<compile_context>
chip_gen: v7x
topology: tpu7x:2x2x1
jax: 0.10.0
libtpu: 0.0.40
codegen_flags: <defaults>
</compile_context>

<pallas_src>
import jax
import jax.numpy as jnp
import numpy as np
from jax.experimental import pallas as pl
from jax.experimental.pallas import tpu as pltpu


# ------------------------------- Pallas kernel ------------------------------ #

def _lenet_kernel(x_ref, m1_ref, b1_ref, m2_ref, b2_ref,
                  f1_ref, fb1_ref, f2_ref, fb2_ref, f3_ref, fb3_ref, o_ref):
    f32 = jnp.float32

    # ---- conv1 (1->6, 5x5) + bias + ReLU + fused 2x2 max-pool -------------
    # x_ref: (2, 18, 8, 28) = input rows split by parity (row = 2k + par),
    # zero padded past row 27; dim 2 is the local batch (8 images).
    m1 = [m1_ref[i] for i in range(5)]            # (28, 256) per kernel row
    pooled1 = None
    for dh in range(2):                           # height pooling phase
        acc = None
        for i in range(5):                        # kernel row tap
            s = dh + i
            xs = x_ref[s % 2, pl.ds(s // 2, 16), :, :]      # (16, 8, 28)
            xs = xs.reshape(16 * 8, 28)                     # rows = u*8 + b
            t = jnp.dot(xs, m1[i], preferred_element_type=f32)
            acc = t if acc is None else acc + t             # (128, 256)
        # width pooling: even/odd output columns live in separate 128-lane halves
        pw = jnp.maximum(acc[:, :128], acc[:, 128:])
        pooled1 = pw if pooled1 is None else jnp.maximum(pooled1, pw)
    h1 = jnp.maximum(pooled1 + b1_ref[...], 0.0)            # (128, 128)
    # h1[u*8 + b, pw*8 + oc] = pooled conv1 activation (u<12, pw<12, oc<6)

    # ---- conv2 (6->16, 5x5) + bias + ReLU + pool, fused with fc1 ----------
    m2 = [m2_ref[i] for i in range(5)]            # (128, 256) per kernel row
    f1 = [f1_ref[q] for q in range(4)]            # (128, 128) per pooled row qh
    b2row = b2_ref[...]
    z1 = None
    for qh in range(4):                           # conv2 pooled output row
        pooled2 = None
        for eh in range(2):                       # height pooling phase
            acc = None
            for i in range(5):                    # kernel row tap
                ph = 2 * qh + eh + i              # conv1 pooled row (< 12)
                rows = h1[ph * 8:(ph + 1) * 8, :]           # (8, 128), rows = b
                t = jnp.dot(rows, m2[i], preferred_element_type=f32)
                acc = t if acc is None else acc + t         # (8, 256)
            pw = jnp.maximum(acc[:, :128], acc[:, 128:])    # width pooling
            pooled2 = pw if pooled2 is None else jnp.maximum(pooled2, pw)
        h2q = jnp.maximum(pooled2 + b2row, 0.0)             # (8, 128)
        # fc1 with the NCHW flatten permutation folded into per-qh weights
        t = jnp.dot(h2q, f1[qh], preferred_element_type=f32)
        z1 = t if z1 is None else z1 + t                    # (8, 128)
    a1 = jnp.maximum(z1 + fb1_ref[...], 0.0)                # 120 real lanes

    # ---- fc2 + fc3 + masked log_softmax over the 10 real classes ----------
    a2 = jnp.maximum(jnp.dot(a1, f2_ref[...], preferred_element_type=f32)
                     + fb2_ref[...], 0.0)                   # 84 real lanes
    z3 = jnp.dot(a2, f3_ref[...], preferred_element_type=f32) + fb3_ref[...]

    lane = jax.lax.broadcasted_iota(jnp.int32, z3.shape, 1)
    valid = lane < 10
    zmax = jnp.max(jnp.where(valid, z3, -jnp.inf), axis=-1, keepdims=True)
    ez = jnp.where(valid, jnp.exp(z3 - zmax), 0.0)
    lse = jnp.log(jnp.sum(ez, axis=-1, keepdims=True))
    o_ref[...] = z3 - zmax - lse          # first 10 lanes are the log-probs


# ------------------------- one-time parameter repack ------------------------ #

def pack_params(params):
    """Repack PyTorch-layout LeNet params into the kernel's structured,
    lane-dense (K/N padded) weight matrices.  Host-side, done once."""
    w1 = np.asarray(params["conv1_w"], np.float32)   # (6, 1, 5, 5)
    b1 = np.asarray(params["conv1_b"], np.float32)   # (6,)
    w2 = np.asarray(params["conv2_w"], np.float32)   # (16, 6, 5, 5)
    b2 = np.asarray(params["conv2_b"], np.float32)   # (16,)
    fw1 = np.asarray(params["fc1_w"], np.float32)    # (120, 256)
    fb1 = np.asarray(params["fc1_b"], np.float32)
    fw2 = np.asarray(params["fc2_w"], np.float32)    # (84, 120)
    fb2 = np.asarray(params["fc2_b"], np.float32)
    fw3 = np.asarray(params["fc3_w"], np.float32)    # (10, 84)
    fb3 = np.asarray(params["fc3_b"], np.float32)

    # conv1: per kernel-row matrices (28 input cols) -> lanes (dw, pw, oc)
    m1 = np.zeros((5, 28, 256), np.float32)
    for i in range(5):
        for dw in range(2):
            for pw in range(12):
                for j in range(5):
                    w = 2 * pw + dw + j
                    for oc in range(6):
                        m1[i, w, dw * 128 + pw * 8 + oc] = w1[oc, 0, i, j]
    b1row = np.zeros((1, 128), np.float32)
    for pw in range(12):
        b1row[0, pw * 8:pw * 8 + 6] = b1

    # conv2: per kernel-row matrices, input lanes (pw, ic) -> lanes (ew, qw, oc)
    m2 = np.zeros((5, 128, 256), np.float32)
    for i in range(5):
        for ew in range(2):
            for qw in range(4):
                for j in range(5):
                    pw = 2 * qw + ew + j
                    for oc in range(16):
                        for ic in range(6):
                            m2[i, pw * 8 + ic, ew * 128 + qw * 16 + oc] = w2[oc, ic, i, j]
    b2row = np.zeros((1, 128), np.float32)
    for qw in range(4):
        b2row[0, qw * 16:qw * 16 + 16] = b2

    # fc1: fold the NCHW flatten (f = oc*16 + qh*4 + qw) into per-qh blocks
    f1p = np.zeros((4, 128, 128), np.float32)
    for qh in range(4):
        for qw in range(4):
            for oc in range(16):
                f1p[qh, qw * 16 + oc, :120] = fw1[:, oc * 16 + qh * 4 + qw]
    fb1row = np.zeros((1, 128), np.float32)
    fb1row[0, :120] = fb1

    f2p = np.zeros((128, 128), np.float32)
    f2p[:120, :84] = fw2.T
    fb2row = np.zeros((1, 128), np.float32)
    fb2row[0, :84] = fb2

    f3p = np.zeros((128, 128), np.float32)
    f3p[:84, :10] = fw3.T
    fb3row = np.zeros((1, 128), np.float32)
    fb3row[0, :10] = fb3

    packed = dict(m1=m1, b1=b1row, m2=m2, b2=b2row, f1=f1p, fb1=fb1row,
                  f2=f2p, fb2=fb2row, f3=f3p, fb3=fb3row)
    return {k: jnp.asarray(v) for k, v in packed.items()}


# --------------------------------- wrapper ---------------------------------- #

def lenet_apply(packed, x):
    """x: (B, 1, 28, 28) float32 NCHW -> (B, 10) log-probs."""
    B = x.shape[0]
    assert x.shape[1:] == (1, 28, 28)
    Bp = ((B + 7) // 8) * 8                      # batch tile = 8 images

    # cheap glue: squeeze channel, zero-pad batch to 8 and rows to 36,
    # split rows by parity, batch-minor layout -> (2, 18, Bp, 28)
    x2 = x[:, 0, :, :].astype(jnp.float32)
    x2 = jnp.pad(x2, ((0, Bp - B), (0, 8), (0, 0)))
    xs = x2.reshape(Bp, 18, 2, 28).transpose(2, 1, 0, 3)

    grid = (Bp // 8,)
    w3 = lambda shape: pl.BlockSpec(shape, lambda g: (0, 0, 0))   # resident weights
    w2_ = lambda shape: pl.BlockSpec(shape, lambda g: (0, 0))

    out = pl.pallas_call(
        _lenet_kernel,
        out_shape=jax.ShapeDtypeStruct((Bp, 128), jnp.float32),
        grid=grid,
        in_specs=[
            pl.BlockSpec((2, 18, 8, 28), lambda g: (0, 0, g, 0)),  # input tile
            w3((5, 28, 256)),    # conv1 structured weights
            w2_((1, 128)),       # conv1 bias row
            w3((5, 128, 256)),   # conv2 structured weights
            w2_((1, 128)),       # conv2 bias row
            w3((4, 128, 128)),   # fc1 (flatten folded, per-qh)
            w2_((1, 128)),       # fc1 bias
            w2_((128, 128)),     # fc2
            w2_((1, 128)),       # fc2 bias
            w2_((128, 128)),     # fc3
            w2_((1, 128)),       # fc3 bias
        ],
        out_specs=pl.BlockSpec((8, 128), lambda g: (g, 0)),
        compiler_params=pltpu.CompilerParams(
            dimension_semantics=("parallel",),
            vmem_limit_bytes=32 * 1024 * 1024,
        ),
    )(xs, packed["m1"], packed["b1"], packed["m2"], packed["b2"],
      packed["f1"], packed["fb1"], packed["f2"], packed["fb2"],
      packed["f3"], packed["fb3"])
    return out[:B, :10]


# ------------------------- params & pure-JAX reference ---------------------- #

def init_params(key):
    def uniform(k, shape, fan_in):
        bound = 1.0 / jnp.sqrt(jnp.float32(fan_in))
        return jax.random.uniform(k, shape, jnp.float32, -bound, bound)

    ks = jax.random.split(key, 10)
    return {
        "conv1_w": uniform(ks[0], (6, 1, 5, 5), 1 * 5 * 5),
        "conv1_b": uniform(ks[1], (6,), 1 * 5 * 5),
        "conv2_w": uniform(ks[2], (16, 6, 5, 5), 6 * 5 * 5),
        "conv2_b": uniform(ks[3], (16,), 6 * 5 * 5),
        "fc1_w": uniform(ks[4], (120, 256), 256),
        "fc1_b": uniform(ks[5], (120,), 256),
        "fc2_w": uniform(ks[6], (84, 120), 120),
        "fc2_b": uniform(ks[7], (84,), 120),
        "fc3_w": uniform(ks[8], (10, 84), 84),
        "fc3_b": uniform(ks[9], (10,), 84),
    }


def lenet_reference(params, x):
    """Pure-JAX/XLA reference matching the PyTorch module (for validation)."""
    hi = jax.lax.Precision.HIGHEST
    x = x.astype(jnp.float32)
    y = jax.lax.conv_general_dilated(
        x, params["conv1_w"], (1, 1), "VALID",
        dimension_numbers=("NCHW", "OIHW", "NCHW"), precision=hi)
    y = jax.nn.relu(y + params["conv1_b"][None, :, None, None])
    y = jax.lax.reduce_window(y, -jnp.inf, jax.lax.max,
                              (1, 1, 2, 2), (1, 1, 2, 2), "VALID")
    y = jax.lax.conv_general_dilated(
        y, params["conv2_w"], (1, 1), "VALID",
        dimension_numbers=("NCHW", "OIHW", "NCHW"), precision=hi)
    y = jax.nn.relu(y + params["conv2_b"][None, :, None, None])
    y = jax.lax.reduce_window(y, -jnp.inf, jax.lax.max,
                              (1, 1, 2, 2), (1, 1, 2, 2), "VALID")
    y = y.reshape(y.shape[0], -1)
    y = jax.nn.relu(jnp.dot(y, params["fc1_w"].T, precision=hi) + params["fc1_b"])
    y = jax.nn.relu(jnp.dot(y, params["fc2_w"].T, precision=hi) + params["fc2_b"])
    y = jnp.dot(y, params["fc3_w"].T, precision=hi) + params["fc3_b"]
    return jax.nn.log_softmax(y, axis=-1)


if __name__ == "__main__":
    key = jax.random.PRNGKey(0)
    pkey, xkey = jax.random.split(key)
    params = init_params(pkey)
    x = jax.random.normal(xkey, (2, 1, 28, 28), jnp.float32)

    packed = pack_params(params)                     # one-time repack
    out = jax.block_until_ready(jax.jit(lenet_apply)(packed, x))

    assert out.shape == (2, 10) and out.dtype == jnp.float32
    assert bool(jnp.allclose(jnp.sum(jnp.exp(out), axis=1), 1.0, atol=1e-4))

    ref = jax.block_until_ready(jax.jit(lenet_reference)(params, x))
    max_err = float(jnp.max(jnp.abs(out - ref)))
    assert max_err < 1e-2, f"mismatch vs reference: {max_err}"
    print("KERNEL_OK")
</pallas_src>

<mosaic_0001>
module attributes {stable_mosaic.version = 11 : i64} {
  func.func @_lenet_kernel(%arg0: i32, %arg1: memref<2x18x8x28xf32, #tpu.memory_space<vmem>>, %arg2: memref<5x28x256xf32, #tpu.memory_space<vmem>>, %arg3: memref<1x128xf32, #tpu.memory_space<vmem>>, %arg4: memref<5x128x256xf32, #tpu.memory_space<vmem>>, %arg5: memref<1x128xf32, #tpu.memory_space<vmem>>, %arg6: memref<4x128x128xf32, #tpu.memory_space<vmem>>, %arg7: memref<1x128xf32, #tpu.memory_space<vmem>>, %arg8: memref<128x128xf32, #tpu.memory_space<vmem>>, %arg9: memref<1x128xf32, #tpu.memory_space<vmem>>, %arg10: memref<128x128xf32, #tpu.memory_space<vmem>>, %arg11: memref<1x128xf32, #tpu.memory_space<vmem>>, %arg12: memref<8x128xf32, #tpu.memory_space<vmem>>) attributes {dimension_semantics = [#tpu.dimension_semantics<parallel>], iteration_bounds = array<i64: 1>, scalar_prefetch = 0 : i64, scratch_operands = 0 : i64, tpu.core_type = #tpu.core_type<tc>, window_params = [{transform_indices = @transform_0, window_bounds = array<i64: 2, 18, 8, 28>}, {pipeline_mode = #tpu.pipeline_mode<synchronous>, transform_indices = @transform_1, window_bounds = array<i64: 5, 28, 256>}, {pipeline_mode = #tpu.pipeline_mode<synchronous>, transform_indices = @transform_2, window_bounds = array<i64: 1, 128>}, {pipeline_mode = #tpu.pipeline_mode<synchronous>, transform_indices = @transform_3, window_bounds = array<i64: 5, 128, 256>}, {pipeline_mode = #tpu.pipeline_mode<synchronous>, transform_indices = @transform_4, window_bounds = array<i64: 1, 128>}, {pipeline_mode = #tpu.pipeline_mode<synchronous>, transform_indices = @transform_5, window_bounds = array<i64: 4, 128, 128>}, {pipeline_mode = #tpu.pipeline_mode<synchronous>, transform_indices = @transform_6, window_bounds = array<i64: 1, 128>}, {pipeline_mode = #tpu.pipeline_mode<synchronous>, transform_indices = @transform_7, window_bounds = array<i64: 128, 128>}, {pipeline_mode = #tpu.pipeline_mode<synchronous>, transform_indices = @transform_8, window_bounds = array<i64: 1, 128>}, {pipeline_mode = #tpu.pipeline_mode<synchronous>, transform_indices = @transform_9, window_bounds = array<i64: 128, 128>}, {pipeline_mode = #tpu.pipeline_mode<synchronous>, transform_indices = @transform_10, window_bounds = array<i64: 1, 128>}, {transform_indices = @transform_11, window_bounds = array<i64: 8, 128>}]} {
    %c0 = arith.constant 0 : index
    %c0_0 = arith.constant 0 : index
    %c0_1 = arith.constant 0 : index
    %0 = vector.load %arg2[%c0, %c0_0, %c0_1] : memref<5x28x256xf32, #tpu.memory_space<vmem>>, vector<1x28x256xf32>
    %1 = vector.shape_cast %0 : vector<1x28x256xf32> to vector<28x256xf32>
    %c1 = arith.constant 1 : index
    %c0_2 = arith.constant 0 : index
    %c0_3 = arith.constant 0 : index
    %2 = vector.load %arg2[%c1, %c0_2, %c0_3] : memref<5x28x256xf32, #tpu.memory_space<vmem>>, vector<1x28x256xf32>
    %3 = vector.shape_cast %2 : vector<1x28x256xf32> to vector<28x256xf32>
    %c2 = arith.constant 2 : index
    %c0_4 = arith.constant 0 : index
    %c0_5 = arith.constant 0 : index
    %4 = vector.load %arg2[%c2, %c0_4, %c0_5] : memref<5x28x256xf32, #tpu.memory_space<vmem>>, vector<1x28x256xf32>
    %5 = vector.shape_cast %4 : vector<1x28x256xf32> to vector<28x256xf32>
    %c3 = arith.constant 3 : index
    %c0_6 = arith.constant 0 : index
    %c0_7 = arith.constant 0 : index
    %6 = vector.load %arg2[%c3, %c0_6, %c0_7] : memref<5x28x256xf32, #tpu.memory_space<vmem>>, vector<1x28x256xf32>
    %7 = vector.shape_cast %6 : vector<1x28x256xf32> to vector<28x256xf32>
    %c4 = arith.constant 4 : index
    %c0_8 = arith.constant 0 : index
    %c0_9 = arith.constant 0 : index
    %8 = vector.load %arg2[%c4, %c0_8, %c0_9] : memref<5x28x256xf32, #tpu.memory_space<vmem>>, vector<1x28x256xf32>
    %9 = vector.shape_cast %8 : vector<1x28x256xf32> to vector<28x256xf32>
    %c0_10 = arith.constant 0 : index
    %c0_11 = arith.constant 0 : index
    %c0_12 = arith.constant 0 : index
    %c0_13 = arith.constant 0 : index
    %10 = vector.load %arg1[%c0_10, %c0_11, %c0_12, %c0_13] : memref<2x18x8x28xf32, #tpu.memory_space<vmem>>, vector<1x16x8x28xf32>
    %11 = vector.shape_cast %10 : vector<1x16x8x28xf32> to vector<16x8x28xf32>
    %12 = vector.shape_cast %11 : vector<16x8x28xf32> to vector<128x28xf32>
    %cst = arith.constant dense<0.000000e+00> : vector<128x256xf32>
    %13 = tpu.matmul %12, %1, %cst {dimension_numbers = #tpu.dot_dimension_numbers<[1], [0], [0], [1], [0, 0, 1, 1], [], []>} : vector<128x28xf32>, vector<28x256xf32>, vector<128x256xf32> -> vector<128x256xf32>
    %c1_14 = arith.constant 1 : index
    %c0_15 = arith.constant 0 : index
    %c0_16 = arith.constant 0 : index
    %c0_17 = arith.constant 0 : index
    %14 = vector.load %arg1[%c1_14, %c0_15, %c0_16, %c0_17] : memref<2x18x8x28xf32, #tpu.memory_space<vmem>>, vector<1x16x8x28xf32>
    %15 = vector.shape_cast %14 : vector<1x16x8x28xf32> to vector<16x8x28xf32>
    %16 = vector.shape_cast %15 : vector<16x8x28xf32> to vector<128x28xf32>
    %cst_18 = arith.constant dense<0.000000e+00> : vector<128x256xf32>
    %17 = tpu.matmul %16, %3, %cst_18 {dimension_numbers = #tpu.dot_dimension_numbers<[1], [0], [0], [1], [0, 0, 1, 1], [], []>} : vector<128x28xf32>, vector<28x256xf32>, vector<128x256xf32> -> vector<128x256xf32>
    %18 = arith.addf %13, %17 : vector<128x256xf32>
    %c0_19 = arith.constant 0 : index
    %c1_20 = arith.constant 1 : index
    %c0_21 = arith.constant 0 : index
    %c0_22 = arith.constant 0 : index
    %19 = vector.load %arg1[%c0_19, %c1_20, %c0_21, %c0_22] : memref<2x18x8x28xf32, #tpu.memory_space<vmem>>, vector<1x16x8x28xf32>
    %20 = vector.shape_cast %19 : vector<1x16x8x28xf32> to vector<16x8x28xf32>
    %21 = vector.shape_cast %20 : vector<16x8x28xf32> to vector<128x28xf32>
    %cst_23 = arith.constant dense<0.000000e+00> : vector<128x256xf32>
    %22 = tpu.matmul %21, %5, %cst_23 {dimension_numbers = #tpu.dot_dimension_numbers<[1], [0], [0], [1], [0, 0, 1, 1], [], []>} : vector<128x28xf32>, vector<28x256xf32>, vector<128x256xf32> -> vector<128x256xf32>
    %23 = arith.addf %18, %22 : vector<128x256xf32>
    %c1_24 = arith.constant 1 : index
    %c1_25 = arith.constant 1 : index
    %c0_26 = arith.constant 0 : index
    %c0_27 = arith.constant 0 : index
    %24 = vector.load %arg1[%c1_24, %c1_25, %c0_26, %c0_27] : memref<2x18x8x28xf32, #tpu.memory_space<vmem>>, vector<1x16x8x28xf32>
    %25 = vector.shape_cast %24 : vector<1x16x8x28xf32> to vector<16x8x28xf32>
    %26 = vector.shape_cast %25 : vector<16x8x28xf32> to vector<128x28xf32>
    %cst_28 = arith.constant dense<0.000000e+00> : vector<128x256xf32>
    %27 = tpu.matmul %26, %7, %cst_28 {dimension_numbers = #tpu.dot_dimension_numbers<[1], [0], [0], [1], [0, 0, 1, 1], [], []>} : vector<128x28xf32>, vector<28x256xf32>, vector<128x256xf32> -> vector<128x256xf32>
    %28 = arith.addf %23, %27 : vector<128x256xf32>
    %c0_29 = arith.constant 0 : index
    %c2_30 = arith.constant 2 : index
    %c0_31 = arith.constant 0 : index
    %c0_32 = arith.constant 0 : index
    %29 = vector.load %arg1[%c0_29, %c2_30, %c0_31, %c0_32] : memref<2x18x8x28xf32, #tpu.memory_space<vmem>>, vector<1x16x8x28xf32>
    %30 = vector.shape_cast %29 : vector<1x16x8x28xf32> to vector<16x8x28xf32>
    %31 = vector.shape_cast %30 : vector<16x8x28xf32> to vector<128x28xf32>
    %cst_33 = arith.constant dense<0.000000e+00> : vector<128x256xf32>
    %32 = tpu.matmul %31, %9, %cst_33 {dimension_numbers = #tpu.dot_dimension_numbers<[1], [0], [0], [1], [0, 0, 1, 1], [], []>} : vector<128x28xf32>, vector<28x256xf32>, vector<128x256xf32> -> vector<128x256xf32>
    %33 = arith.addf %28, %32 : vector<128x256xf32>
    %34 = vector.extract_strided_slice %33 {offsets = [0, 0], sizes = [128, 128], strides = [1, 1]} : vector<128x256xf32> to vector<128x128xf32>
    %35 = vector.extract_strided_slice %33 {offsets = [0, 128], sizes = [128, 128], strides = [1, 1]} : vector<128x256xf32> to vector<128x128xf32>
    %36 = arith.maximumf %34, %35 : vector<128x128xf32>
    %c1_34 = arith.constant 1 : index
    %c0_35 = arith.constant 0 : index
    %c0_36 = arith.constant 0 : index
    %c0_37 = arith.constant 0 : index
    %37 = vector.load %arg1[%c1_34, %c0_35, %c0_36, %c0_37] : memref<2x18x8x28xf32, #tpu.memory_space<vmem>>, vector<1x16x8x28xf32>
    %38 = vector.shape_cast %37 : vector<1x16x8x28xf32> to vector<16x8x28xf32>
    %39 = vector.shape_cast %38 : vector<16x8x28xf32> to vector<128x28xf32>
    %cst_38 = arith.constant dense<0.000000e+00> : vector<128x256xf32>
    %40 = tpu.matmul %39, %1, %cst_38 {dimension_numbers = #tpu.dot_dimension_numbers<[1], [0], [0], [1], [0, 0, 1, 1], [], []>} : vector<128x28xf32>, vector<28x256xf32>, vector<128x256xf32> -> vector<128x256xf32>
    %c0_39 = arith.constant 0 : index
    %c1_40 = arith.constant 1 : index
    %c0_41 = arith.constant 0 : index
    %c0_42 = arith.constant 0 : index
    %41 = vector.load %arg1[%c0_39, %c1_40, %c0_41, %c0_42] : memref<2x18x8x28xf32, #tpu.memory_space<vmem>>, vector<1x16x8x28xf32>
    %42 = vector.shape_cast %41 : vector<1x16x8x28xf32> to vector<16x8x28xf32>
    %43 = vector.shape_cast %42 : vector<16x8x28xf32> to vector<128x28xf32>
    %cst_43 = arith.constant dense<0.000000e+00> : vector<128x256xf32>
    %44 = tpu.matmul %43, %3, %cst_43 {dimension_numbers = #tpu.dot_dimension_numbers<[1], [0], [0], [1], [0, 0, 1, 1], [], []>} : vector<128x28xf32>, vector<28x256xf32>, vector<128x256xf32> -> vector<128x256xf32>
    %45 = arith.addf %40, %44 : vector<128x256xf32>
    %c1_44 = arith.constant 1 : index
    %c1_45 = arith.constant 1 : index
    %c0_46 = arith.constant 0 : index
    %c0_47 = arith.constant 0 : index
    %46 = vector.load %arg1[%c1_44, %c1_45, %c0_46, %c0_47] : memref<2x18x8x28xf32, #tpu.memory_space<vmem>>, vector<1x16x8x28xf32>
    %47 = vector.shape_cast %46 : vector<1x16x8x28xf32> to vector<16x8x28xf32>
    %48 = vector.shape_cast %47 : vector<16x8x28xf32> to vector<128x28xf32>
    %cst_48 = arith.constant dense<0.000000e+00> : vector<128x256xf32>
    %49 = tpu.matmul %48, %5, %cst_48 {dimension_numbers = #tpu.dot_dimension_numbers<[1], [0], [0], [1], [0, 0, 1, 1], [], []>} : vector<128x28xf32>, vector<28x256xf32>, vector<128x256xf32> -> vector<128x256xf32>
    %50 = arith.addf %45, %49 : vector<128x256xf32>
    %c0_49 = arith.constant 0 : index
    %c2_50 = arith.constant 2 : index
    %c0_51 = arith.constant 0 : index
    %c0_52 = arith.constant 0 : index
    %51 = vector.load %arg1[%c0_49, %c2_50, %c0_51, %c0_52] : memref<2x18x8x28xf32, #tpu.memory_space<vmem>>, vector<1x16x8x28xf32>
    %52 = vector.shape_cast %51 : vector<1x16x8x28xf32> to vector<16x8x28xf32>
    %53 = vector.shape_cast %52 : vector<16x8x28xf32> to vector<128x28xf32>
    %cst_53 = arith.constant dense<0.000000e+00> : vector<128x256xf32>
    %54 = tpu.matmul %53, %7, %cst_53 {dimension_numbers = #tpu.dot_dimension_numbers<[1], [0], [0], [1], [0, 0, 1, 1], [], []>} : vector<128x28xf32>, vector<28x256xf32>, vector<128x256xf32> -> vector<128x256xf32>
    %55 = arith.addf %50, %54 : vector<128x256xf32>
    %c1_54 = arith.constant 1 : index
    %c2_55 = arith.constant 2 : index
    %c0_56 = arith.constant 0 : index
    %c0_57 = arith.constant 0 : index
    %56 = vector.load %arg1[%c1_54, %c2_55, %c0_56, %c0_57] : memref<2x18x8x28xf32, #tpu.memory_space<vmem>>, vector<1x16x8x28xf32>
    %57 = vector.shape_cast %56 : vector<1x16x8x28xf32> to vector<16x8x28xf32>
    %58 = vector.shape_cast %57 : vector<16x8x28xf32> to vector<128x28xf32>
    %cst_58 = arith.constant dense<0.000000e+00> : vector<128x256xf32>
    %59 = tpu.matmul %58, %9, %cst_58 {dimension_numbers = #tpu.dot_dimension_numbers<[1], [0], [0], [1], [0, 0, 1, 1], [], []>} : vector<128x28xf32>, vector<28x256xf32>, vector<128x256xf32> -> vector<128x256xf32>
    %60 = arith.addf %55, %59 : vector<128x256xf32>
    %61 = vector.extract_strided_slice %60 {offsets = [0, 0], sizes = [128, 128], strides = [1, 1]} : vector<128x256xf32> to vector<128x128xf32>
    %62 = vector.extract_strided_slice %60 {offsets = [0, 128], sizes = [128, 128], strides = [1, 1]} : vector<128x256xf32> to vector<128x128xf32>
    %63 = arith.maximumf %61, %62 : vector<128x128xf32>
    %64 = arith.maximumf %36, %63 : vector<128x128xf32>
    %c0_59 = arith.constant 0 : index
    %c0_60 = arith.constant 0 : index
    %65 = vector.load %arg3[%c0_59, %c0_60] : memref<1x128xf32, #tpu.memory_space<vmem>>, vector<1x128xf32>
    %66 = vector.broadcast %65 : vector<1x128xf32> to vector<128x128xf32>
    %67 = arith.addf %64, %66 : vector<128x128xf32>
    %cst_61 = arith.constant 0.000000e+00 : f32
    %68 = vector.broadcast %cst_61 : f32 to vector<128x128xf32>
    %69 = arith.maximumf %67, %68 : vector<128x128xf32>
    %c0_62 = arith.constant 0 : index
    %c0_63 = arith.constant 0 : index
    %c0_64 = arith.constant 0 : index
    %70 = vector.load %arg4[%c0_62, %c0_63, %c0_64] : memref<5x128x256xf32, #tpu.memory_space<vmem>>, vector<1x128x256xf32>
    %71 = vector.shape_cast %70 : vector<1x128x256xf32> to vector<128x256xf32>
    %c1_65 = arith.constant 1 : index
    %c0_66 = arith.constant 0 : index
    %c0_67 = arith.constant 0 : index
    %72 = vector.load %arg4[%c1_65, %c0_66, %c0_67] : memref<5x128x256xf32, #tpu.memory_space<vmem>>, vector<1x128x256xf32>
    %73 = vector.shape_cast %72 : vector<1x128x256xf32> to vector<128x256xf32>
    %c2_68 = arith.constant 2 : index
    %c0_69 = arith.constant 0 : index
    %c0_70 = arith.constant 0 : index
    %74 = vector.load %arg4[%c2_68, %c0_69, %c0_70] : memref<5x128x256xf32, #tpu.memory_space<vmem>>, vector<1x128x256xf32>
    %75 = vector.shape_cast %74 : vector<1x128x256xf32> to vector<128x256xf32>
    %c3_71 = arith.constant 3 : index
    %c0_72 = arith.constant 0 : index
    %c0_73 = arith.constant 0 : index
    %76 = vector.load %arg4[%c3_71, %c0_72, %c0_73] : memref<5x128x256xf32, #tpu.memory_space<vmem>>, vector<1x128x256xf32>
    %77 = vector.shape_cast %76 : vector<1x128x256xf32> to vector<128x256xf32>
    %c4_74 = arith.constant 4 : index
    %c0_75 = arith.constant 0 : index
    %c0_76 = arith.constant 0 : index
    %78 = vector.load %arg4[%c4_74, %c0_75, %c0_76] : memref<5x128x256xf32, #tpu.memory_space<vmem>>, vector<1x128x256xf32>
    %79 = vector.shape_cast %78 : vector<1x128x256xf32> to vector<128x256xf32>
    %c0_77 = arith.constant 0 : index
    %c0_78 = arith.constant 0 : index
    %c0_79 = arith.constant 0 : index
    %80 = vector.load %arg6[%c0_77, %c0_78, %c0_79] : memref<4x128x128xf32, #tpu.memory_space<vmem>>, vector<1x128x128xf32>
    %81 = vector.shape_cast %80 : vector<1x128x128xf32> to vector<128x128xf32>
    %c1_80 = arith.constant 1 : index
    %c0_81 = arith.constant 0 : index
    %c0_82 = arith.constant 0 : index
    %82 = vector.load %arg6[%c1_80, %c0_81, %c0_82] : memref<4x128x128xf32, #tpu.memory_space<vmem>>, vector<1x128x128xf32>
    %83 = vector.shape_cast %82 : vector<1x128x128xf32> to vector<128x128xf32>
    %c2_83 = arith.constant 2 : index
    %c0_84 = arith.constant 0 : index
    %c0_85 = arith.constant 0 : index
    %84 = vector.load %arg6[%c2_83, %c0_84, %c0_85] : memref<4x128x128xf32, #tpu.memory_space<vmem>>, vector<1x128x128xf32>
    %85 = vector.shape_cast %84 : vector<1x128x128xf32> to vector<128x128xf32>
    %c3_86 = arith.constant 3 : index
    %c0_87 = arith.constant 0 : index
    %c0_88 = arith.constant 0 : index
    %86 = vector.load %arg6[%c3_86, %c0_87, %c0_88] : memref<4x128x128xf32, #tpu.memory_space<vmem>>, vector<1x128x128xf32>
    %87 = vector.shape_cast %86 : vector<1x128x128xf32> to vector<128x128xf32>
    %c0_89 = arith.constant 0 : index
    %c0_90 = arith.constant 0 : index
    %88 = vector.load %arg5[%c0_89, %c0_90] : memref<1x128xf32, #tpu.memory_space<vmem>>, vector<1x128xf32>
    %89 = vector.extract_strided_slice %69 {offsets = [0, 0], sizes = [8, 128], strides = [1, 1]} : vector<128x128xf32> to vector<8x128xf32>
    %cst_91 = arith.constant dense<0.000000e+00> : vector<8x256xf32>
    %90 = tpu.matmul %89, %71, %cst_91 {dimension_numbers = #tpu.dot_dimension_numbers<[1], [0], [0], [1], [0, 0, 1, 1], [], []>} : vector<8x128xf32>, vector<128x256xf32>, vector<8x256xf32> -> vector<8x256xf32>
    %91 = vector.extract_strided_slice %69 {offsets = [8, 0], sizes = [8, 128], strides = [1, 1]} : vector<128x128xf32> to vector<8x128xf32>
    %cst_92 = arith.constant dense<0.000000e+00> : vector<8x256xf32>
    %92 = tpu.matmul %91, %73, %cst_92 {dimension_numbers = #tpu.dot_dimension_numbers<[1], [0], [0], [1], [0, 0, 1, 1], [], []>} : vector<8x128xf32>, vector<128x256xf32>, vector<8x256xf32> -> vector<8x256xf32>
    %93 = arith.addf %90, %92 : vector<8x256xf32>
    %94 = vector.extract_strided_slice %69 {offsets = [16, 0], sizes = [8, 128], strides = [1, 1]} : vector<128x128xf32> to vector<8x128xf32>
    %cst_93 = arith.constant dense<0.000000e+00> : vector<8x256xf32>
    %95 = tpu.matmul %94, %75, %cst_93 {dimension_numbers = #tpu.dot_dimension_numbers<[1], [0], [0], [1], [0, 0, 1, 1], [], []>} : vector<8x128xf32>, vector<128x256xf32>, vector<8x256xf32> -> vector<8x256xf32>
    %96 = arith.addf %93, %95 : vector<8x256xf32>
    %97 = vector.extract_strided_slice %69 {offsets = [24, 0], sizes = [8, 128], strides = [1, 1]} : vector<128x128xf32> to vector<8x128xf32>
    %cst_94 = arith.constant dense<0.000000e+00> : vector<8x256xf32>
    %98 = tpu.matmul %97, %77, %cst_94 {dimension_numbers = #tpu.dot_dimension_numbers<[1], [0], [0], [1], [0, 0, 1, 1], [], []>} : vector<8x128xf32>, vector<128x256xf32>, vector<8x256xf32> -> vector<8x256xf32>
    %99 = arith.addf %96, %98 : vector<8x256xf32>
    %100 = vector.extract_strided_slice %69 {offsets = [32, 0], sizes = [8, 128], strides = [1, 1]} : vector<128x128xf32> to vector<8x128xf32>
    %cst_95 = arith.constant dense<0.000000e+00> : vector<8x256xf32>
    %101 = tpu.matmul %100, %79, %cst_95 {dimension_numbers = #tpu.dot_dimension_numbers<[1], [0], [0], [1], [0, 0, 1, 1], [], []>} : vector<8x128xf32>, vector<128x256xf32>, vector<8x256xf32> -> vector<8x256xf32>
    %102 = arith.addf %99, %101 : vector<8x256xf32>
    %103 = vector.extract_strided_slice %102 {offsets = [0, 0], sizes = [8, 128], strides = [1, 1]} : vector<8x256xf32> to vector<8x128xf32>
    %104 = vector.extract_strided_slice %102 {offsets = [0, 128], sizes = [8, 128], strides = [1, 1]} : vector<8x256xf32> to vector<8x128xf32>
    %105 = arith.maximumf %103, %104 : vector<8x128xf32>
    %106 = vector.extract_strided_slice %69 {offsets = [8, 0], sizes = [8, 128], strides = [1, 1]} : vector<128x128xf32> to vector<8x128xf32>
    %cst_96 = arith.constant dense<0.000000e+00> : vector<8x256xf32>
    %107 = tpu.matmul %106, %71, %cst_96 {dimension_numbers = #tpu.dot_dimension_numbers<[1], [0], [0], [1], [0, 0, 1, 1], [], []>} : vector<8x128xf32>, vector<128x256xf32>, vector<8x256xf32> -> vector<8x256xf32>
    %108 = vector.extract_strided_slice %69 {offsets = [16, 0], sizes = [8, 128], strides = [1, 1]} : vector<128x128xf32> to vector<8x128xf32>
    %cst_97 = arith.constant dense<0.000000e+00> : vector<8x256xf32>
    %109 = tpu.matmul %108, %73, %cst_97 {dimension_numbers = #tpu.dot_dimension_numbers<[1], [0], [0], [1], [0, 0, 1, 1], [], []>} : vector<8x128xf32>, vector<128x256xf32>, vector<8x256xf32> -> vector<8x256xf32>
    %110 = arith.addf %107, %109 : vector<8x256xf32>
    %111 = vector.extract_strided_slice %69 {offsets = [24, 0], sizes = [8, 128], strides = [1, 1]} : vector<128x128xf32> to vector<8x128xf32>
    %cst_98 = arith.constant dense<0.000000e+00> : vector<8x256xf32>
    %112 = tpu.matmul %111, %75, %cst_98 {dimension_numbers = #tpu.dot_dimension_numbers<[1], [0], [0], [1], [0, 0, 1, 1], [], []>} : vector<8x128xf32>, vector<128x256xf32>, vector<8x256xf32> -> vector<8x256xf32>
    %113 = arith.addf %110, %112 : vector<8x256xf32>
    %114 = vector.extract_strided_slice %69 {offsets = [32, 0], sizes = [8, 128], strides = [1, 1]} : vector<128x128xf32> to vector<8x128xf32>
    %cst_99 = arith.constant dense<0.000000e+00> : vector<8x256xf32>
    %115 = tpu.matmul %114, %77, %cst_99 {dimension_numbers = #tpu.dot_dimension_numbers<[1], [0], [0], [1], [0, 0, 1, 1], [], []>} : vector<8x128xf32>, vector<128x256xf32>, vector<8x256xf32> -> vector<8x256xf32>
    %116 = arith.addf %113, %115 : vector<8x256xf32>
    %117 = vector.extract_strided_slice %69 {offsets = [40, 0], sizes = [8, 128], strides = [1, 1]} : vector<128x128xf32> to vector<8x128xf32>
    %cst_100 = arith.constant dense<0.000000e+00> : vector<8x256xf32>
    %118 = tpu.matmul %117, %79, %cst_100 {dimension_numbers = #tpu.dot_dimension_numbers<[1], [0], [0], [1], [0, 0, 1, 1], [], []>} : vector<8x128xf32>, vector<128x256xf32>, vector<8x256xf32> -> vector<8x256xf32>
    %119 = arith.addf %116, %118 : vector<8x256xf32>
    %120 = vector.extract_strided_slice %119 {offsets = [0, 0], sizes = [8, 128], strides = [1, 1]} : vector<8x256xf32> to vector<8x128xf32>
    %121 = vector.extract_strided_slice %119 {offsets = [0, 128], sizes = [8, 128], strides = [1, 1]} : vector<8x256xf32> to vector<8x128xf32>
    %122 = arith.maximumf %120, %121 : vector<8x128xf32>
    %123 = arith.maximumf %105, %122 : vector<8x128xf32>
    %124 = vector.broadcast %88 : vector<1x128xf32> to vector<8x128xf32>
    %125 = arith.addf %123, %124 : vector<8x128xf32>
    %cst_101 = arith.constant 0.000000e+00 : f32
    %126 = vector.broadcast %cst_101 : f32 to vector<8x128xf32>
    %127 = arith.maximumf %125, %126 : vector<8x128xf32>
    %cst_102 = arith.constant dense<0.000000e+00> : vector<8x128xf32>
    %128 = tpu.matmul %127, %81, %cst_102 {dimension_numbers = #tpu.dot_dimension_numbers<[1], [0], [0], [1], [0, 0, 1, 1], [], []>} : vector<8x128xf32>, vector<128x128xf32>, vector<8x128xf32> -> vector<8x128xf32>
    %129 = vector.extract_strided_slice %69 {offsets = [16, 0], sizes = [8, 128], strides = [1, 1]} : vector<128x128xf32> to vector<8x128xf32>
    %cst_103 = arith.constant dense<0.000000e+00> : vector<8x256xf32>
    %130 = tpu.matmul %129, %71, %cst_103 {dimension_numbers = #tpu.dot_dimension_numbers<[1], [0], [0], [1], [0, 0, 1, 1], [], []>} : vector<8x128xf32>, vector<128x256xf32>, vector<8x256xf32> -> vector<8x256xf32>
    %131 = vector.extract_strided_slice %69 {offsets = [24, 0], sizes = [8, 128], strides = [1, 1]} : vector<128x128xf32> to vector<8x128xf32>
    %cst_104 = arith.constant dense<0.000000e+00> : vector<8x256xf32>
    %132 = tpu.matmul %131, %73, %cst_104 {dimension_numbers = #tpu.dot_dimension_numbers<[1], [0], [0], [1], [0, 0, 1, 1], [], []>} : vector<8x128xf32>, vector<128x256xf32>, vector<8x256xf32> -> vector<8x256xf32>
    %133 = arith.addf %130, %132 : vector<8x256xf32>
    %134 = vector.extract_strided_slice %69 {offsets = [32, 0], sizes = [8, 128], strides = [1, 1]} : vector<128x128xf32> to vector<8x128xf32>
    %cst_105 = arith.constant dense<0.000000e+00> : vector<8x256xf32>
    %135 = tpu.matmul %134, %75, %cst_105 {dimension_numbers = #tpu.dot_dimension_numbers<[1], [0], [0], [1], [0, 0, 1, 1], [], []>} : vector<8x128xf32>, vector<128x256xf32>, vector<8x256xf32> -> vector<8x256xf32>
    %136 = arith.addf %133, %135 : vector<8x256xf32>
    %137 = vector.extract_strided_slice %69 {offsets = [40, 0], sizes = [8, 128], strides = [1, 1]} : vector<128x128xf32> to vector<8x128xf32>
    %cst_106 = arith.constant dense<0.000000e+00> : vector<8x256xf32>
    %138 = tpu.matmul %137, %77, %cst_106 {dimension_numbers = #tpu.dot_dimension_numbers<[1], [0], [0], [1], [0, 0, 1, 1], [], []>} : vector<8x128xf32>, vector<128x256xf32>, vector<8x256xf32> -> vector<8x256xf32>
    %139 = arith.addf %136, %138 : vector<8x256xf32>
    %140 = vector.extract_strided_slice %69 {offsets = [48, 0], sizes = [8, 128], strides = [1, 1]} : vector<128x128xf32> to vector<8x128xf32>
    %cst_107 = arith.constant dense<0.000000e+00> : vector<8x256xf32>
    %141 = tpu.matmul %140, %79, %cst_107 {dimension_numbers = #tpu.dot_dimension_numbers<[1], [0], [0], [1], [0, 0, 1, 1], [], []>} : vector<8x128xf32>, vector<128x256xf32>, vector<8x256xf32> -> vector<8x256xf32>
    %142 = arith.addf %139, %141 : vector<8x256xf32>
    %143 = vector.extract_strided_slice %142 {offsets = [0, 0], sizes = [8, 128], strides = [1, 1]} : vector<8x256xf32> to vector<8x128xf32>
    %144 = vector.extract_strided_slice %142 {offsets = [0, 128], sizes = [8, 128], strides = [1, 1]} : vector<8x256xf32> to vector<8x128xf32>
    %145 = arith.maximumf %143, %144 : vector<8x128xf32>
    %146 = vector.extract_strided_slice %69 {offsets = [24, 0], sizes = [8, 128], strides = [1, 1]} : vector<128x128xf32> to vector<8x128xf32>
    %cst_108 = arith.constant dense<0.000000e+00> : vector<8x256xf32>
    %147 = tpu.matmul %146, %71, %cst_108 {dimension_numbers = #tpu.dot_dimension_numbers<[1], [0], [0], [1], [0, 0, 1, 1], [], []>} : vector<8x128xf32>, vector<128x256xf32>, vector<8x256xf32> -> vector<8x256xf32>
    %148 = vector.extract_strided_slice %69 {offsets = [32, 0], sizes = [8, 128], strides = [1, 1]} : vector<128x128xf32> to vector<8x128xf32>
    %cst_109 = arith.constant dense<0.000000e+00> : vector<8x256xf32>
    %149 = tpu.matmul %148, %73, %cst_109 {dimension_numbers = #tpu.dot_dimension_numbers<[1], [0], [0], [1], [0, 0, 1, 1], [], []>} : vector<8x128xf32>, vector<128x256xf32>, vector<8x256xf32> -> vector<8x256xf32>
    %150 = arith.addf %147, %149 : vector<8x256xf32>
    %151 = vector.extract_strided_slice %69 {offsets = [40, 0], sizes = [8, 128], strides = [1, 1]} : vector<128x128xf32> to vector<8x128xf32>
    %cst_110 = arith.constant dense<0.000000e+00> : vector<8x256xf32>
    %152 = tpu.matmul %151, %75, %cst_110 {dimension_numbers = #tpu.dot_dimension_numbers<[1], [0], [0], [1], [0, 0, 1, 1], [], []>} : vector<8x128xf32>, vector<128x256xf32>, vector<8x256xf32> -> vector<8x256xf32>
    %153 = arith.addf %150, %152 : vector<8x256xf32>
    %154 = vector.extract_strided_slice %69 {offsets = [48, 0], sizes = [8, 128], strides = [1, 1]} : vector<128x128xf32> to vector<8x128xf32>
    %cst_111 = arith.constant dense<0.000000e+00> : vector<8x256xf32>
    %155 = tpu.matmul %154, %77, %cst_111 {dimension_numbers = #tpu.dot_dimension_numbers<[1], [0], [0], [1], [0, 0, 1, 1], [], []>} : vector<8x128xf32>, vector<128x256xf32>, vector<8x256xf32> -> vector<8x256xf32>
    %156 = arith.addf %153, %155 : vector<8x256xf32>
    %157 = vector.extract_strided_slice %69 {offsets = [56, 0], sizes = [8, 128], strides = [1, 1]} : vector<128x128xf32> to vector<8x128xf32>
    %cst_112 = arith.constant dense<0.000000e+00> : vector<8x256xf32>
    %158 = tpu.matmul %157, %79, %cst_112 {dimension_numbers = #tpu.dot_dimension_numbers<[1], [0], [0], [1], [0, 0, 1, 1], [], []>} : vector<8x128xf32>, vector<128x256xf32>, vector<8x256xf32> -> vector<8x256xf32>
    %159 = arith.addf %156, %158 : vector<8x256xf32>
    %160 = vector.extract_strided_slice %159 {offsets = [0, 0], sizes = [8, 128], strides = [1, 1]} : vector<8x256xf32> to vector<8x128xf32>
    %161 = vector.extract_strided_slice %159 {offsets = [0, 128], sizes = [8, 128], strides = [1, 1]} : vector<8x256xf32> to vector<8x128xf32>
    %162 = arith.maximumf %160, %161 : vector<8x128xf32>
    %163 = arith.maximumf %145, %162 : vector<8x128xf32>
    %164 = vector.broadcast %88 : vector<1x128xf32> to vector<8x128xf32>
    %165 = arith.addf %163, %164 : vector<8x128xf32>
    %cst_113 = arith.constant 0.000000e+00 : f32
    %166 = vector.broadcast %cst_113 : f32 to vector<8x128xf32>
    %167 = arith.maximumf %165, %166 : vector<8x128xf32>
    %cst_114 = arith.constant dense<0.000000e+00> : vector<8x128xf32>
    %168 = tpu.matmul %167, %83, %cst_114 {dimension_numbers = #tpu.dot_dimension_numbers<[1], [0], [0], [1], [0, 0, 1, 1], [], []>} : vector<8x128xf32>, vector<128x128xf32>, vector<8x128xf32> -> vector<8x128xf32>
    %169 = arith.addf %128, %168 : vector<8x128xf32>
    %170 = vector.extract_strided_slice %69 {offsets = [32, 0], sizes = [8, 128], strides = [1, 1]} : vector<128x128xf32> to vector<8x128xf32>
    %cst_115 = arith.constant dense<0.000000e+00> : vector<8x256xf32>
    %171 = tpu.matmul %170, %71, %cst_115 {dimension_numbers = #tpu.dot_dimension_numbers<[1], [0], [0], [1], [0, 0, 1, 1], [], []>} : vector<8x128xf32>, vector<128x256xf32>, vector<8x256xf32> -> vector<8x256xf32>
    %172 = vector.extract_strided_slice %69 {offsets = [40, 0], sizes = [8, 128], strides = [1, 1]} : vector<128x128xf32> to vector<8x128xf32>
    %cst_116 = arith.constant dense<0.000000e+00> : vector<8x256xf32>
    %173 = tpu.matmul %172, %73, %cst_116 {dimension_numbers = #tpu.dot_dimension_numbers<[1], [0], [0], [1], [0, 0, 1, 1], [], []>} : vector<8x128xf32>, vector<128x256xf32>, vector<8x256xf32> -> vector<8x256xf32>
    %174 = arith.addf %171, %173 : vector<8x256xf32>
    %175 = vector.extract_strided_slice %69 {offsets = [48, 0], sizes = [8, 128], strides = [1, 1]} : vector<128x128xf32> to vector<8x128xf32>
    %cst_117 = arith.constant dense<0.000000e+00> : vector<8x256xf32>
    %176 = tpu.matmul %175, %75, %cst_117 {dimension_numbers = #tpu.dot_dimension_numbers<[1], [0], [0], [1], [0, 0, 1, 1], [], []>} : vector<8x128xf32>, vector<128x256xf32>, vector<8x256xf32> -> vector<8x256xf32>
    %177 = arith.addf %174, %176 : vector<8x256xf32>
    %178 = vector.extract_strided_slice %69 {offsets = [56, 0], sizes = [8, 128], strides = [1, 1]} : vector<128x128xf32> to vector<8x128xf32>
    %cst_118 = arith.constant dense<0.000000e+00> : vector<8x256xf32>
    %179 = tpu.matmul %178, %77, %cst_118 {dimension_numbers = #tpu.dot_dimension_numbers<[1], [0], [0], [1], [0, 0, 1, 1], [], []>} : vector<8x128xf32>, vector<128x256xf32>, vector<8x256xf32> -> vector<8x256xf32>
    %180 = arith.addf %177, %179 : vector<8x256xf32>
    %181 = vector.extract_strided_slice %69 {offsets = [64, 0], sizes = [8, 128], strides = [1, 1]} : vector<128x128xf32> to vector<8x128xf32>
    %cst_119 = arith.constant dense<0.000000e+00> : vector<8x256xf32>
    %182 = tpu.matmul %181, %79, %cst_119 {dimension_numbers = #tpu.dot_dimension_numbers<[1], [0], [0], [1], [0, 0, 1, 1], [], []>} : vector<8x128xf32>, vector<128x256xf32>, vector<8x256xf32> -> vector<8x256xf32>
    %183 = arith.addf %180, %182 : vector<8x256xf32>
    %184 = vector.extract_strided_slice %183 {offsets = [0, 0], sizes = [8, 128], strides = [1, 1]} : vector<8x256xf32> to vector<8x128xf32>
    %185 = vector.extract_strided_slice %183 {offsets = [0, 128], sizes = [8, 128], strides = [1, 1]} : vector<8x256xf32> to vector<8x128xf32>
    %186 = arith.maximumf %184, %185 : vector<8x128xf32>
    %187 = vector.extract_strided_slice %69 {offsets = [40, 0], sizes = [8, 128], strides = [1, 1]} : vector<128x128xf32> to vector<8x128xf32>
    %cst_120 = arith.constant dense<0.000000e+00> : vector<8x256xf32>
    %188 = tpu.matmul %187, %71, %cst_120 {dimension_numbers = #tpu.dot_dimension_numbers<[1], [0], [0], [1], [0, 0, 1, 1], [], []>} : vector<8x128xf32>, vector<128x256xf32>, vector<8x256xf32> -> vector<8x256xf32>
    %189 = vector.extract_strided_slice %69 {offsets = [48, 0], sizes = [8, 128], strides = [1, 1]} : vector<128x128xf32> to vector<8x128xf32>
    %cst_121 = arith.constant dense<0.000000e+00> : vector<8x256xf32>
    %190 = tpu.matmul %189, %73, %cst_121 {dimension_numbers = #tpu.dot_dimension_numbers<[1], [0], [0], [1], [0, 0, 1, 1], [], []>} : vector<8x128xf32>, vector<128x256xf32>, vector<8x256xf32> -> vector<8x256xf32>
    %191 = arith.addf %188, %190 : vector<8x256xf32>
    %192 = vector.extract_strided_slice %69 {offsets = [56, 0], sizes = [8, 128], strides = [1, 1]} : vector<128x128xf32> to vector<8x128xf32>
    %cst_122 = arith.constant dense<0.000000e+00> : vector<8x256xf32>
    %193 = tpu.matmul %192, %75, %cst_122 {dimension_numbers = #tpu.dot_dimension_numbers<[1], [0], [0], [1], [0, 0, 1, 1], [], []>} : vector<8x128xf32>, vector<128x256xf32>, vector<8x256xf32> -> vector<8x256xf32>
    %194 = arith.addf %191, %193 : vector<8x256xf32>
    %195 = vector.extract_strided_slice %69 {offsets = [64, 0], sizes = [8, 128], strides = [1, 1]} : vector<128x128xf32> to vector<8x128xf32>
    %cst_123 = arith.constant dense<0.000000e+00> : vector<8x256xf32>
    %196 = tpu.matmul %195, %77, %cst_123 {dimension_numbers = #tpu.dot_dimension_numbers<[1], [0], [0], [1], [0, 0, 1, 1], [], []>} : vector<8x128xf32>, vector<128x256xf32>, vector<8x256xf32> -> vector<8x256xf32>
    %197 = arith.addf %194, %196 : vector<8x256xf32>
    %198 = vector.extract_strided_slice %69 {offsets = [72, 0], sizes = [8, 128], strides = [1, 1]} : vector<128x128xf32> to vector<8x128xf32>
    %cst_124 = arith.constant dense<0.000000e+00> : vector<8x256xf32>
    %199 = tpu.matmul %198, %79, %cst_124 {dimension_numbers = #tpu.dot_dimension_numbers<[1], [0], [0], [1], [0, 0, 1, 1], [], []>} : vector<8x128xf32>, vector<128x256xf32>, vector<8x256xf32> -> vector<8x256xf32>
    %200 = arith.addf %197, %199 : vector<8x256xf32>
    %201 = vector.extract_strided_slice %200 {offsets = [0, 0], sizes = [8, 128], strides = [1, 1]} : vector<8x256xf32> to vector<8x128xf32>
    %202 = vector.extract_strided_slice %200 {offsets = [0, 128], sizes = [8, 128], strides = [1, 1]} : vector<8x256xf32> to vector<8x128xf32>
    %203 = arith.maximumf %201, %202 : vector<8x128xf32>
    %204 = arith.maximumf %186, %203 : vector<8x128xf32>
    %205 = vector.broadcast %88 : vector<1x128xf32> to vector<8x128xf32>
    %206 = arith.addf %204, %205 : vector<8x128xf32>
    %cst_125 = arith.constant 0.000000e+00 : f32
    %207 = vector.broadcast %cst_125 : f32 to vector<8x128xf32>
    %208 = arith.maximumf %206, %207 : vector<8x128xf32>
    %cst_126 = arith.constant dense<0.000000e+00> : vector<8x128xf32>
    %209 = tpu.matmul %208, %85, %cst_126 {dimension_numbers = #tpu.dot_dimension_numbers<[1], [0], [0], [1], [0, 0, 1, 1], [], []>} : vector<8x128xf32>, vector<128x128xf32>, vector<8x128xf32> -> vector<8x128xf32>
    %210 = arith.addf %169, %209 : vector<8x128xf32>
    %211 = vector.extract_strided_slice %69 {offsets = [48, 0], sizes = [8, 128], strides = [1, 1]} : vector<128x128xf32> to vector<8x128xf32>
    %cst_127 = arith.constant dense<0.000000e+00> : vector<8x256xf32>
    %212 = tpu.matmul %211, %71, %cst_127 {dimension_numbers = #tpu.dot_dimension_numbers<[1], [0], [0], [1], [0, 0, 1, 1], [], []>} : vector<8x128xf32>, vector<128x256xf32>, vector<8x256xf32> -> vector<8x256xf32>
    %213 = vector.extract_strided_slice %69 {offsets = [56, 0], sizes = [8, 128], strides = [1, 1]} : vector<128x128xf32> to vector<8x128xf32>
    %cst_128 = arith.constant dense<0.000000e+00> : vector<8x256xf32>
    %214 = tpu.matmul %213, %73, %cst_128 {dimension_numbers = #tpu.dot_dimension_numbers<[1], [0], [0], [1], [0, 0, 1, 1], [], []>} : vector<8x128xf32>, vector<128x256xf32>, vector<8x256xf32> -> vector<8x256xf32>
    %215 = arith.addf %212, %214 : vector<8x256xf32>
    %216 = vector.extract_strided_slice %69 {offsets = [64, 0], sizes = [8, 128], strides = [1, 1]} : vector<128x128xf32> to vector<8x128xf32>
    %cst_129 = arith.constant dense<0.000000e+00> : vector<8x256xf32>
    %217 = tpu.matmul %216, %75, %cst_129 {dimension_numbers = #tpu.dot_dimension_numbers<[1], [0], [0], [1], [0, 0, 1, 1], [], []>} : vector<8x128xf32>, vector<128x256xf32>, vector<8x256xf32> -> vector<8x256xf32>
    %218 = arith.addf %215, %217 : vector<8x256xf32>
    %219 = vector.extract_strided_slice %69 {offsets = [72, 0], sizes = [8, 128], strides = [1, 1]} : vector<128x128xf32> to vector<8x128xf32>
    %cst_130 = arith.constant dense<0.000000e+00> : vector<8x256xf32>
    %220 = tpu.matmul %219, %77, %cst_130 {dimension_numbers = #tpu.dot_dimension_numbers<[1], [0], [0], [1], [0, 0, 1, 1], [], []>} : vector<8x128xf32>, vector<128x256xf32>, vector<8x256xf32> -> vector<8x256xf32>
    %221 = arith.addf %218, %220 : vector<8x256xf32>
    %222 = vector.extract_strided_slice %69 {offsets = [80, 0], sizes = [8, 128], strides = [1, 1]} : vector<128x128xf32> to vector<8x128xf32>
    %cst_131 = arith.constant dense<0.000000e+00> : vector<8x256xf32>
    %223 = tpu.matmul %222, %79, %cst_131 {dimension_numbers = #tpu.dot_dimension_numbers<[1], [0], [0], [1], [0, 0, 1, 1], [], []>} : vector<8x128xf32>, vector<128x256xf32>, vector<8x256xf32> -> vector<8x256xf32>
    %224 = arith.addf %221, %223 : vector<8x256xf32>
    %225 = vector.extract_strided_slice %224 {offsets = [0, 0], sizes = [8, 128], strides = [1, 1]} : vector<8x256xf32> to vector<8x128xf32>
    %226 = vector.extract_strided_slice %224 {offsets = [0, 128], sizes = [8, 128], strides = [1, 1]} : vector<8x256xf32> to vector<8x128xf32>
    %227 = arith.maximumf %225, %226 : vector<8x128xf32>
    %228 = vector.extract_strided_slice %69 {offsets = [56, 0], sizes = [8, 128], strides = [1, 1]} : vector<128x128xf32> to vector<8x128xf32>
    %cst_132 = arith.constant dense<0.000000e+00> : vector<8x256xf32>
    %229 = tpu.matmul %228, %71, %cst_132 {dimension_numbers = #tpu.dot_dimension_numbers<[1], [0], [0], [1], [0, 0, 1, 1], [], []>} : vector<8x128xf32>, vector<128x256xf32>, vector<8x256xf32> -> vector<8x256xf32>
    %230 = vector.extract_strided_slice %69 {offsets = [64, 0], sizes = [8, 128], strides = [1, 1]} : vector<128x128xf32> to vector<8x128xf32>
    %cst_133 = arith.constant dense<0.000000e+00> : vector<8x256xf32>
    %231 = tpu.matmul %230, %73, %cst_133 {dimension_numbers = #tpu.dot_dimension_numbers<[1], [0], [0], [1], [0, 0, 1, 1], [], []>} : vector<8x128xf32>, vector<128x256xf32>, vector<8x256xf32> -> vector<8x256xf32>
    %232 = arith.addf %229, %231 : vector<8x256xf32>
    %233 = vector.extract_strided_slice %69 {offsets = [72, 0], sizes = [8, 128], strides = [1, 1]} : vector<128x128xf32> to vector<8x128xf32>
    %cst_134 = arith.constant dense<0.000000e+00> : vector<8x256xf32>
    %234 = tpu.matmul %233, %75, %cst_134 {dimension_numbers = #tpu.dot_dimension_numbers<[1], [0], [0], [1], [0, 0, 1, 1], [], []>} : vector<8x128xf32>, vector<128x256xf32>, vector<8x256xf32> -> vector<8x256xf32>
    %235 = arith.addf %232, %234 : vector<8x256xf32>
    %236 = vector.extract_strided_slice %69 {offsets = [80, 0], sizes = [8, 128], strides = [1, 1]} : vector<128x128xf32> to vector<8x128xf32>
    %cst_135 = arith.constant dense<0.000000e+00> : vector<8x256xf32>
    %237 = tpu.matmul %236, %77, %cst_135 {dimension_numbers = #tpu.dot_dimension_numbers<[1], [0], [0], [1], [0, 0, 1, 1], [], []>} : vector<8x128xf32>, vector<128x256xf32>, vector<8x256xf32> -> vector<8x256xf32>
    %238 = arith.addf %235, %237 : vector<8x256xf32>
    %239 = vector.extract_strided_slice %69 {offsets = [88, 0], sizes = [8, 128], strides = [1, 1]} : vector<128x128xf32> to vector<8x128xf32>
    %cst_136 = arith.constant dense<0.000000e+00> : vector<8x256xf32>
    %240 = tpu.matmul %239, %79, %cst_136 {dimension_numbers = #tpu.dot_dimension_numbers<[1], [0], [0], [1], [0, 0, 1, 1], [], []>} : vector<8x128xf32>, vector<128x256xf32>, vector<8x256xf32> -> vector<8x256xf32>
    %241 = arith.addf %238, %240 : vector<8x256xf32>
    %242 = vector.extract_strided_slice %241 {offsets = [0, 0], sizes = [8, 128], strides = [1, 1]} : vector<8x256xf32> to vector<8x128xf32>
    %243 = vector.extract_strided_slice %241 {offsets = [0, 128], sizes = [8, 128], strides = [1, 1]} : vector<8x256xf32> to vector<8x128xf32>
    %244 = arith.maximumf %242, %243 : vector<8x128xf32>
    %245 = arith.maximumf %227, %244 : vector<8x128xf32>
    %246 = vector.broadcast %88 : vector<1x128xf32> to vector<8x128xf32>
    %247 = arith.addf %245, %246 : vector<8x128xf32>
    %cst_137 = arith.constant 0.000000e+00 : f32
    %248 = vector.broadcast %cst_137 : f32 to vector<8x128xf32>
    %249 = arith.maximumf %247, %248 : vector<8x128xf32>
    %cst_138 = arith.constant dense<0.000000e+00> : vector<8x128xf32>
    %250 = tpu.matmul %249, %87, %cst_138 {dimension_numbers = #tpu.dot_dimension_numbers<[1], [0], [0], [1], [0, 0, 1, 1], [], []>} : vector<8x128xf32>, vector<128x128xf32>, vector<8x128xf32> -> vector<8x128xf32>
    %251 = arith.addf %210, %250 : vector<8x128xf32>
    %c0_139 = arith.constant 0 : index
    %c0_140 = arith.constant 0 : index
    %252 = vector.load %arg7[%c0_139, %c0_140] : memref<1x128xf32, #tpu.memory_space<vmem>>, vector<1x128xf32>
    %253 = vector.broadcast %252 : vector<1x128xf32> to vector<8x128xf32>
    %254 = arith.addf %251, %253 : vector<8x128xf32>
    %cst_141 = arith.constant 0.000000e+00 : f32
    %255 = vector.broadcast %cst_141 : f32 to vector<8x128xf32>
    %256 = arith.maximumf %254, %255 : vector<8x128xf32>
    %c0_142 = arith.constant 0 : index
    %c0_143 = arith.constant 0 : index
    %257 = vector.load %arg8[%c0_142, %c0_143] : memref<128x128xf32, #tpu.memory_space<vmem>>, vector<128x128xf32>
    %cst_144 = arith.constant dense<0.000000e+00> : vector<8x128xf32>
    %258 = tpu.matmul %256, %257, %cst_144 {dimension_numbers = #tpu.dot_dimension_numbers<[1], [0], [0], [1], [0, 0, 1, 1], [], []>} : vector<8x128xf32>, vector<128x128xf32>, vector<8x128xf32> -> vector<8x128xf32>
    %c0_145 = arith.constant 0 : index
    %c0_146 = arith.constant 0 : index
    %259 = vector.load %arg9[%c0_145, %c0_146] : memref<1x128xf32, #tpu.memory_space<vmem>>, vector<1x128xf32>
    %260 = vector.broadcast %259 : vector<1x128xf32> to vector<8x128xf32>
    %261 = arith.addf %258, %260 : vector<8x128xf32>
    %cst_147 = arith.constant 0.000000e+00 : f32
    %262 = vector.broadcast %cst_147 : f32 to vector<8x128xf32>
    %263 = arith.maximumf %261, %262 : vector<8x128xf32>
    %c0_148 = arith.constant 0 : index
    %c0_149 = arith.constant 0 : index
    %264 = vector.load %arg10[%c0_148, %c0_149] : memref<128x128xf32, #tpu.memory_space<vmem>>, vector<128x128xf32>
    %cst_150 = arith.constant dense<0.000000e+00> : vector<8x128xf32>
    %265 = tpu.matmul %263, %264, %cst_150 {dimension_numbers = #tpu.dot_dimension_numbers<[1], [0], [0], [1], [0, 0, 1, 1], [], []>} : vector<8x128xf32>, vector<128x128xf32>, vector<8x128xf32> -> vector<8x128xf32>
    %c0_151 = arith.constant 0 : index
    %c0_152 = arith.constant 0 : index
    %266 = vector.load %arg11[%c0_151, %c0_152] : memref<1x128xf32, #tpu.memory_space<vmem>>, vector<1x128xf32>
    %267 = vector.broadcast %266 : vector<1x128xf32> to vector<8x128xf32>
    %268 = arith.addf %265, %267 : vector<8x128xf32>
    %269 = tpu.iota {dimensions = array<i32: 1>} : vector<8x128xi32>
    %c10_i32 = arith.constant 10 : i32
    %270 = vector.broadcast %c10_i32 : i32 to vector<8x128xi32>
    %271 = arith.cmpi slt, %269, %270 : vector<8x128xi32>
    %cst_153 = arith.constant 0xFF800000 : f32
    %272 = vector.broadcast %cst_153 : f32 to vector<8x128xf32>
    %273 = arith.select %271, %268, %272 : vector<8x128xi1>, vector<8x128xf32>
    %cst_154 = arith.constant dense<0xFF800000> : vector<8xf32>
    %274 = vector.multi_reduction <maximumf>, %273, %cst_154 [1] : vector<8x128xf32> to vector<8xf32>
    %275 = vector.shape_cast %274 : vector<8xf32> to vector<8x1xf32>
    %276 = vector.broadcast %275 : vector<8x1xf32> to vector<8x128xf32>
    %277 = arith.subf %268, %276 : vector<8x128xf32>
    %278 = math.exp %277 : vector<8x128xf32>
    %cst_155 = arith.constant 0.000000e+00 : f32
    %279 = vector.broadcast %cst_155 : f32 to vector<8x128xf32>
    %280 = arith.select %271, %278, %279 : vector<8x128xi1>, vector<8x128xf32>
    %cst_156 = arith.constant dense<0.000000e+00> : vector<8xf32>
    %281 = vector.multi_reduction <add>, %280, %cst_156 [1] : vector<8x128xf32> to vector<8xf32>
    %282 = vector.shape_cast %281 : vector<8xf32> to vector<8x1xf32>
    %283 = math.log %282 : vector<8x1xf32>
    %284 = vector.broadcast %275 : vector<8x1xf32> to vector<8x128xf32>
    %285 = arith.subf %268, %284 : vector<8x128xf32>
    %286 = vector.broadcast %283 : vector<8x1xf32> to vector<8x128xf32>
    %287 = arith.subf %285, %286 : vector<8x128xf32>
    %c0_157 = arith.constant 0 : index
    %c0_158 = arith.constant 0 : index
    %288 = vector.load %arg12[%c0_157, %c0_158] : memref<8x128xf32, #tpu.memory_space<vmem>>, vector<8x128xf32>
    tpu.vector_store %arg12[%c0_157, %c0_158], %287 {strides = array<i32>} : memref<8x128xf32, #tpu.memory_space<vmem>>, vector<8x128xf32>,
    return
  }
  func.func @transform_0(%arg0: i32) -> (i32, i32, i32, i32) {
    %c0_i32 = arith.constant 0 : i32
    %c0_i32_0 = arith.constant 0 : i32
    %c0_i32_1 = arith.constant 0 : i32
    %c0_i32_2 = arith.constant 0 : i32
    return %c0_i32, %c0_i32_0, %arg0, %c0_i32_1 : i32, i32, i32, i32
  }
  func.func @transform_1(%arg0: i32) -> (i32, i32, i32) {
    %c0_i32 = arith.constant 0 : i32
    %c0_i32_0 = arith.constant 0 : i32
    %c0_i32_1 = arith.constant 0 : i32
    %c0_i32_2 = arith.constant 0 : i32
    return %c0_i32, %c0_i32_0, %c0_i32_1 : i32, i32, i32
  }
  func.func @transform_2(%arg0: i32) -> (i32, i32) {
    %c0_i32 = arith.constant 0 : i32
    %c0_i32_0 = arith.constant 0 : i32
    %c0_i32_1 = arith.constant 0 : i32
    return %c0_i32, %c0_i32_0 : i32, i32
  }
  func.func @transform_3(%arg0: i32) -> (i32, i32, i32) {
    %c0_i32 = arith.constant 0 : i32
    %c0_i32_0 = arith.constant 0 : i32
    %c0_i32_1 = arith.constant 0 : i32
    %c0_i32_2 = arith.constant 0 : i32
    return %c0_i32, %c0_i32_0, %c0_i32_1 : i32, i32, i32
  }
  func.func @transform_4(%arg0: i32) -> (i32, i32) {
    %c0_i32 = arith.constant 0 : i32
    %c0_i32_0 = arith.constant 0 : i32
    %c0_i32_1 = arith.constant 0 : i32
    return %c0_i32, %c0_i32_0 : i32, i32
  }
  func.func @transform_5(%arg0: i32) -> (i32, i32, i32) {
    %c0_i32 = arith.constant 0 : i32
    %c0_i32_0 = arith.constant 0 : i32
    %c0_i32_1 = arith.constant 0 : i32
    %c0_i32_2 = arith.constant 0 : i32
    return %c0_i32, %c0_i32_0, %c0_i32_1 : i32, i32, i32
  }
  func.func @transform_6(%arg0: i32) -> (i32, i32) {
    %c0_i32 = arith.constant 0 : i32
    %c0_i32_0 = arith.constant 0 : i32
    %c0_i32_1 = arith.constant 0 : i32
    return %c0_i32, %c0_i32_0 : i32, i32
  }
  func.func @transform_7(%arg0: i32) -> (i32, i32) {
    %c0_i32 = arith.constant 0 : i32
    %c0_i32_0 = arith.constant 0 : i32
    %c0_i32_1 = arith.constant 0 : i32
    return %c0_i32, %c0_i32_0 : i32, i32
  }
  func.func @transform_8(%arg0: i32) -> (i32, i32) {
    %c0_i32 = arith.constant 0 : i32
    %c0_i32_0 = arith.constant 0 : i32
    %c0_i32_1 = arith.constant 0 : i32
    return %c0_i32, %c0_i32_0 : i32, i32
  }
  func.func @transform_9(%arg0: i32) -> (i32, i32) {
    %c0_i32 = arith.constant 0 : i32
    %c0_i32_0 = arith.constant 0 : i32
    %c0_i32_1 = arith.constant 0 : i32
    return %c0_i32, %c0_i32_0 : i32, i32
  }
  func.func @transform_10(%arg0: i32) -> (i32, i32) {
    %c0_i32 = arith.constant 0 : i32
    %c0_i32_0 = arith.constant 0 : i32
    %c0_i32_1 = arith.constant 0 : i32
    return %c0_i32, %c0_i32_0 : i32, i32
  }
  func.func @transform_11(%arg0: i32) -> (i32, i32) {
    %c0_i32 = arith.constant 0 : i32
    %c0_i32_0 = arith.constant 0 : i32
    return %arg0, %c0_i32 : i32, i32
  }
}

</mosaic_0001>

<bundles_post_ra>
// kernel: lenet_apply.1
= control target key start
LH: loop header
LB: loop body
LE: loop exit
PB: predicated region body
PF: predicated region fallthrough
CT: control target
= control target key end

     0   :  { %16 = vsyncpa [#allocation3], 0  ;;  %s10621_s0 = inlined_call_operand.vmem [shape: f32[2,18,8,28], index: 0, kind: input, shape index: {}]   ;;  %s10622_s1 = inlined_call_operand.vmem [shape: f32[5,28,256], index: 1, kind: input, shape index: {}]   ;;  %s10623_s2 = inlined_call_operand.vmem [shape: f32[1,128], index: 2, kind: input, shape index: {}]   ;;  %s10624_s3 = inlined_call_operand.hbm [shape: f32[5,128,256], index: 3, kind: input, shape index: {}]   ;;  %s10625_s4 = inlined_call_operand.vmem [shape: f32[1,128], index: 4, kind: input, shape index: {}]   ;;  %s10626_s5 = inlined_call_operand.vmem [shape: f32[4,128,128], index: 5, kind: input, shape index: {}]   ;;  %s10627_s6 = inlined_call_operand.vmem [shape: f32[1,128], index: 6, kind: input, shape index: {}]   ;;  %s10628_s7 = inlined_call_operand.vmem [shape: f32[128,128], index: 7, kind: input, shape index: {}]   ;;  %s10629_s8 = inlined_call_operand.vmem [shape: f32[1,128], index: 8, kind: input, shape index: {}]   ;;  %s10630_s9 = inlined_call_operand.hbm [shape: f32[128,128], index: 9, kind: input, shape index: {}]   ;;  %s10631_s10 = inlined_call_operand.vmem [shape: f32[1,128], index: 10, kind: input, shape index: {}]   ;;  %s10632_s11 = inlined_call_operand.vmem [shape: f32[8,128], index: 11, kind: output, shape index: {}]  }
   0x1   :  { %17 = vsyncpa [#allocation5], 0  ;;  %s8418_s17 = smov [#allocation2]   ;;  %s8370_s21 = scalar_lea.hbm %s10624_s3, 20480 }
   0x2   :  { %s29_s18 = sshll.u32 %s8418_s17, 4  ;;  %p8371_p0 = scmp.ne.s32.totalorder %s10624_s3, %s8370_s21  ;;  %s30_s18 = int_to_ptr.vmem [resolvable:$true] %s29_s18 }
   0x3   :  { %p8374_p1 = scmp.lt.u32.totalorder %s8370_s21, %s10624_s3 }
   0x5   :  { %p8376_p2 = pnand %p8374_p1, %p8371_p0 }
   0x7   :  { %8379 = shalt.err (!%p8376_p2)
}
   0x8   :  { %s8380_s26 = scalar_lea.vmem %s30_s18, 20480  ;;  %p8385_p4 = scmp.lt.s32.totalorder %s30_s18, %s30_s18 }
   0x9   :  { %p8381_p3 = scmp.ne.s32.totalorder %s30_s18, %s8380_s26  ;;  %p8386_p5 = scmp.lt.s32.totalorder %s8380_s26, %s8380_s26 }
   0xb   :  { %p8387_p6 = por %p8386_p5, %p8385_p4 }
   0xd   :  { %p8388_p7 = pnand %p8387_p6, %p8381_p3 }
   0xf   :  { %8391 = shalt.err (!%p8388_p7)
}
  0x10   :  { %s8419_s27 = smov 256   ;;  %s8420_s28 = smov 16  }
  0x11   :  { %35 = dma.hbm_to_vmem [thread:$0]  %s10624_s3, 20480, %s30_s18, [#allocation3], %s8419_s27, %s8419_s27, %s8420_s28  }
  0x12   :  { %s8421_s12 = smov [#allocation4]   ;;  %s8392_s16 = scalar_lea.hbm %s10630_s9, 2048 }
  0x13   :  { %s51_s13 = sshll.u32 %s8421_s12, 4  ;;  %p8393_p8 = scmp.ne.s32.totalorder %s10630_s9, %s8392_s16  ;;  %s52_s13 = int_to_ptr.vmem [resolvable:$true] %s51_s13 }
  0x14   :  { %p8396_p9 = scmp.lt.u32.totalorder %s8392_s16, %s10630_s9 }
  0x16   :  { %p8398_p10 = pnand %p8396_p9, %p8393_p8 }
  0x18   :  { %8401 = shalt.err (!%p8398_p10)
}
  0x19   :  { %s8402_s22 = scalar_lea.vmem %s52_s13, 2048  ;;  %p8407_p12 = scmp.lt.s32.totalorder %s52_s13, %s52_s13 }
  0x1a   :  { %p8403_p11 = scmp.ne.s32.totalorder %s52_s13, %s8402_s22  ;;  %p8408_p13 = scmp.lt.s32.totalorder %s8402_s22, %s8402_s22 }
  0x1c   :  { %p8409_p0 = por %p8408_p13, %p8407_p12 }
  0x1e   :  { %p8410_p1 = pnand %p8409_p0, %p8403_p11 }
  0x20   :  { %8413 = shalt.err (!%p8410_p1)
}
  0x21   :  { %s8422_s3 = smov 128   ;;  %s8423_s18 = smov 8  }
  0x22   :  { %57 = dma.hbm_to_vmem [thread:$0]  %s10630_s9, 2048, %s52_s13, [#allocation5], %s8422_s3, %s8422_s3, %s8423_s18  }
  0x23   :  { %8414 = dma.done.wait [#allocation3], 20480  }
  0x24   :  { %8415 = vsyncadd [#allocation3], 4294946816 }
  0x25   :  { %8416 = dma.done.wait [#allocation5], 2048  }
  0x26   :  { %8417 = vsyncadd [#allocation5], 4294965248  ;;  %v10634_v0 = vmov 0.0   ;;  %vm192_vm0 = vcmask 1043456   ;;  %v5919_v1 = vld [vmem:[%s10622_s1 + $0x48] sm:$0xff]  ;;  %v5921_v2 = vld [vmem:[%s10622_s1 + $0x58] sm:$0xff] }
  0x27   :  { %263 = vmatprep.mubr.f32.mxu0 %v10634_v0  ;;  %1379 = vmatprep.mubr.f32.mxu1 %v10634_v0  ;;  %v5918_v3 = vld [vmem:[%s10622_s1 + $0x40] sm:$0xff]  ;;  %v6575_v4 = vpack.c.bf16 %v5921_v2, %v5919_v1  ;;  %v5920_v5 = vld [vmem:[%s10622_s1 + $0x50] sm:$0xff]  ;;  %v5923_v6 = vld [vmem:[%s10622_s1 + $0x68] sm:$0xff]  ;;  %vm8425_vm1 = vmmov 1   ;;  %vm143_vm3 = vcmask 228352   ;;  %vm8427_vm4 = vmmov 0  }
  0x28   :  { %v5925_v7 = vld [vmem:[%s10622_s1 + $0x78] sm:$0xf]  ;;  %v6577_v8 = vpack.c.bf16 %v5920_v5, %v5918_v3  ;;  %vm8532_vm2 = vmpackc.low %vm192_vm0, %vm8425_vm1  ;;  %v5922_v11 = vld [vmem:[%s10622_s1 + $0x60] sm:$0xff] }
  0x29   :  { %v6579_v9 = vpack.c.bf16 %v5925_v7, %v5923_v6  ;;  %v5924_v12 = vld [vmem:[%s10622_s1 + $0x70] sm:$0xf]  ;;  %6576 = vmatprep.subr.bf16.mxu0 %v6575_v4  ;;  %6626 = vmatprep.subr.bf16.mxu1 %v6575_v4  ;;  %v67_v13 = vld [vmem:[%s10622_s1 + $0x8] sm:$0xff]  ;;  %v69_v14 = vld [vmem:[%s10622_s1 + $0x18] sm:$0xff] }
  0x2a   :  { %6578 = vmatpush1.bf16.msra.mxu0 %v6577_v8  ;;  %6628 = vmatpush1.bf16.msra.mxu1 %v6577_v8  ;;  %v6582_v15 = vpack.c.bf16 %v5924_v12, %v5922_v11  ;;  %v6585_v16 = vpack.c.bf16 %v69_v14, %v67_v13  ;;  %v66_v17 = vld [vmem:[%s10622_s1] sm:$0xff]  ;;  %v68_v18 = vld [vmem:[%s10622_s1 + $0x10] sm:$0xff]  ;;  %v8570_v20 = vld [vmem:[%s10621_s0 + $0x8] sm:$0xff] }
  0x2b   :  { %6581 = vmatprep.subr.msk.bf16.mxu0 %vm8532_vm2, %v6579_v9  ;;  %6631 = vmatprep.subr.msk.bf16.mxu1 %vm8532_vm2, %v6579_v9  ;;  %v8565_v19 = vld [vmem:[%s10621_s0 + $0x90] sm:$0xff]  ;;  %v6587_v21 = vpack.c.bf16 %v68_v18, %v66_v17  ;;  %v71_v22 = vld [vmem:[%s10622_s1 + $0x28] sm:$0xff]  ;;  %v73_v23 = vld [vmem:[%s10622_s1 + $0x38] sm:$0xf] }
  0x2c   :  { %v70_v24 = vld [vmem:[%s10622_s1 + $0x20] sm:$0xff]  ;;  %v6589_v25 = vpack.c.bf16 %v73_v23, %v71_v22  ;;  %v72_v26 = vld [vmem:[%s10622_s1 + $0x30] sm:$0xf]  ;;  %v8591_v27 = vld [vmem:[%s10621_s0 + $0x98] sm:$0xff] }
  0x2d   :  { %v8596_v28 = vld [vmem:[%s10621_s0 + $0x10] sm:$0xff]  ;;  %v6592_v29 = vpack.c.bf16 %v72_v26, %v70_v24  ;;  %v8611_v30 = vld [vmem:[%s10621_s0 + $0xa0] sm:$0xff]  ;;  %v8618_v31 = vld [vmem:[%s10621_s0 + $0x18] sm:$0xff] }
  0x2e   :  { %6584 = vmatpush1.bf16.msk.msra.mxu0 %vm8532_vm2, %v6582_v15  ;;  %6634 = vmatpush1.bf16.msk.msra.mxu1 %vm8532_vm2, %v6582_v15  ;;  %v5927_v32 = vld [vmem:[%s10622_s1 + $0x88] sm:$0xff]  ;;  %v5929_v33 = vld [vmem:[%s10622_s1 + $0x98] sm:$0xff]  ;;  %v8644_v36 = vld [vmem:[%s10621_s0 + $0x20] sm:$0xff] }
  0x2f   :  { %6586 = vmatprep.subr.bf16.mxu0 %v6585_v16  ;;  %6636 = vmatprep.subr.bf16.mxu1 %v6585_v16  ;;  %v6595_v34 = vpack.c.bf16 %v5929_v33, %v5927_v32  ;;  %v8639_v35 = vld [vmem:[%s10621_s0 + $0xa8] sm:$0xff]  ;;  %v8655_v37 = vld [vmem:[%s10621_s0 + $0xb0] sm:$0xff]  ;;  %v8671_v39 = vld [vmem:[%s10621_s0 + $0xb8] sm:$0xff] }
  0x30   :  { %v8660_v38 = vld [vmem:[%s10621_s0 + $0x28] sm:$0xff]  ;;  %v8676_v40 = vld [vmem:[%s10621_s0 + $0x30] sm:$0xff]  ;;  %v8687_v41 = vld [vmem:[%s10621_s0 + $0xc0] sm:$0xff] }
  0x31   :  { %5968 = vmatmul.mubr.msk.f32.vlgmr.msra.gmra.mrb[0].mxu0 %vm143_vm3, %v8565_v19  ;;  %6106 = vmatmul.mubr.msk.f32.vlgmr.msra.gmra.mrb[0].mxu1 %vm143_vm3, %v8570_v20  ;;  %v8692_v42 = vld [vmem:[%s10621_s0 + $0x38] sm:$0xff]  ;;  %v8703_v43 = vld [vmem:[%s10621_s0 + $0xc8] sm:$0xff]  ;;  %v8708_v44 = vld [vmem:[%s10621_s0 + $0x40] sm:$0xff] }
  0x32   :  { %6588 = vmatpush1.bf16.msra.mxu0 %v6587_v21  ;;  %6638 = vmatpush1.bf16.msra.mxu1 %v6587_v21  ;;  %v8719_v45 = vld [vmem:[%s10621_s0 + $0xd0] sm:$0xff]  ;;  %v8724_v46 = vld [vmem:[%s10621_s0 + $0x48] sm:$0xff]  ;;  %v8735_v47 = vld [vmem:[%s10621_s0 + $0xd8] sm:$0xff] }
  0x33   :  { %269 = vmatprep.mubr.f32.mxu0 %v10634_v0  ;;  %1385 = vmatprep.mubr.f32.mxu1 %v10634_v0  ;;  %v8740_v48 = vld [vmem:[%s10621_s0 + $0x50] sm:$0xff]  ;;  %v8751_v49 = vld [vmem:[%s10621_s0 + $0xe0] sm:$0xff]  ;;  %v8756_v50 = vld [vmem:[%s10621_s0 + $0x58] sm:$0xff] }
  0x34   :  { %6591 = vmatprep.subr.msk.bf16.mxu0 %vm8532_vm2, %v6589_v25  ;;  %6641 = vmatprep.subr.msk.bf16.mxu1 %vm8532_vm2, %v6589_v25  ;;  %v8767_v51 = vld [vmem:[%s10621_s0 + $0xe8] sm:$0xff]  ;;  %v8772_v52 = vld [vmem:[%s10621_s0 + $0x60] sm:$0xff]  ;;  %v8783_v53 = vld [vmem:[%s10621_s0 + $0xf0] sm:$0xff] }
  0x35   :  { %5969 = vmatmul.mubr.msk.f32.gmra.mrb[2].mxu0 %vm143_vm3, %v8591_v27  ;;  %6107 = vmatmul.mubr.msk.f32.gmra.mrb[2].mxu1 %vm143_vm3, %v8596_v28  ;;  %v8788_v54 = vld [vmem:[%s10621_s0 + $0x68] sm:$0xff]  ;;  %v8799_v55 = vld [vmem:[%s10621_s0 + $0xf8] sm:$0xff]  ;;  %v8804_v56 = vld [vmem:[%s10621_s0 + $0x70] sm:$0xff] }
  0x36   :  { %275 = vmatprep.mubr.f32.mxu0 %v10634_v0  ;;  %1391 = vmatprep.mubr.f32.mxu1 %v10634_v0  ;;  %v8815_v57 = vld [vmem:[%s10621_s0 + $0x100] sm:$0xff]  ;;  %v8820_v58 = vld [vmem:[%s10621_s0 + $0x78] sm:$0xff]  ;;  %v8831_v59 = vld [vmem:[%s10621_s0 + $0x108] sm:$0xff] }
  0x37   :  { %6594 = vmatpush1.bf16.msk.msra.mxu0 %vm8532_vm2, %v6592_v29  ;;  %6644 = vmatpush1.bf16.msk.msra.mxu1 %vm8532_vm2, %v6592_v29  ;;  %v8836_v60 = vld [vmem:[%s10621_s0 + $0x80] sm:$0xff]  ;;  %v5928_v62 = vld [vmem:[%s10622_s1 + $0x90] sm:$0xff]  ;;  %v5931_v63 = vld [vmem:[%s10622_s1 + $0xa8] sm:$0xff] }
  0x38   :  { %6596 = vmatprep.subr.bf16.mxu0 %v6595_v34  ;;  %6646 = vmatprep.subr.bf16.mxu1 %v6595_v34  ;;  %v5926_v61 = vld [vmem:[%s10622_s1 + $0x80] sm:$0xff]  ;;  %v5933_v1 = vld [vmem:[%s10622_s1 + $0xb8] sm:$0xf]  ;;  %v5932_v6 = vld [vmem:[%s10622_s1 + $0xb0] sm:$0xf] }
  0x39   :  { %5970 = vmatmul.mubr.msk.f32.gmra.mrb[4].mxu0 %vm143_vm3, %v8611_v30  ;;  %6108 = vmatmul.mubr.msk.f32.gmra.mrb[4].mxu1 %vm143_vm3, %v8618_v31  ;;  %v110_v2 = vld [vmem:[%s10621_s0] sm:$0xff]  ;;  %v6597_v3 = vpack.c.bf16 %v5928_v62, %v5926_v61  ;;  %v6599_v4 = vpack.c.bf16 %v5933_v1, %v5931_v63  ;;  %v5935_v7 = vld [vmem:[%s10622_s1 + $0xc8] sm:$0xff]  ;;  %v5937_v8 = vld [vmem:[%s10622_s1 + $0xd8] sm:$0xff] }
  0x3a   :  { %281 = vmatprep.mubr.f32.mxu0 %v10634_v0  ;;  %1397 = vmatprep.mubr.f32.mxu1 %v10634_v0  ;;  %v5930_v5 = vld [vmem:[%s10622_s1 + $0xa0] sm:$0xff]  ;;  %v6605_v11 = vpack.c.bf16 %v5937_v8, %v5935_v7  ;;  %v5936_v13 = vld [vmem:[%s10622_s1 + $0xd0] sm:$0xff]  ;;  %v5939_v14 = vld [vmem:[%s10622_s1 + $0xe8] sm:$0xff] }
  0x3b   :  { %v6602_v9 = vpack.c.bf16 %v5932_v6, %v5930_v5  ;;  %v5934_v12 = vld [vmem:[%s10622_s1 + $0xc0] sm:$0xff]  ;;  %v5941_v15 = vld [vmem:[%s10622_s1 + $0xf8] sm:$0xf]  ;;  %v5943_v21 = vld [vmem:[%s10622_s1 + $0x108] sm:$0xff] }
  0x3c   :  { %v6607_v16 = vpack.c.bf16 %v5936_v13, %v5934_v12  ;;  %v6609_v17 = vpack.c.bf16 %v5941_v15, %v5939_v14  ;;  %v5938_v18 = vld [vmem:[%s10622_s1 + $0xe0] sm:$0xff]  ;;  %v5945_v22 = vld [vmem:[%s10622_s1 + $0x118] sm:$0xff]  ;;  %v9099_v24 = vld [vmem:[%s10621_s0 + $0x110] sm:$0xff] }
  0x3d   :  { %5971 = vmatmul.mubr.msk.f32.gmra.mrb[6].mxu0 %vm143_vm3, %v8639_v35  ;;  %6109 = vmatmul.mubr.msk.f32.gmra.mrb[6].mxu1 %vm143_vm3, %v8644_v36  ;;  %v5942_v25 = vld [vmem:[%s10622_s1 + $0x100] sm:$0xff]  ;;  %v5944_v26 = vld [vmem:[%s10622_s1 + $0x110] sm:$0xff]  ;;  %v5947_v29 = vld [vmem:[%s10622_s1 + $0x128] sm:$0xff] }
  0x3e   :  { %287 = vmatprep.mubr.f32.mxu0 %v10634_v0  ;;  %1403 = vmatprep.mubr.f32.mxu1 %v10634_v0  ;;  %v5949_v32 = vld [vmem:[%s10622_s1 + $0x138] sm:$0xf]  ;;  %v6617_v33 = vpack.c.bf16 %v5944_v26, %v5942_v25  ;;  %v5946_v61 = vld [vmem:[%s10622_s1 + $0x120] sm:$0xff]  ;;  %v5948_v62 = vld [vmem:[%s10622_s1 + $0x130] sm:$0xf] }
  0x3f   :  { %v6619_v34 = vpack.c.bf16 %v5949_v32, %v5947_v29  ;;  %v6622_v63 = vpack.c.bf16 %v5948_v62, %v5946_v61  ;;  %v9226_v10 = vld [vmem:[%s10621_s0 + $0x88] sm:$0xff]  ;;  %v2307_v12 = vld [vmem:[#allocation2 + $0x110] sm:$0xff]  ;;  %v2312_v14 = vld [vmem:[#allocation2 + $0x138] sm:$0xff] }
  0x40   :  { %v2310_v13 = vld [vmem:[#allocation2 + $0x128] sm:$0xff]  ;;  %v2317_v25 = vld [vmem:[#allocation2 + $0x160] sm:$0xff]  ;;  %v2328_v62 = vld [vmem:[#allocation2 + $0x1b8] sm:$0xff] }
  0x41   :  { %5972 = vmatmul.mubr.msk.f32.gmra.mrb[8].mxu0 %vm143_vm3, %v8655_v37  ;;  %6110 = vmatmul.mubr.msk.f32.gmra.mrb[8].mxu1 %vm143_vm3, %v8660_v38  ;;  %v2326_v61 = vld [vmem:[#allocation2 + $0x1a8] sm:$0xff] }
  0x42   :  { %293 = vmatprep.mubr.f32.mxu0 %v10634_v0  ;;  %1409 = vmatprep.mubr.f32.mxu1 %v10634_v0 }
  0x45   :  { %5973 = vmatmul.mubr.msk.f32.gmra.mrb[10].mxu0 %vm143_vm3, %v8671_v39  ;;  %6111 = vmatmul.mubr.msk.f32.gmra.mrb[10].mxu1 %vm143_vm3, %v8676_v40 }
  0x46   :  { %299 = vmatprep.mubr.f32.mxu0 %v10634_v0  ;;  %1415 = vmatprep.mubr.f32.mxu1 %v10634_v0 }
  0x49   :  { %5974 = vmatmul.mubr.msk.f32.gmra.mrb[12].mxu0 %vm143_vm3, %v8687_v41  ;;  %6112 = vmatmul.mubr.msk.f32.gmra.mrb[12].mxu1 %vm143_vm3, %v8692_v42 }
  0x4a   :  { %305 = vmatprep.mubr.f32.mxu0 %v10634_v0  ;;  %1421 = vmatprep.mubr.f32.mxu1 %v10634_v0 }
  0x4d   :  { %5975 = vmatmul.mubr.msk.f32.gmra.mrb[14].mxu0 %vm143_vm3, %v8703_v43  ;;  %6113 = vmatmul.mubr.msk.f32.gmra.mrb[14].mxu1 %vm143_vm3, %v8708_v44 }
  0x4e   :  { %311 = vmatprep.mubr.f32.mxu0 %v10634_v0  ;;  %1427 = vmatprep.mubr.f32.mxu1 %v10634_v0 }
  0x51   :  { %5976 = vmatmul.mubr.msk.f32.gmra.mrb[16].mxu0 %vm143_vm3, %v8719_v45  ;;  %6114 = vmatmul.mubr.msk.f32.gmra.mrb[16].mxu1 %vm143_vm3, %v8724_v46 }
  0x52   :  { %317 = vmatprep.mubr.f32.mxu0 %v10634_v0  ;;  %1433 = vmatprep.mubr.f32.mxu1 %v10634_v0 }
  0x55   :  { %5977 = vmatmul.mubr.msk.f32.gmra.mrb[18].mxu0 %vm143_vm3, %v8735_v47  ;;  %6115 = vmatmul.mubr.msk.f32.gmra.mrb[18].mxu1 %vm143_vm3, %v8740_v48 }
  0x56   :  { %323 = vmatprep.mubr.f32.mxu0 %v10634_v0  ;;  %1439 = vmatprep.mubr.f32.mxu1 %v10634_v0 }
  0x59   :  { %5978 = vmatmul.mubr.msk.f32.gmra.mrb[20].mxu0 %vm143_vm3, %v8751_v49  ;;  %6116 = vmatmul.mubr.msk.f32.gmra.mrb[20].mxu1 %vm143_vm3, %v8756_v50 }
  0x5a   :  { %329 = vmatprep.mubr.f32.mxu0 %v10634_v0  ;;  %1445 = vmatprep.mubr.f32.mxu1 %v10634_v0 }
  0x5d   :  { %5979 = vmatmul.mubr.msk.f32.gmra.mrb[22].mxu0 %vm143_vm3, %v8767_v51  ;;  %6117 = vmatmul.mubr.msk.f32.gmra.mrb[22].mxu1 %vm143_vm3, %v8772_v52 }
  0x5e   :  { %335 = vmatprep.mubr.f32.mxu0 %v10634_v0  ;;  %1451 = vmatprep.mubr.f32.mxu1 %v10634_v0 }
  0x61   :  { %5980 = vmatmul.mubr.msk.f32.gmra.mrb[24].mxu0 %vm143_vm3, %v8783_v53  ;;  %6118 = vmatmul.mubr.msk.f32.gmra.mrb[24].mxu1 %vm143_vm3, %v8788_v54 }
  0x62   :  { %339 = vmatprep.mubr.f32.mxu0 %v10634_v0  ;;  %1455 = vmatprep.mubr.f32.mxu1 %v10634_v0 }
  0x65   :  { %5981 = vmatmul.mubr.msk.f32.gmra.mrb[26].mxu0 %vm143_vm3, %v8799_v55  ;;  %6119 = vmatmul.mubr.msk.f32.gmra.mrb[26].mxu1 %vm143_vm3, %v8804_v56 }
  0x66   :  { %343 = vmatprep.mubr.f32.mxu0 %v10634_v0  ;;  %1459 = vmatprep.mubr.f32.mxu1 %v10634_v0 }
  0x69   :  { %5982 = vmatmul.mubr.msk.f32.gmra.mrb[28].mxu0 %vm143_vm3, %v8815_v57  ;;  %6120 = vmatmul.mubr.msk.f32.gmra.mrb[28].mxu1 %vm143_vm3, %v8820_v58 }
  0x6a   :  { %347 = vmatprep.mubr.f32.mxu0 %v10634_v0  ;;  %1463 = vmatprep.mubr.f32.mxu1 %v10634_v0 }
  0x6d   :  { %5983 = vmatmul.mubr.msk.f32.gmra.mrb[30].mxu0 %vm143_vm3, %v8831_v59  ;;  %6121 = vmatmul.mubr.msk.f32.gmra.mrb[30].mxu1 %vm143_vm3, %v8836_v60 }
  0x6e   :  { %470 = vmatprep.mubr.f32.mxu0 %v10634_v0  ;;  %1532 = vmatprep.mubr.f32.mxu1 %v10634_v0 }
  0x71   :  { %5986 = vmatmul.mubr.msk.f32.vlgmr.msra.gmra.mrb[0].mxu0 %vm143_vm3, %v110_v2  ;;  %6124 = vmatmul.mubr.msk.f32.vlgmr.msra.gmra.mrb[0].mxu1 %vm143_vm3, %v8565_v19  ;;  %v5940_v19 = vld [vmem:[%s10622_s1 + $0xf0] sm:$0xf] }
  0x72   :  { %6598 = vmatpush1.bf16.msra.mxu0 %v6597_v3  ;;  %6648 = vmatpush1.bf16.msra.mxu1 %v6597_v3  ;;  %v6612_v23 = vpack.c.bf16 %v5940_v19, %v5938_v18  ;;  %v2316_v18 = vld [vmem:[#allocation2 + $0x158] sm:$0xff] }
  0x73   :  { %476 = vmatprep.mubr.f32.mxu0 %v10634_v0  ;;  %1538 = vmatprep.mubr.f32.mxu1 %v10634_v0 }
  0x74   :  { %6601 = vmatprep.subr.msk.bf16.mxu0 %vm8532_vm2, %v6599_v4  ;;  %6651 = vmatprep.subr.msk.bf16.mxu1 %vm8532_vm2, %v6599_v4 }
  0x75   :  { %5987 = vmatmul.mubr.msk.f32.gmra.mrb[2].mxu0 %vm143_vm3, %v8570_v20  ;;  %6125 = vmatmul.mubr.msk.f32.gmra.mrb[2].mxu1 %vm143_vm3, %v8591_v27 }
  0x76   :  { %482 = vmatprep.mubr.f32.mxu0 %v10634_v0  ;;  %1544 = vmatprep.mubr.f32.mxu1 %v10634_v0 }
  0x77   :  { %6604 = vmatpush1.bf16.msk.msra.mxu0 %vm8532_vm2, %v6602_v9  ;;  %6654 = vmatpush1.bf16.msk.msra.mxu1 %vm8532_vm2, %v6602_v9  ;;  %v2306_v9 = vld [vmem:[#allocation2 + $0x108] sm:$0xff] }
  0x78   :  { %6606 = vmatprep.subr.bf16.mxu0 %v6605_v11  ;;  %6656 = vmatprep.subr.bf16.mxu1 %v6605_v11  ;;  %v2305_v11 = vld [vmem:[#allocation2 + $0x100] sm:$0xff] }
  0x79   :  { %5988 = vmatmul.mubr.msk.f32.gmra.mrb[4].mxu0 %vm143_vm3, %v8596_v28  ;;  %6126 = vmatmul.mubr.msk.f32.gmra.mrb[4].mxu1 %vm143_vm3, %v8611_v30  ;;  %v9266_v15 = vpack.c.bf16 %v2307_v12, %v2305_v11  ;;  %v2273_v12 = vld [vmem:[#allocation2 + $0x8] sm:$0xff] }
  0x7a   :  { %488 = vmatprep.mubr.f32.mxu0 %v10634_v0  ;;  %1550 = vmatprep.mubr.f32.mxu1 %v10634_v0 }
  0x7d   :  { %5989 = vmatmul.mubr.msk.f32.gmra.mrb[6].mxu0 %vm143_vm3, %v8618_v31  ;;  %6127 = vmatmul.mubr.msk.f32.gmra.mrb[6].mxu1 %vm143_vm3, %v8639_v35 }
  0x7e   :  { %494 = vmatprep.mubr.f32.mxu0 %v10634_v0  ;;  %1556 = vmatprep.mubr.f32.mxu1 %v10634_v0 }
  0x81   :  { %5990 = vmatmul.mubr.msk.f32.gmra.mrb[8].mxu0 %vm143_vm3, %v8644_v36  ;;  %6128 = vmatmul.mubr.msk.f32.gmra.mrb[8].mxu1 %vm143_vm3, %v8655_v37 }
  0x82   :  { %500 = vmatprep.mubr.f32.mxu0 %v10634_v0  ;;  %1562 = vmatprep.mubr.f32.mxu1 %v10634_v0 }
  0x85   :  { %5991 = vmatmul.mubr.msk.f32.gmra.mrb[10].mxu0 %vm143_vm3, %v8660_v38  ;;  %6129 = vmatmul.mubr.msk.f32.gmra.mrb[10].mxu1 %vm143_vm3, %v8671_v39 }
  0x86   :  { %506 = vmatprep.mubr.f32.mxu0 %v10634_v0  ;;  %1568 = vmatprep.mubr.f32.mxu1 %v10634_v0 }
  0x89   :  { %5992 = vmatmul.mubr.msk.f32.gmra.mrb[12].mxu0 %vm143_vm3, %v8676_v40  ;;  %6130 = vmatmul.mubr.msk.f32.gmra.mrb[12].mxu1 %vm143_vm3, %v8687_v41 }
  0x8a   :  { %512 = vmatprep.mubr.f32.mxu0 %v10634_v0  ;;  %1574 = vmatprep.mubr.f32.mxu1 %v10634_v0 }
  0x8d   :  { %5993 = vmatmul.mubr.msk.f32.gmra.mrb[14].mxu0 %vm143_vm3, %v8692_v42  ;;  %6131 = vmatmul.mubr.msk.f32.gmra.mrb[14].mxu1 %vm143_vm3, %v8703_v43 }
  0x8e   :  { %518 = vmatprep.mubr.f32.mxu0 %v10634_v0  ;;  %1580 = vmatprep.mubr.f32.mxu1 %v10634_v0 }
  0x91   :  { %5994 = vmatmul.mubr.msk.f32.gmra.mrb[16].mxu0 %vm143_vm3, %v8708_v44  ;;  %6132 = vmatmul.mubr.msk.f32.gmra.mrb[16].mxu1 %vm143_vm3, %v8719_v45 }
  0x92   :  { %524 = vmatprep.mubr.f32.mxu0 %v10634_v0  ;;  %1586 = vmatprep.mubr.f32.mxu1 %v10634_v0 }
  0x95   :  { %5995 = vmatmul.mubr.msk.f32.gmra.mrb[18].mxu0 %vm143_vm3, %v8724_v46  ;;  %6133 = vmatmul.mubr.msk.f32.gmra.mrb[18].mxu1 %vm143_vm3, %v8735_v47 }
  0x96   :  { %530 = vmatprep.mubr.f32.mxu0 %v10634_v0  ;;  %1592 = vmatprep.mubr.f32.mxu1 %v10634_v0 }
  0x99   :  { %5996 = vmatmul.mubr.msk.f32.gmra.mrb[20].mxu0 %vm143_vm3, %v8740_v48  ;;  %6134 = vmatmul.mubr.msk.f32.gmra.mrb[20].mxu1 %vm143_vm3, %v8751_v49 }
  0x9a   :  { %536 = vmatprep.mubr.f32.mxu0 %v10634_v0  ;;  %1598 = vmatprep.mubr.f32.mxu1 %v10634_v0 }
  0x9d   :  { %5997 = vmatmul.mubr.msk.f32.gmra.mrb[22].mxu0 %vm143_vm3, %v8756_v50  ;;  %6135 = vmatmul.mubr.msk.f32.gmra.mrb[22].mxu1 %vm143_vm3, %v8767_v51 }
  0x9e   :  { %542 = vmatprep.mubr.f32.mxu0 %v10634_v0  ;;  %1604 = vmatprep.mubr.f32.mxu1 %v10634_v0 }
  0xa1   :  { %5998 = vmatmul.mubr.msk.f32.gmra.mrb[32].mxu0 %vm143_vm3, %v8772_v52  ;;  %6136 = vmatmul.mubr.msk.f32.gmra.mrb[32].mxu1 %vm143_vm3, %v8783_v53 }
  0xa2   :  { %546 = vmatprep.mubr.f32.mxu0 %v10634_v0  ;;  %1608 = vmatprep.mubr.f32.mxu1 %v10634_v0 }
  0xa5   :  { %5999 = vmatmul.mubr.msk.f32.gmra.mrb[34].mxu0 %vm143_vm3, %v8788_v54  ;;  %6137 = vmatmul.mubr.msk.f32.gmra.mrb[34].mxu1 %vm143_vm3, %v8799_v55 }
  0xa6   :  { %550 = vmatprep.mubr.f32.mxu0 %v10634_v0  ;;  %1612 = vmatprep.mubr.f32.mxu1 %v10634_v0 }
  0xa9   :  { %6000 = vmatmul.mubr.msk.f32.gmra.mrb[36].mxu0 %vm143_vm3, %v8804_v56  ;;  %6138 = vmatmul.mubr.msk.f32.gmra.mrb[36].mxu1 %vm143_vm3, %v8815_v57 }
  0xaa   :  { %554 = vmatprep.mubr.f32.mxu0 %v10634_v0  ;;  %1616 = vmatprep.mubr.f32.mxu1 %v10634_v0 }
  0xad   :  { %6001 = vmatmul.mubr.msk.f32.gmra.mrb[38].mxu0 %vm143_vm3, %v8820_v58  ;;  %6139 = vmatmul.mubr.msk.f32.gmra.mrb[38].mxu1 %vm143_vm3, %v8831_v59 }
  0xae   :  { %694 = vmatprep.mubr.f32.mxu0 %v10634_v0  ;;  %1685 = vmatprep.mubr.f32.mxu1 %v10634_v0 }
  0xb1   :  { %6020 = vmatmul.mubr.msk.f32.vlgmr.msra.gmra.mrb[0].mxu0 %vm143_vm3, %v8570_v20  ;;  %6142 = vmatmul.mubr.msk.f32.vlgmr.msra.gmra.mrb[0].mxu1 %vm143_vm3, %v8591_v27  ;;  %v6615_v20 = vpack.c.bf16 %v5945_v22, %v5943_v21  ;;  %v2313_v21 = vld [vmem:[#allocation2 + $0x140] sm:$0xff]  ;;  %v2318_v22 = vld [vmem:[#allocation2 + $0x168] sm:$0xff] }
  0xb2   :  { %6608 = vmatpush1.bf16.msra.mxu0 %v6607_v16  ;;  %6658 = vmatpush1.bf16.msra.mxu1 %v6607_v16  ;;  %v2311_v16 = vld [vmem:[#allocation2 + $0x130] sm:$0xff] }
  0xb3   :  { %700 = vmatprep.mubr.f32.mxu0 %v10634_v0  ;;  %1691 = vmatprep.mubr.f32.mxu1 %v10634_v0 }
  0xb4   :  { %6611 = vmatprep.subr.msk.bf16.mxu0 %vm8532_vm2, %v6609_v17  ;;  %6661 = vmatprep.subr.msk.bf16.mxu1 %vm8532_vm2, %v6609_v17  ;;  %v2314_v17 = vld [vmem:[#allocation2 + $0x148] sm:$0xff] }
  0xb5   :  { %6021 = vmatmul.mubr.msk.f32.gmra.mrb[2].mxu0 %vm143_vm3, %v8596_v28  ;;  %6143 = vmatmul.mubr.msk.f32.gmra.mrb[2].mxu1 %vm143_vm3, %v8611_v30 }
  0xb6   :  { %706 = vmatprep.mubr.f32.mxu0 %v10634_v0  ;;  %1697 = vmatprep.mubr.f32.mxu1 %v10634_v0 }
  0xb7   :  { %6614 = vmatpush1.bf16.msk.msra.mxu0 %vm8532_vm2, %v6612_v23  ;;  %6664 = vmatpush1.bf16.msk.msra.mxu1 %vm8532_vm2, %v6612_v23  ;;  %v2320_v23 = vld [vmem:[#allocation2 + $0x178] sm:$0xff] }
  0xb8   :  { %6616 = vmatprep.subr.bf16.mxu0 %v6615_v20  ;;  %6666 = vmatprep.subr.bf16.mxu1 %v6615_v20 }
  0xb9   :  { %6022 = vmatmul.mubr.msk.f32.gmra.mrb[4].mxu0 %vm143_vm3, %v8618_v31  ;;  %6144 = vmatmul.mubr.msk.f32.gmra.mrb[4].mxu1 %vm143_vm3, %v8639_v35 }
  0xba   :  { %712 = vmatprep.mubr.f32.mxu0 %v10634_v0  ;;  %1703 = vmatprep.mubr.f32.mxu1 %v10634_v0 }
  0xbd   :  { %6023 = vmatmul.mubr.msk.f32.gmra.mrb[6].mxu0 %vm143_vm3, %v8644_v36  ;;  %6145 = vmatmul.mubr.msk.f32.gmra.mrb[6].mxu1 %vm143_vm3, %v8655_v37 }
  0xbe   :  { %718 = vmatprep.mubr.f32.mxu0 %v10634_v0  ;;  %1709 = vmatprep.mubr.f32.mxu1 %v10634_v0 }
  0xc1   :  { %6024 = vmatmul.mubr.msk.f32.gmra.mrb[8].mxu0 %vm143_vm3, %v8660_v38  ;;  %6146 = vmatmul.mubr.msk.f32.gmra.mrb[8].mxu1 %vm143_vm3, %v8671_v39 }
  0xc2   :  { %724 = vmatprep.mubr.f32.mxu0 %v10634_v0  ;;  %1715 = vmatprep.mubr.f32.mxu1 %v10634_v0 }
  0xc5   :  { %6025 = vmatmul.mubr.msk.f32.gmra.mrb[10].mxu0 %vm143_vm3, %v8676_v40  ;;  %6147 = vmatmul.mubr.msk.f32.gmra.mrb[10].mxu1 %vm143_vm3, %v8687_v41 }
  0xc6   :  { %730 = vmatprep.mubr.f32.mxu0 %v10634_v0  ;;  %1721 = vmatprep.mubr.f32.mxu1 %v10634_v0 }
  0xc9   :  { %6026 = vmatmul.mubr.msk.f32.gmra.mrb[12].mxu0 %vm143_vm3, %v8692_v42  ;;  %6148 = vmatmul.mubr.msk.f32.gmra.mrb[12].mxu1 %vm143_vm3, %v8703_v43 }
  0xca   :  { %736 = vmatprep.mubr.f32.mxu0 %v10634_v0  ;;  %1727 = vmatprep.mubr.f32.mxu1 %v10634_v0 }
  0xcd   :  { %6027 = vmatmul.mubr.msk.f32.gmra.mrb[14].mxu0 %vm143_vm3, %v8708_v44  ;;  %6149 = vmatmul.mubr.msk.f32.gmra.mrb[14].mxu1 %vm143_vm3, %v8719_v45 }
  0xce   :  { %742 = vmatprep.mubr.f32.mxu0 %v10634_v0  ;;  %1733 = vmatprep.mubr.f32.mxu1 %v10634_v0 }
  0xd1   :  { %6028 = vmatmul.mubr.msk.f32.gmra.mrb[16].mxu0 %vm143_vm3, %v8724_v46  ;;  %6150 = vmatmul.mubr.msk.f32.gmra.mrb[16].mxu1 %vm143_vm3, %v8735_v47 }
  0xd2   :  { %748 = vmatprep.mubr.f32.mxu0 %v10634_v0  ;;  %1739 = vmatprep.mubr.f32.mxu1 %v10634_v0 }
  0xd5   :  { %6029 = vmatmul.mubr.msk.f32.gmra.mrb[18].mxu0 %vm143_vm3, %v8740_v48  ;;  %6151 = vmatmul.mubr.msk.f32.gmra.mrb[18].mxu1 %vm143_vm3, %v8751_v49 }
  0xd6   :  { %754 = vmatprep.mubr.f32.mxu0 %v10634_v0  ;;  %1745 = vmatprep.mubr.f32.mxu1 %v10634_v0 }
  0xd9   :  { %6030 = vmatmul.mubr.msk.f32.gmra.mrb[20].mxu0 %vm143_vm3, %v8756_v50  ;;  %6152 = vmatmul.mubr.msk.f32.gmra.mrb[20].mxu1 %vm143_vm3, %v8767_v51 }
  0xda   :  { %760 = vmatprep.mubr.f32.mxu0 %v10634_v0  ;;  %1751 = vmatprep.mubr.f32.mxu1 %v10634_v0 }
  0xdd   :  { %6031 = vmatmul.mubr.msk.f32.gmra.mrb[22].mxu0 %vm143_vm3, %v8772_v52  ;;  %6153 = vmatmul.mubr.msk.f32.gmra.mrb[22].mxu1 %vm143_vm3, %v8783_v53 }
  0xde   :  { %766 = vmatprep.mubr.f32.mxu0 %v10634_v0  ;;  %1757 = vmatprep.mubr.f32.mxu1 %v10634_v0 }
  0xe1   :  { %6032 = vmatmul.mubr.msk.f32.gmra.mrb[40].mxu0 %vm143_vm3, %v8788_v54  ;;  %6154 = vmatmul.mubr.msk.f32.gmra.mrb[40].mxu1 %vm143_vm3, %v8799_v55 }
  0xe2   :  { %770 = vmatprep.mubr.f32.mxu0 %v10634_v0  ;;  %1761 = vmatprep.mubr.f32.mxu1 %v10634_v0 }
  0xe5   :  { %6033 = vmatmul.mubr.msk.f32.gmra.mrb[42].mxu0 %vm143_vm3, %v8804_v56  ;;  %6155 = vmatmul.mubr.msk.f32.gmra.mrb[42].mxu1 %vm143_vm3, %v8815_v57 }
  0xe6   :  { %774 = vmatprep.mubr.f32.mxu0 %v10634_v0  ;;  %1765 = vmatprep.mubr.f32.mxu1 %v10634_v0 }
  0xe9   :  { %6034 = vmatmul.mubr.msk.f32.gmra.mrb[44].mxu0 %vm143_vm3, %v8820_v58  ;;  %6156 = vmatmul.mubr.msk.f32.gmra.mrb[44].mxu1 %vm143_vm3, %v8831_v59 }
  0xea   :  { %778 = vmatprep.mubr.f32.mxu0 %v10634_v0  ;;  %1769 = vmatprep.mubr.f32.mxu1 %v10634_v0 }
  0xed   :  { %6035 = vmatmul.mubr.msk.f32.gmra.mrb[46].mxu0 %vm143_vm3, %v8836_v60  ;;  %6157 = vmatmul.mubr.msk.f32.gmra.mrb[46].mxu1 %vm143_vm3, %v9099_v24 }
  0xee   :  { %942 = vmatprep.mubr.f32.mxu0 %v10634_v0  ;;  %1862 = vmatprep.mubr.f32.mxu1 %v10634_v0 }
  0xf1   :  { %6054 = vmatmul.mubr.msk.f32.vlgmr.msra.gmra.mrb[0].mxu0 %vm143_vm3, %v8591_v27  ;;  %6160 = vmatmul.mubr.msk.f32.vlgmr.msra.gmra.mrb[0].mxu1 %vm143_vm3, %v8596_v28 }
  0xf2   :  { %6618 = vmatpush1.bf16.msra.mxu0 %v6617_v33  ;;  %6668 = vmatpush1.bf16.msra.mxu1 %v6617_v33 }
  0xf3   :  { %948 = vmatprep.mubr.f32.mxu0 %v10634_v0  ;;  %1868 = vmatprep.mubr.f32.mxu1 %v10634_v0 }
  0xf4   :  { %6621 = vmatprep.subr.msk.bf16.mxu0 %vm8532_vm2, %v6619_v34  ;;  %6671 = vmatprep.subr.msk.bf16.mxu1 %vm8532_vm2, %v6619_v34 }
  0xf5   :  { %6055 = vmatmul.mubr.msk.f32.gmra.mrb[2].mxu0 %vm143_vm3, %v8611_v30  ;;  %6161 = vmatmul.mubr.msk.f32.gmra.mrb[2].mxu1 %vm143_vm3, %v8618_v31 }
  0xf6   :  { %954 = vmatprep.mubr.f32.mxu0 %v10634_v0  ;;  %1874 = vmatprep.mubr.f32.mxu1 %v10634_v0 }
  0xf7   :  { %6624 = vmatpush1.bf16.msk.msra.mxu0 %vm8532_vm2, %v6622_v63  ;;  %6674 = vmatpush1.bf16.msk.msra.mxu1 %vm8532_vm2, %v6622_v63  ;;  %v2325_v63 = vld [vmem:[#allocation2 + $0x1a0] sm:$0xff] }
  0xf9   :  { %6056 = vmatmul.mubr.msk.f32.gmra.mrb[4].mxu0 %vm143_vm3, %v8639_v35  ;;  %6162 = vmatmul.mubr.msk.f32.gmra.mrb[4].mxu1 %vm143_vm3, %v8644_v36 }
  0xfa   :  { %960 = vmatprep.mubr.f32.mxu0 %v10634_v0  ;;  %1880 = vmatprep.mubr.f32.mxu1 %v10634_v0 }
  0xfd   :  { %6057 = vmatmul.mubr.msk.f32.gmra.mrb[6].mxu0 %vm143_vm3, %v8655_v37  ;;  %6163 = vmatmul.mubr.msk.f32.gmra.mrb[6].mxu1 %vm143_vm3, %v8660_v38 }
  0xfe   :  { %966 = vmatprep.mubr.f32.mxu0 %v10634_v0  ;;  %1886 = vmatprep.mubr.f32.mxu1 %v10634_v0 }
 0x101   :  { %6058 = vmatmul.mubr.msk.f32.gmra.mrb[8].mxu0 %vm143_vm3, %v8671_v39  ;;  %6164 = vmatmul.mubr.msk.f32.gmra.mrb[8].mxu1 %vm143_vm3, %v8676_v40 }
 0x102   :  { %972 = vmatprep.mubr.f32.mxu0 %v10634_v0  ;;  %1892 = vmatprep.mubr.f32.mxu1 %v10634_v0 }
 0x105   :  { %6059 = vmatmul.mubr.msk.f32.gmra.mrb[10].mxu0 %vm143_vm3, %v8687_v41  ;;  %6165 = vmatmul.mubr.msk.f32.gmra.mrb[10].mxu1 %vm143_vm3, %v8692_v42 }
 0x106   :  { %978 = vmatprep.mubr.f32.mxu0 %v10634_v0  ;;  %1898 = vmatprep.mubr.f32.mxu1 %v10634_v0 }
 0x109   :  { %6060 = vmatmul.mubr.msk.f32.gmra.mrb[12].mxu0 %vm143_vm3, %v8703_v43  ;;  %6166 = vmatmul.mubr.msk.f32.gmra.mrb[12].mxu1 %vm143_vm3, %v8708_v44 }
 0x10a   :  { %984 = vmatprep.mubr.f32.mxu0 %v10634_v0  ;;  %1904 = vmatprep.mubr.f32.mxu1 %v10634_v0 }
 0x10d   :  { %6061 = vmatmul.mubr.msk.f32.gmra.mrb[14].mxu0 %vm143_vm3, %v8719_v45  ;;  %6167 = vmatmul.mubr.msk.f32.gmra.mrb[14].mxu1 %vm143_vm3, %v8724_v46 }
 0x10e   :  { %990 = vmatprep.mubr.f32.mxu0 %v10634_v0  ;;  %1910 = vmatprep.mubr.f32.mxu1 %v10634_v0 }
 0x111   :  { %6062 = vmatmul.mubr.msk.f32.gmra.mrb[16].mxu0 %vm143_vm3, %v8735_v47  ;;  %6168 = vmatmul.mubr.msk.f32.gmra.mrb[16].mxu1 %vm143_vm3, %v8740_v48 }
 0x112   :  { %996 = vmatprep.mubr.f32.mxu0 %v10634_v0  ;;  %1916 = vmatprep.mubr.f32.mxu1 %v10634_v0 }
 0x115   :  { %6063 = vmatmul.mubr.msk.f32.gmra.mrb[18].mxu0 %vm143_vm3, %v8751_v49  ;;  %6169 = vmatmul.mubr.msk.f32.gmra.mrb[18].mxu1 %vm143_vm3, %v8756_v50 }
 0x116   :  { %1002 = vmatprep.mubr.f32.mxu0 %v10634_v0  ;;  %1922 = vmatprep.mubr.f32.mxu1 %v10634_v0 }
 0x119   :  { %6064 = vmatmul.mubr.msk.f32.gmra.mrb[20].mxu0 %vm143_vm3, %v8767_v51  ;;  %6170 = vmatmul.mubr.msk.f32.gmra.mrb[20].mxu1 %vm143_vm3, %v8772_v52 }
 0x11a   :  { %1008 = vmatprep.mubr.f32.mxu0 %v10634_v0  ;;  %1928 = vmatprep.mubr.f32.mxu1 %v10634_v0 }
 0x11d   :  { %6065 = vmatmul.mubr.msk.f32.gmra.mrb[22].mxu0 %vm143_vm3, %v8783_v53  ;;  %6171 = vmatmul.mubr.msk.f32.gmra.mrb[22].mxu1 %vm143_vm3, %v8788_v54 }
 0x11e   :  { %1014 = vmatprep.mubr.f32.mxu0 %v10634_v0  ;;  %1934 = vmatprep.mubr.f32.mxu1 %v10634_v0 }
 0x121   :  { %6066 = vmatmul.mubr.msk.f32.gmra.mrb[48].mxu0 %vm143_vm3, %v8799_v55  ;;  %6172 = vmatmul.mubr.msk.f32.gmra.mrb[48].mxu1 %vm143_vm3, %v8804_v56 }
 0x122   :  { %1018 = vmatprep.mubr.f32.mxu0 %v10634_v0  ;;  %1938 = vmatprep.mubr.f32.mxu1 %v10634_v0 }
 0x125   :  { %6067 = vmatmul.mubr.msk.f32.gmra.mrb[50].mxu0 %vm143_vm3, %v8815_v57  ;;  %6173 = vmatmul.mubr.msk.f32.gmra.mrb[50].mxu1 %vm143_vm3, %v8820_v58 }
 0x126   :  { %1022 = vmatprep.mubr.f32.mxu0 %v10634_v0  ;;  %1942 = vmatprep.mubr.f32.mxu1 %v10634_v0 }
 0x129   :  { %6068 = vmatmul.mubr.msk.f32.gmra.mrb[52].mxu0 %vm143_vm3, %v8831_v59  ;;  %6174 = vmatmul.mubr.msk.f32.gmra.mrb[52].mxu1 %vm143_vm3, %v8836_v60 }
 0x12a   :  { %1026 = vmatprep.mubr.f32.mxu0 %v10634_v0  ;;  %1946 = vmatprep.mubr.f32.mxu1 %v10634_v0 }
 0x12d   :  { %6069 = vmatmul.mubr.msk.f32.gmra.mrb[54].mxu0 %vm143_vm3, %v9099_v24  ;;  %6175 = vmatmul.mubr.msk.f32.gmra.mrb[54].mxu1 %vm143_vm3, %v9226_v10 }
 0x12e   :  { %1190 = vmatprep.mubr.f32.mxu0 %v10634_v0  ;;  %2104 = vmatprep.mubr.f32.mxu1 %v10634_v0 }
 0x131   :  { %6088 = vmatmul.mubr.msk.f32.vlgmr.msra.gmra.mrb[0].mxu0 %vm143_vm3, %v8596_v28  ;;  %6194 = vmatmul.mubr.msk.f32.vlgmr.msra.gmra.mrb[0].mxu1 %vm143_vm3, %v8611_v30 }
 0x132   :  { %1196 = vmatprep.mubr.f32.mxu0 %v10634_v0  ;;  %2110 = vmatprep.mubr.f32.mxu1 %v10634_v0 }
 0x134   :  { %v337_v27 = vpop.f32.mrb[24].mxu0  ;;  %v1453_v59 = vpop.f32.mrb[24].mxu1 }
 0x135   :  { %v338_v1 = vpop.f32.mrb[25].mxu0  ;;  %6089 = vmatmul.mubr.msk.f32.gmra.mrb[2].mxu0 %vm143_vm3, %v8618_v31  ;;  %v1454_v2 = vpop.f32.mrb[25].mxu1  ;;  %6195 = vmatmul.mubr.msk.f32.gmra.mrb[2].mxu1 %vm143_vm3, %v8639_v35  ;;  %v2327_v27 = vld [vmem:[#allocation2 + $0x1b0] sm:$0xff] }
 0x136   :  { %1202 = vmatprep.mubr.f32.mxu0 %v10634_v0  ;;  %2116 = vmatprep.mubr.f32.mxu1 %v10634_v0  ;;  %v9363_v59 = vpack.c.bf16 %v2327_v27, %v2325_v63 }
 0x138   :  { %v341_v28 = vpop.f32.mrb[26].mxu0  ;;  %v1457_v30 = vpop.f32.mrb[26].mxu1 }
 0x139   :  { %v342_v3 = vpop.f32.mrb[27].mxu0  ;;  %6090 = vmatmul.mubr.msk.f32.gmra.mrb[4].mxu0 %vm143_vm3, %v8644_v36  ;;  %v1458_v4 = vpop.f32.mrb[27].mxu1  ;;  %6196 = vmatmul.mubr.msk.f32.gmra.mrb[4].mxu1 %vm143_vm3, %v8655_v37 }
 0x13a   :  { %1208 = vmatprep.mubr.f32.mxu0 %v10634_v0  ;;  %2122 = vmatprep.mubr.f32.mxu1 %v10634_v0  ;;  %v2330_v3 = vld [vmem:[#allocation2 + $0x1c8] sm:$0xff]  ;;  %v2332_v4 = vld [vmem:[#allocation2 + $0x1d8] sm:$0xff] }
 0x13c   :  { %v345_v31 = vpop.f32.mrb[28].mxu0  ;;  %v1461_v35 = vpop.f32.mrb[28].mxu1 }
 0x13d   :  { %v346_v5 = vpop.f32.mrb[29].mxu0  ;;  %6091 = vmatmul.mubr.msk.f32.gmra.mrb[6].mxu0 %vm143_vm3, %v8660_v38  ;;  %v1462_v6 = vpop.f32.mrb[29].mxu1  ;;  %6197 = vmatmul.mubr.msk.f32.gmra.mrb[6].mxu1 %vm143_vm3, %v8671_v39  ;;  %v2308_v38 = vld [vmem:[#allocation2 + $0x118] sm:$0xff]  ;;  %v9369_v31 = vpack.c.bf16 %v2332_v4, %v2330_v3  ;;  %v2329_v35 = vld [vmem:[#allocation2 + $0x1c0] sm:$0xff] }
 0x13e   :  { %1214 = vmatprep.mubr.f32.mxu0 %v10634_v0  ;;  %2128 = vmatprep.mubr.f32.mxu1 %v10634_v0  ;;  %v9264_v39 = vpack.c.bf16 %v2308_v38, %v2306_v9  ;;  %v2331_v5 = vld [vmem:[#allocation2 + $0x1d0] sm:$0xff]  ;;  %v2333_v9 = vld [vmem:[#allocation2 + $0x1e0] sm:$0xff] }
 0x13f   :  { %v9371_v6 = vpack.c.bf16 %v2331_v5, %v2329_v35  ;;  %v2335_v38 = vld [vmem:[#allocation2 + $0x1f0] sm:$0xff] }
 0x140   :  { %v349_v36 = vpop.f32.mrb[30].mxu0  ;;  %v1465_v37 = vpop.f32.mrb[30].mxu1  ;;  %6676 = vmatprep.subr.bf16.mxu0 %v9264_v39  ;;  %6836 = vmatprep.subr.bf16.mxu1 %v9264_v39  ;;  %v9384_v11 = vpack.c.bf16 %v2335_v38, %v2333_v9 }
 0x141   :  { %v350_v7 = vpop.f32.mrb[31].mxu0  ;;  %6092 = vmatmul.mubr.msk.f32.gmra.mrb[8].mxu0 %vm143_vm3, %v8676_v40  ;;  %v1466_v8 = vpop.f32.mrb[31].mxu1  ;;  %6198 = vmatmul.mubr.msk.f32.gmra.mrb[8].mxu1 %vm143_vm3, %v8687_v41  ;;  %v9270_v40 = vpack.c.bf16 %v2312_v14, %v2310_v13  ;;  %v2309_v41 = vld [vmem:[#allocation2 + $0x120] sm:$0xff]  ;;  %v6189_v36 = vld [vmem:[%s10621_s0 + $0x108] sm:$0xff]  ;;  %v2275_v13 = vld [vmem:[#allocation2 + $0x18] sm:$0xff] }
 0x142   :  { %1220 = vmatprep.mubr.f32.mxu0 %v10634_v0  ;;  %2134 = vmatprep.mubr.f32.mxu1 %v10634_v0  ;;  %v9280_v19 = vpack.c.bf16 %v2311_v16, %v2309_v41  ;;  %v2334_v37 = vld [vmem:[#allocation2 + $0x1e8] sm:$0xff]  ;;  %v2336_v7 = vld [vmem:[#allocation2 + $0x1f8] sm:$0xff]  ;;  %v9392_v14 = vpack.c.bf16 %v2275_v13, %v2273_v12 }
 0x143   :  { %6678 = vmatpush1.bf16.msra.mxu0 %v9266_v15  ;;  %6838 = vmatpush1.bf16.msra.mxu1 %v9266_v15  ;;  %v9381_v8 = vpack.c.bf16 %v2336_v7, %v2334_v37  ;;  %v6191_v41 = vld [vmem:[%s10621_s0 + $0x118] sm:$0xff] }
 0x144   :  { %6680 = vmatprep.subr.bf16.mxu0 %v9270_v40  ;;  %6840 = vmatprep.subr.bf16.mxu1 %v9270_v40 }
 0x145   :  { %6093 = vmatmul.mubr.msk.f32.gmra.mrb[10].mxu0 %vm143_vm3, %v8692_v42  ;;  %6199 = vmatmul.mubr.msk.f32.gmra.mrb[10].mxu1 %vm143_vm3, %v8703_v43  ;;  %v9284_v42 = vpack.c.bf16 %v2316_v18, %v2314_v17  ;;  %v2315_v43 = vld [vmem:[#allocation2 + $0x150] sm:$0xff] }
 0x146   :  { %1226 = vmatprep.mubr.f32.mxu0 %v10634_v0  ;;  %2140 = vmatprep.mubr.f32.mxu1 %v10634_v0  ;;  %v9294_v20 = vpack.c.bf16 %v2315_v43, %v2313_v21 }
 0x147   :  { %6682 = vmatpush1.bf16.msra.mxu0 %v9280_v19  ;;  %6842 = vmatpush1.bf16.msra.mxu1 %v9280_v19 }
 0x148   :  { %6684 = vmatprep.subr.bf16.mxu0 %v9284_v42  ;;  %6844 = vmatprep.subr.bf16.mxu1 %v9284_v42 }
 0x149   :  { %6094 = vmatmul.mubr.msk.f32.gmra.mrb[12].mxu0 %vm143_vm3, %v8708_v44  ;;  %6200 = vmatmul.mubr.msk.f32.gmra.mrb[12].mxu1 %vm143_vm3, %v8719_v45  ;;  %v9298_v44 = vpack.c.bf16 %v2320_v23, %v2318_v22  ;;  %v2319_v45 = vld [vmem:[#allocation2 + $0x170] sm:$0xff] }
 0x14a   :  { %1232 = vmatprep.mubr.f32.mxu0 %v10634_v0  ;;  %2146 = vmatprep.mubr.f32.mxu1 %v10634_v0  ;;  %v9308_v26 = vpack.c.bf16 %v2319_v45, %v2317_v25 }
 0x14b   :  { %6686 = vmatpush1.bf16.msra.mxu0 %v9294_v20  ;;  %6846 = vmatpush1.bf16.msra.mxu1 %v9294_v20 }
 0x14c   :  { %6688 = vmatprep.subr.bf16.mxu0 %v9298_v44  ;;  %6848 = vmatprep.subr.bf16.mxu1 %v9298_v44 }
 0x14d   :  { %6095 = vmatmul.mubr.msk.f32.gmra.mrb[14].mxu0 %vm143_vm3, %v8724_v46  ;;  %6201 = vmatmul.mubr.msk.f32.gmra.mrb[14].mxu1 %vm143_vm3, %v8735_v47 }
 0x14e   :  { %1238 = vmatprep.mubr.f32.mxu0 %v10634_v0  ;;  %2152 = vmatprep.mubr.f32.mxu1 %v10634_v0 }
 0x14f   :  { %6690 = vmatpush1.bf16.msra.mxu0 %v9308_v26  ;;  %6850 = vmatpush1.bf16.msra.mxu1 %v9308_v26 }
 0x151   :  { %6096 = vmatmul.mubr.msk.f32.gmra.mrb[16].mxu0 %vm143_vm3, %v8740_v48  ;;  %6202 = vmatmul.mubr.msk.f32.gmra.mrb[16].mxu1 %vm143_vm3, %v8751_v49 }
 0x152   :  { %1244 = vmatprep.mubr.f32.mxu0 %v10634_v0  ;;  %2158 = vmatprep.mubr.f32.mxu1 %v10634_v0 }
 0x155   :  { %6097 = vmatmul.mubr.msk.f32.gmra.mrb[18].mxu0 %vm143_vm3, %v8756_v50  ;;  %6203 = vmatmul.mubr.msk.f32.gmra.mrb[18].mxu1 %vm143_vm3, %v8767_v51  ;;  %v2322_v50 = vld [vmem:[#allocation2 + $0x188] sm:$0xff]  ;;  %v2324_v51 = vld [vmem:[#allocation2 + $0x198] sm:$0xff] }
 0x156   :  { %1250 = vmatprep.mubr.f32.mxu0 %v10634_v0  ;;  %2164 = vmatprep.mubr.f32.mxu1 %v10634_v0 }
 0x159   :  { %6098 = vmatmul.mubr.msk.f32.gmra.mrb[20].mxu0 %vm143_vm3, %v8772_v52  ;;  %6204 = vmatmul.mubr.msk.f32.gmra.mrb[20].mxu1 %vm143_vm3, %v8783_v53  ;;  %v2321_v52 = vld [vmem:[#allocation2 + $0x180] sm:$0xff]  ;;  %v9353_v53 = vpack.c.bf16 %v2324_v51, %v2322_v50 }
 0x15a   :  { %1256 = vmatprep.mubr.f32.mxu0 %v10634_v0  ;;  %2170 = vmatprep.mubr.f32.mxu1 %v10634_v0 }
 0x15b   :  { %6692 = vmatprep.subr.bf16.mxu0 %v9353_v53  ;;  %6852 = vmatprep.subr.bf16.mxu1 %v9353_v53 }
 0x15d   :  { %6099 = vmatmul.mubr.msk.f32.gmra.mrb[22].mxu0 %vm143_vm3, %v8788_v54  ;;  %6205 = vmatmul.mubr.msk.f32.gmra.mrb[22].mxu1 %vm143_vm3, %v8799_v55  ;;  %v2323_v54 = vld [vmem:[#allocation2 + $0x190] sm:$0xff] }
 0x15e   :  { %1262 = vmatprep.mubr.f32.mxu0 %v10634_v0  ;;  %2176 = vmatprep.mubr.f32.mxu1 %v10634_v0  ;;  %v9355_v55 = vpack.c.bf16 %v2323_v54, %v2321_v52 }
 0x160   :  { %6694 = vmatpush1.bf16.msra.mxu0 %v9355_v55  ;;  %6854 = vmatpush1.bf16.msra.mxu1 %v9355_v55 }
 0x161   :  { %6100 = vmatmul.mubr.msk.f32.gmra.mrb[56].mxu0 %vm143_vm3, %v8804_v56  ;;  %6206 = vmatmul.mubr.msk.f32.gmra.mrb[56].mxu1 %vm143_vm3, %v8815_v57 }
 0x162   :  { %1266 = vmatprep.mubr.f32.mxu0 %v10634_v0  ;;  %2180 = vmatprep.mubr.f32.mxu1 %v10634_v0 }
 0x165   :  { %6101 = vmatmul.mubr.msk.f32.gmra.mrb[58].mxu0 %vm143_vm3, %v8820_v58  ;;  %6207 = vmatmul.mubr.msk.f32.gmra.mrb[58].mxu1 %vm143_vm3, %v6189_v36 }
 0x166   :  { %1270 = vmatprep.mubr.f32.mxu0 %v10634_v0  ;;  %2184 = vmatprep.mubr.f32.mxu1 %v10634_v0 }
 0x169   :  { %6102 = vmatmul.mubr.msk.f32.gmra.mrb[60].mxu0 %vm143_vm3, %v8836_v60  ;;  %6208 = vmatmul.mubr.msk.f32.gmra.mrb[60].mxu1 %vm143_vm3, %v9099_v24 }
 0x16a   :  { %1274 = vmatprep.mubr.f32.mxu0 %v10634_v0  ;;  %2188 = vmatprep.mubr.f32.mxu1 %v10634_v0 }
 0x16d   :  { %6103 = vmatmul.mubr.msk.f32.gmra.mrb[62].mxu0 %vm143_vm3, %v9226_v10  ;;  %v9361_v10 = vpack.c.bf16 %v2328_v62, %v2326_v61  ;;  %6209 = vmatmul.mubr.msk.f32.gmra.mrb[62].mxu1 %vm143_vm3, %v6191_v41 }
 0x16e   :  { %2568 = vmatprep.mubr.f32.mxu0 %v10634_v0  ;;  %2930 = vmatprep.mubr.f32.mxu1 %v10634_v0 }
 0x16f   :  { %6696 = vmatprep.subr.bf16.mxu0 %v9361_v10  ;;  %6856 = vmatprep.subr.bf16.mxu1 %v9361_v10 }
 0x170   :  { %6698 = vmatpush1.bf16.msra.mxu0 %v9363_v59  ;;  %6858 = vmatpush1.bf16.msra.mxu1 %v9363_v59 }
 0x171   :  { %6700 = vmatprep.subr.bf16.mxu0 %v9369_v31  ;;  %6860 = vmatprep.subr.bf16.mxu1 %v9369_v31 }
 0x174   :  { %v544_v46 = vpop.f32.mrb[32].mxu0  ;;  %v1606_v47 = vpop.f32.mrb[32].mxu1  ;;  %6702 = vmatpush1.bf16.msra.mxu0 %v9371_v6  ;;  %6862 = vmatpush1.bf16.msra.mxu1 %v9371_v6 }
 0x175   :  { %v545_v48 = vpop.f32.mrb[33].mxu0  ;;  %v1607_v49 = vpop.f32.mrb[33].mxu1  ;;  %6704 = vmatprep.subr.bf16.mxu0 %v9381_v8  ;;  %6864 = vmatprep.subr.bf16.mxu1 %v9381_v8 }
 0x178   :  { %v548_v56 = vpop.f32.mrb[34].mxu0  ;;  %v1610_v57 = vpop.f32.mrb[34].mxu1  ;;  %6706 = vmatpush1.bf16.msra.mxu0 %v9384_v11  ;;  %6866 = vmatpush1.bf16.msra.mxu1 %v9384_v11 }
 0x179   :  { %v549_v58 = vpop.f32.mrb[35].mxu0  ;;  %v1611_v60 = vpop.f32.mrb[35].mxu1  ;;  %6708 = vmatprep.subr.bf16.mxu0 %v9392_v14  ;;  %6868 = vmatprep.subr.bf16.mxu1 %v9392_v14 }
 0x17c   :  { %v552_v29 = vpop.f32.mrb[36].mxu0  ;;  %v1614_v32 = vpop.f32.mrb[36].mxu1 }
 0x17d   :  { %v553_v33 = vpop.f32.mrb[37].mxu0  ;;  %v1615_v34 = vpop.f32.mrb[37].mxu1 }
 0x180   :  { %v556_v1 = vpop.f32.mrb[38].mxu0  ;;  %v1618_v2 = vpop.f32.mrb[38].mxu1 }
 0x181   :  { %v557_v28 = vpop.f32.mrb[39].mxu0  ;;  %v1619_v30 = vpop.f32.mrb[39].mxu1 }
 0x1b4   :  { %v768_v16 = vpop.f32.mrb[40].mxu0  ;;  %v1759_v17 = vpop.f32.mrb[40].mxu1 }
 0x1b5   :  { %v769_v18 = vpop.f32.mrb[41].mxu0  ;;  %v1760_v24 = vpop.f32.mrb[41].mxu1 }
 0x1b6   :  { %v2272_v18 = vld [vmem:[#allocation2] sm:$0xff]  ;;  %v2274_v24 = vld [vmem:[#allocation2 + $0x10] sm:$0xff] }
 0x1b8   :  { %v772_v21 = vpop.f32.mrb[42].mxu0  ;;  %v1763_v43 = vpop.f32.mrb[42].mxu1 }
 0x1b9   :  { %v773_v22 = vpop.f32.mrb[43].mxu0  ;;  %v1764_v23 = vpop.f32.mrb[43].mxu1  ;;  %v9407_v21 = vld [vmem:[%s10623_s2] ss:$0 sm:$0xff] }
 0x1ba   :  { %v2277_v23 = vld [vmem:[#allocation2 + $0x28] sm:$0xff] }
 0x1bc   :  { %v776_v25 = vpop.f32.mrb[44].mxu0  ;;  %v1767_v45 = vpop.f32.mrb[44].mxu1 }
 0x1bd   :  { %v777_v46 = vpop.f32.mrb[45].mxu0  ;;  %v1768_v47 = vpop.f32.mrb[45].mxu1  ;;  %v2279_v25 = vld [vmem:[#allocation2 + $0x38] sm:$0xff] }
 0x1c0   :  { %v780_v48 = vpop.f32.mrb[46].mxu0  ;;  %v1771_v49 = vpop.f32.mrb[46].mxu1 }
 0x1c1   :  { %v781_v50 = vpop.f32.mrb[47].mxu0  ;;  %v1772_v51 = vpop.f32.mrb[47].mxu1  ;;  %v9412_v48 = vpack.c.bf16 %v2274_v24, %v2272_v18  ;;  %v2284_v18 = vld [vmem:[#allocation2 + $0x60] sm:$0xff]  ;;  %v2286_v24 = vld [vmem:[#allocation2 + $0x70] sm:$0xff] }
 0x1f4   :  { %v1016_v52 = vpop.f32.mrb[48].mxu0  ;;  %v1936_v54 = vpop.f32.mrb[48].mxu1 }
 0x1f5   :  { %v1017_v56 = vpop.f32.mrb[49].mxu0  ;;  %v1937_v57 = vpop.f32.mrb[49].mxu1  ;;  %v9415_v54 = vpack.c.bf16 %v2279_v25, %v2277_v23  ;;  %v2289_v23 = vld [vmem:[#allocation2 + $0x88] sm:$0xff]  ;;  %v2291_v25 = vld [vmem:[#allocation2 + $0x98] sm:$0xff] }
 0x1f6   :  { %v2276_v56 = vld [vmem:[#allocation2 + $0x20] sm:$0xff]  ;;  %v2278_v57 = vld [vmem:[#allocation2 + $0x30] sm:$0xff] }
 0x1f8   :  { %v1020_v58 = vpop.f32.mrb[50].mxu0  ;;  %v1940_v60 = vpop.f32.mrb[50].mxu1 }
 0x1f9   :  { %v1021_v29 = vpop.f32.mrb[51].mxu0  ;;  %v1941_v32 = vpop.f32.mrb[51].mxu1 }
 0x1fa   :  { %v2281_v29 = vld [vmem:[#allocation2 + $0x48] sm:$0xff]  ;;  %v2283_v32 = vld [vmem:[#allocation2 + $0x58] sm:$0xff] }
 0x1fc   :  { %v1024_v33 = vpop.f32.mrb[52].mxu0  ;;  %v1944_v34 = vpop.f32.mrb[52].mxu1 }
 0x1fd   :  { %v1025_v61 = vpop.f32.mrb[53].mxu0  ;;  %v1945_v62 = vpop.f32.mrb[53].mxu1 }
 0x1fe   :  { %v9421_v62 = vpack.c.bf16 %v2278_v57, %v2276_v56 }
 0x200   :  { %v1028_v63 = vpop.f32.mrb[54].mxu0  ;;  %v1948_v27 = vpop.f32.mrb[54].mxu1 }
 0x201   :  { %v1029_v1 = vpop.f32.mrb[55].mxu0  ;;  %v1949_v2 = vpop.f32.mrb[55].mxu1 }
 0x204   :  { %v1192_v28 = vpop.f32.mrb[0].mxu0  ;;  %v2106_v30 = vpop.f32.mrb[0].mxu1 }
 0x205   :  { %v1194_v3 = vpop.f32.mrb[1].mxu0  ;;  %v2108_v4 = vpop.f32.mrb[1].mxu1 }
 0x206   :  { %v1303_v35 = vmax.f32 %v1192_v28, %v1194_v3  ;;  %v2217_v5 = vmax.f32 %v2106_v30, %v2108_v4  ;;  %v9427_v28 = vpack.c.bf16 %v2283_v32, %v2281_v29  ;;  %v2280_v30 = vld [vmem:[#allocation2 + $0x40] sm:$0xff]  ;;  %v2282_v3 = vld [vmem:[#allocation2 + $0x50] sm:$0xff] }
 0x207   :  { %v2290_v29 = vld [vmem:[#allocation2 + $0x90] sm:$0xff] }
 0x208   :  { %v9402_v36 = vmax.f32 %v1303_v35, %v2217_v5  ;;  %v1198_v37 = vpop.f32.mrb[2].mxu0  ;;  %v2112_v7 = vpop.f32.mrb[2].mxu1  ;;  %v2285_v5 = vld [vmem:[#allocation2 + $0x68] sm:$0xff] }
 0x209   :  { %v1200_v9 = vpop.f32.mrb[3].mxu0  ;;  %v2114_v38 = vpop.f32.mrb[3].mxu1 }
 0x20a   :  { %v1304_v12 = vmax.f32 %v1198_v37, %v1200_v9  ;;  %v2218_v13 = vmax.f32 %v2112_v7, %v2114_v38  ;;  %v2287_v37 = vld [vmem:[#allocation2 + $0x78] sm:$0xff] }
 0x20c   :  { %v2230_v41 = vmax.f32 %v1304_v12, %v2218_v13  ;;  %v1204_v16 = vpop.f32.mrb[4].mxu0  ;;  %v2118_v17 = vpop.f32.mrb[4].mxu1  ;;  %v9435_v12 = vpack.c.bf16 %v2282_v3, %v2280_v30 }
 0x20d   :  { %v1206_v43 = vpop.f32.mrb[5].mxu0  ;;  %v2120_v22 = vpop.f32.mrb[5].mxu1 }
 0x20e   :  { %v9410_v45 = vadd.f32 %v9407_v21, %v2230_v41  ;;  %v1305_v46 = vmax.f32 %v1204_v16, %v1206_v43  ;;  %v2219_v47 = vmax.f32 %v2118_v17, %v2120_v22  ;;  %v9439_v17 = vpack.c.bf16 %v2287_v37, %v2285_v5  ;;  %v2292_v37 = vld [vmem:[#allocation2 + $0xa0] sm:$0xff] }
 0x210   :  { %v10633_v49 = vmax.f32 %v9410_v45, 0.0  ;;  %v2231_v50 = vmax.f32 %v1305_v46, %v2219_v47  ;;  %v1210_v51 = vpop.f32.mrb[6].mxu0  ;;  %v2124_v52 = vpop.f32.mrb[6].mxu1 }
 0x211   :  { %v1212_v58 = vpop.f32.mrb[7].mxu0  ;;  %v2126_v60 = vpop.f32.mrb[7].mxu1 }
 0x212   :  { %v2250_v33 = vadd.f32 %v9407_v21, %v2231_v50  ;;  %v1306_v34 = vmax.f32 %v1210_v51, %v1212_v58  ;;  %v2220_v61 = vmax.f32 %v2124_v52, %v2126_v60  ;;  %2569 = vmatmul.mubr.f32.vlgmr.msra.gmra.mrb[64].mxu0 %v10633_v49  ;;  %v9447_v51 = vpack.c.bf16 %v2286_v24, %v2284_v18  ;;  %v2288_v60 = vld [vmem:[#allocation2 + $0x80] sm:$0xff] }
 0x213   :  { %6710 = vmatpush1.bf16.msra.mxu0 %v9412_v48  ;;  %2639 = vmatprep.mubr.f32.mxu0 %v10634_v0  ;;  %v9451_v58 = vpack.c.bf16 %v2291_v25, %v2289_v23  ;;  %v9458_v30 = vpack.c.bf16 %v2290_v29, %v2288_v60  ;;  %v2301_v29 = vld [vmem:[#allocation2 + $0xe8] sm:$0xff] }
 0x214   :  { %v9424_v63 = vmax.f32 %v2250_v33, 0.0  ;;  %v2232_v27 = vmax.f32 %v1306_v34, %v2220_v61  ;;  %v1216_v1 = vpop.f32.mrb[8].mxu0  ;;  %v2130_v2 = vpop.f32.mrb[8].mxu1  ;;  %6712 = vmatprep.subr.bf16.mxu0 %v9415_v54  ;;  %v2293_v34 = vld [vmem:[#allocation2 + $0xa8] sm:$0xff]  ;;  %v2295_v61 = vld [vmem:[#allocation2 + $0xb8] sm:$0xff] }
 0x215   :  { %v1218_v4 = vpop.f32.mrb[9].mxu0  ;;  %v2132_v35 = vpop.f32.mrb[9].mxu1  ;;  %v9462_v5 = vpack.c.bf16 %v2295_v61, %v2293_v34 }
 0x216   :  { %v9430_v7 = vadd.f32 %v9407_v21, %v2232_v27  ;;  %v1307_v9 = vmax.f32 %v1216_v1, %v1218_v4  ;;  %v2221_v38 = vmax.f32 %v2130_v2, %v2132_v35  ;;  %2931 = vmatmul.mubr.f32.vlgmr.msra.gmra.mrb[64].mxu1 %v9424_v63 }
 0x217   :  { %6714 = vmatpush1.bf16.msra.mxu0 %v9421_v62  ;;  %6870 = vmatpush1.bf16.msra.mxu1 %v9412_v48 }
 0x218   :  { %v2233_v13 = vmax.f32 %v1307_v9, %v2221_v38  ;;  %v1222_v41 = vpop.f32.mrb[10].mxu0  ;;  %v2136_v16 = vpop.f32.mrb[10].mxu1  ;;  %6716 = vmatprep.subr.bf16.mxu0 %v9427_v28  ;;  %6872 = vmatprep.subr.bf16.mxu1 %v9415_v54  ;;  %v2294_v9 = vld [vmem:[#allocation2 + $0xb0] sm:$0xff] }
 0x219   :  { %v1224_v43 = vpop.f32.mrb[11].mxu0  ;;  %v2138_v22 = vpop.f32.mrb[11].mxu1  ;;  %3001 = vmatprep.mubr.f32.mxu1 %v10634_v0 }
 0x21a   :  { %v9443_v46 = vadd.f32 %v9407_v21, %v2233_v13  ;;  %v1308_v47 = vmax.f32 %v1222_v41, %v1224_v43  ;;  %v2222_v50 = vmax.f32 %v2136_v16, %v2138_v22  ;;  %v2297_v41 = vld [vmem:[#allocation2 + $0xc8] sm:$0xff]  ;;  %v2299_v16 = vld [vmem:[#allocation2 + $0xd8] sm:$0xff]  ;;  %v9469_v22 = vpack.c.bf16 %v2294_v9, %v2292_v37  ;;  %v2300_v37 = vld [vmem:[#allocation2 + $0xe0] sm:$0xff] }
 0x21b   :  { %6718 = vmatpush1.bf16.msra.mxu0 %v9435_v12  ;;  %6874 = vmatpush1.bf16.msra.mxu1 %v9421_v62  ;;  %v2302_v9 = vld [vmem:[#allocation2 + $0xf0] sm:$0xff] }
 0x21c   :  { %v2234_v52 = vmax.f32 %v1308_v47, %v2222_v50  ;;  %v1228_v56 = vpop.f32.mrb[12].mxu0  ;;  %v2142_v57 = vpop.f32.mrb[12].mxu1  ;;  %6720 = vmatprep.subr.bf16.mxu0 %v9439_v17  ;;  %6876 = vmatprep.subr.bf16.mxu1 %v9427_v28  ;;  %v9473_v50 = vpack.c.bf16 %v2299_v16, %v2297_v41  ;;  %v2339_v41 = vld [vmem:[#allocation2 + $0x208] sm:$0xff]  ;;  %v2341_v16 = vld [vmem:[#allocation2 + $0x218] sm:$0xff] }
 0x21d   :  { %v1230_v32 = vpop.f32.mrb[13].mxu0  ;;  %v2144_v33 = vpop.f32.mrb[13].mxu1 }
 0x21e   :  { %v9454_v27 = vadd.f32 %v9407_v21, %v2234_v52  ;;  %v1309_v1 = vmax.f32 %v1228_v56, %v1230_v32  ;;  %v2223_v2 = vmax.f32 %v2142_v57, %v2144_v33  ;;  %v2296_v52 = vld [vmem:[#allocation2 + $0xc0] sm:$0xff]  ;;  %v2298_v56 = vld [vmem:[#allocation2 + $0xd0] sm:$0xff]  ;;  %v2303_v32 = vld [vmem:[#allocation2 + $0xf8] sm:$0xff] }
 0x21f   :  { %6722 = vmatpush1.bf16.msra.mxu0 %v9447_v51  ;;  %6878 = vmatpush1.bf16.msra.mxu1 %v9435_v12 }
 0x220   :  { %v2235_v3 = vmax.f32 %v1309_v1, %v2223_v2  ;;  %v1234_v4 = vpop.f32.mrb[14].mxu0  ;;  %v2148_v35 = vpop.f32.mrb[14].mxu1  ;;  %6724 = vmatprep.subr.bf16.mxu0 %v9451_v58  ;;  %6880 = vmatprep.subr.bf16.mxu1 %v9439_v17  ;;  %v9480_v1 = vpack.c.bf16 %v2298_v56, %v2296_v52 }
 0x221   :  { %v1236_v38 = vpop.f32.mrb[15].mxu0  ;;  %v2150_v13 = vpop.f32.mrb[15].mxu1 }
 0x222   :  { %v9465_v18 = vadd.f32 %v9407_v21, %v2235_v3  ;;  %v1310_v24 = vmax.f32 %v1234_v4, %v1236_v38  ;;  %v2224_v43 = vmax.f32 %v2148_v35, %v2150_v13  ;;  %v9484_v35 = vpack.c.bf16 %v2303_v32, %v2301_v29  ;;  %v2338_v29 = vld [vmem:[#allocation2 + $0x200] sm:$0xff]  ;;  %v2340_v32 = vld [vmem:[#allocation2 + $0x210] sm:$0xff] }
 0x223   :  { %6726 = vmatpush1.bf16.msra.mxu0 %v9458_v30  ;;  %6882 = vmatpush1.bf16.msra.mxu1 %v9447_v51 }
 0x224   :  { %10783 = vst [vmem:[#allocation8_spill] sm:$0xff] %v9465_v18  ;;  %v2236_v23 = vmax.f32 %v1310_v24, %v2224_v43  ;;  %v1240_v25 = vpop.f32.mrb[16].mxu0  ;;  %v2154_v47 = vpop.f32.mrb[16].mxu1  ;;  %6728 = vmatprep.subr.bf16.mxu0 %v9462_v5  ;;  %6884 = vmatprep.subr.bf16.mxu1 %v9451_v58  ;;  %v2377_v18 = vld [vmem:[#allocation2 + $0x330] sm:$0xff] }
 0x225   :  { %v1242_v57 = vpop.f32.mrb[17].mxu0  ;;  %v2156_v60 = vpop.f32.mrb[17].mxu1 }
 0x226   :  { %v9476_v33 = vadd.f32 %v9407_v21, %v2236_v23  ;;  %v1311_v34 = vmax.f32 %v1240_v25, %v1242_v57  ;;  %v2225_v61 = vmax.f32 %v2154_v47, %v2156_v60  ;;  %v9491_v25 = vpack.c.bf16 %v2302_v9, %v2300_v37 }
 0x227   :  { %6730 = vmatpush1.bf16.msra.mxu0 %v9469_v22  ;;  %6886 = vmatpush1.bf16.msra.mxu1 %v9458_v30  ;;  %v2248_v47 = vadd.f32 %v9407_v21, %v9402_v36  ;;  %v9497_v60 = vpack.c.bf16 %v2341_v16, %v2339_v41  ;;  %v9504_v9 = vpack.c.bf16 %v2340_v32, %v2338_v29 }
 0x228   :  { %10784 = vst [vmem:[#allocation9_spill] sm:$0xff] %v9476_v33  ;;  %v2237_v2 = vmax.f32 %v1311_v34, %v2225_v61  ;;  %v1246_v3 = vpop.f32.mrb[18].mxu0  ;;  %v2160_v4 = vpop.f32.mrb[18].mxu1  ;;  %6732 = vmatprep.subr.bf16.mxu0 %v9473_v50  ;;  %6888 = vmatprep.subr.bf16.mxu1 %v9462_v5 }
 0x229   :  { %v1248_v38 = vpop.f32.mrb[19].mxu0  ;;  %v2162_v13 = vpop.f32.mrb[19].mxu1 }
 0x22a   :  { %v9487_v24 = vadd.f32 %v9407_v21, %v2237_v2  ;;  %v1312_v43 = vmax.f32 %v1246_v3, %v1248_v38  ;;  %v2226_v23 = vmax.f32 %v2160_v4, %v2162_v13  ;;  %v2343_v2 = vld [vmem:[#allocation2 + $0x228] sm:$0xff]  ;;  %v2345_v3 = vld [vmem:[#allocation2 + $0x238] sm:$0xff]  ;;  %v2260_v38 = vmax.f32 %v2248_v47, 0.0 }
 0x22b   :  { %6734 = vmatpush1.bf16.msra.mxu0 %v9480_v1  ;;  %6890 = vmatpush1.bf16.msra.mxu1 %v9469_v22 }
 0x22c   :  { %10785 = vst [vmem:[#allocation10_spill] sm:$0xff] %v9487_v24  ;;  %v2238_v52 = vmax.f32 %v1312_v43, %v2226_v23  ;;  %v1252_v56 = vpop.f32.mrb[20].mxu0  ;;  %v2166_v57 = vpop.f32.mrb[20].mxu1  ;;  %6736 = vmatprep.subr.bf16.mxu0 %v9484_v35  ;;  %6892 = vmatprep.subr.bf16.mxu1 %v9473_v50  ;;  %v9508_v43 = vpack.c.bf16 %v2345_v3, %v2343_v2  ;;  %v2342_v23 = vld [vmem:[#allocation2 + $0x220] sm:$0xff]  ;;  %v2373_v24 = vld [vmem:[#allocation2 + $0x310] sm:$0xff] }
 0x22d   :  { %v1254_v34 = vpop.f32.mrb[21].mxu0  ;;  %v2168_v61 = vpop.f32.mrb[21].mxu1 }
 0x22e   :  { %v9500_v4 = vadd.f32 %v9407_v21, %v2238_v52  ;;  %v1313_v37 = vmax.f32 %v1252_v56, %v1254_v34  ;;  %v2227_v36 = vmax.f32 %v2166_v57, %v2168_v61  ;;  %v2344_v52 = vld [vmem:[#allocation2 + $0x230] sm:$0xff]  ;;  %v2347_v34 = vld [vmem:[#allocation2 + $0x248] sm:$0xff]  ;;  %v2349_v61 = vld [vmem:[#allocation2 + $0x258] sm:$0xff] }
 0x22f   :  { %6738 = vmatpush1.bf16.msra.mxu0 %v9491_v25  ;;  %6894 = vmatpush1.bf16.msra.mxu1 %v9480_v1  ;;  %v9515_v32 = vpack.c.bf16 %v2344_v52, %v2342_v23  ;;  %v9519_v3 = vpack.c.bf16 %v2349_v61, %v2347_v34  ;;  %v10790_v52 = vmax.f32 %v9410_v45, 0.0  ;;  %v2350_v61 = vld [vmem:[#allocation2 + $0x260] sm:$0xff] }
 0x230   :  { %10786 = vst [vmem:[#allocation11_spill] sm:$0xff] %v9500_v4  ;;  %v2239_v13 = vmax.f32 %v1313_v37, %v2227_v36  ;;  %v1258_v41 = vpop.f32.mrb[22].mxu0  ;;  %v2172_v16 = vpop.f32.mrb[22].mxu1  ;;  %6740 = vmatprep.subr.bf16.mxu0 %v9497_v60  ;;  %6896 = vmatprep.subr.bf16.mxu1 %v9484_v35  ;;  %v2346_v37 = vld [vmem:[#allocation2 + $0x240] sm:$0xff]  ;;  %v2348_v36 = vld [vmem:[#allocation2 + $0x250] sm:$0xff] }
 0x231   :  { %v1260_v56 = vpop.f32.mrb[23].mxu0  ;;  %v2174_v57 = vpop.f32.mrb[23].mxu1  ;;  %v9529_v34 = vpack.c.bf16 %v2348_v36, %v2346_v37 }
 0x232   :  { %v9511_v49 = vadd.f32 %v9407_v21, %v2239_v13  ;;  %v1314_v29 = vmax.f32 %v1258_v41, %v1260_v56  ;;  %v2228_v47 = vmax.f32 %v2172_v16, %v2174_v57  ;;  %2640 = vmatmul.mubr.f32.vlgmr.msra.gmra.mrb[64].mxu0 %v2260_v38  ;;  %v2351_v41 = vld [vmem:[#allocation2 + $0x268] sm:$0xff]  ;;  %v2353_v16 = vld [vmem:[#allocation2 + $0x278] sm:$0xff]  ;;  %v10788_v38 = vmov 0.0  }
 0x233   :  { %6742 = vmatpush1.bf16.msra.mxu0 %v9504_v9  ;;  %6898 = vmatpush1.bf16.msra.mxu1 %v9491_v25 }
 0x234   :  { %10787 = vst [vmem:[#allocation12_spill] sm:$0xff] %v9511_v49  ;;  %v2240_v2 = vmax.f32 %v1314_v29, %v2228_v47  ;;  %6744 = vmatprep.subr.bf16.mxu0 %v9508_v43  ;;  %6900 = vmatprep.subr.bf16.mxu1 %v9497_v60  ;;  %v1264_v13 = vpop.f32.mrb[56].mxu0  ;;  %v2178_v0 = vpop.f32.mrb[56].mxu1  ;;  %v2352_v29 = vld [vmem:[#allocation2 + $0x270] sm:$0xff]  ;;  %v2369_v49 = vld [vmem:[#allocation2 + $0x2f8] sm:$0xff] }
 0x235   :  { %2710 = vmatprep.mubr.f32.mxu0 %v10788_v38  ;;  %v1265_v56 = vpop.f32.mrb[57].mxu0  ;;  %v2179_v57 = vpop.f32.mrb[57].mxu1  ;;  %v9533_v0 = vpack.c.bf16 %v2353_v16, %v2351_v41  ;;  %v9538_v37 = vpack.c.bf16 %v2352_v29, %v2350_v61  ;;  %v2354_v13 = vld [vmem:[#allocation2 + $0x280] sm:$0xff]  ;;  %v2356_v41 = vld [vmem:[#allocation2 + $0x290] sm:$0xff] }
 0x236   :  { %v9523_v23 = vadd.f32 %v9407_v21, %v2240_v2  ;;  %3002 = vmatmul.mubr.f32.vlgmr.msra.gmra.mrb[64].mxu1 %v10790_v52  ;;  %v2355_v21 = vld [vmem:[#allocation2 + $0x288] sm:$0xff]  ;;  %v2357_v2 = vld [vmem:[#allocation2 + $0x298] sm:$0xff]  ;;  %v2358_v29 = vld [vmem:[#allocation2 + $0x2a0] sm:$0xff] }
 0x237   :  { %6746 = vmatpush1.bf16.msra.mxu0 %v9515_v32  ;;  %6902 = vmatpush1.bf16.msra.mxu1 %v9504_v9  ;;  %v9542_v36 = vpack.c.bf16 %v2357_v2, %v2355_v21  ;;  %v2359_v56 = vld [vmem:[#allocation2 + $0x2a8] sm:$0xff]  ;;  %v2361_v57 = vld [vmem:[#allocation2 + $0x2b8] sm:$0xff]  ;;  %v2360_v21 = vld [vmem:[#allocation2 + $0x2b0] sm:$0xff] }
 0x238   :  { %10789 = vst [vmem:[#allocation13_spill] sm:$0xff] %v9523_v23  ;;  %6748 = vmatprep.subr.bf16.mxu0 %v9519_v3  ;;  %6904 = vmatprep.subr.bf16.mxu1 %v9508_v43  ;;  %v1268_v47 = vpop.f32.mrb[58].mxu0  ;;  %v9550_v61 = vpack.c.bf16 %v2361_v57, %v2359_v56  ;;  %v2364_v56 = vld [vmem:[#allocation2 + $0x2d0] sm:$0xff]  ;;  %v2367_v57 = vld [vmem:[#allocation2 + $0x2e8] sm:$0xff] }
 0x239   :  { %3072 = vmatprep.mubr.f32.mxu1 %v10788_v38  ;;  %v1269_v45 = vpop.f32.mrb[59].mxu0  ;;  %v9546_v47 = vpack.c.bf16 %v2356_v41, %v2354_v13  ;;  %v2362_v41 = vld [vmem:[#allocation2 + $0x2c0] sm:$0xff] }
 0x23a   :  { %10791 = vst [vmem:[#allocation14_spill] sm:$0xff] %v9550_v61  ;;  %v2363_v45 = vld [vmem:[#allocation2 + $0x2c8] sm:$0xff] }
 0x23b   :  { %6750 = vmatpush1.bf16.msra.mxu0 %v9529_v34  ;;  %6906 = vmatpush1.bf16.msra.mxu1 %v9515_v32 }
 0x23c   :  { %6752 = vmatprep.subr.bf16.mxu0 %v9533_v0  ;;  %6908 = vmatprep.subr.bf16.mxu1 %v9519_v3  ;;  %v1272_v16 = vpop.f32.mrb[60].mxu0 }
 0x23d   :  { %v1273_v52 = vpop.f32.mrb[61].mxu0  ;;  %v2365_v16 = vld [vmem:[#allocation2 + $0x2d8] sm:$0xff] }
 0x23e   :  { %v9554_v52 = vpack.c.bf16 %v2360_v21, %v2358_v29  ;;  %v9558_v13 = vpack.c.bf16 %v2365_v16, %v2363_v45  ;;  %v9566_v29 = vpack.c.bf16 %v2369_v49, %v2367_v57  ;;  %v2366_v21 = vld [vmem:[#allocation2 + $0x2e0] sm:$0xff]  ;;  %v2372_v45 = vld [vmem:[#allocation2 + $0x308] sm:$0xff]  ;;  %v2374_v16 = vld [vmem:[#allocation2 + $0x318] sm:$0xff] }
 0x23f   :  { %6754 = vmatpush1.bf16.msra.mxu0 %v9538_v37  ;;  %6910 = vmatpush1.bf16.msra.mxu1 %v9529_v34  ;;  %v2376_v49 = vld [vmem:[#allocation2 + $0x328] sm:$0xff]  ;;  %v2378_v57 = vld [vmem:[#allocation2 + $0x338] sm:$0xff] }
 0x240   :  { %6756 = vmatprep.subr.bf16.mxu0 %v9542_v36  ;;  %6912 = vmatprep.subr.bf16.mxu1 %v9533_v0  ;;  %v1276_v2 = vpop.f32.mrb[62].mxu0  ;;  %10792 = vst [vmem:[#allocation15_spill] sm:$0xff] %v9554_v52  ;;  %10793 = vst [vmem:[#allocation16_spill] sm:$0xff] %v9558_v13 }
 0x241   :  { %v1277_v23 = vpop.f32.mrb[63].mxu0  ;;  %10795 = vst [vmem:[#allocation18_spill] sm:$0xff] %v9566_v29  ;;  %v2368_v2 = vld [vmem:[#allocation2 + $0x2f0] sm:$0xff] }
 0x242   :  { %v9562_v23 = vpack.c.bf16 %v2364_v56, %v2362_v41  ;;  %v9570_v4 = vpack.c.bf16 %v2368_v2, %v2366_v21  ;;  %v9574_v41 = vpack.c.bf16 %v2374_v16, %v2372_v45  ;;  %v2371_v56 = vld [vmem:[#allocation2 + $0x300] sm:$0xff]  ;;  %v9582_v21 = vpack.c.bf16 %v2378_v57, %v2376_v49  ;;  %v2380_v45 = vld [vmem:[#allocation2 + $0x348] sm:$0xff]  ;;  %v2382_v16 = vld [vmem:[#allocation2 + $0x358] sm:$0xff] }
 0x243   :  { %6758 = vmatpush1.bf16.msra.mxu0 %v9546_v47  ;;  %6914 = vmatpush1.bf16.msra.mxu1 %v9538_v37  ;;  %v9578_v33 = vpack.c.bf16 %v2373_v24, %v2371_v56  ;;  %v2375_v2 = vld [vmem:[#allocation2 + $0x320] sm:$0xff]  ;;  %v9590_v24 = vmax.f32 %v9430_v7, 0.0  ;;  %v9594_v56 = vpack.c.bf16 %v2382_v16, %v2380_v45  ;;  %v2381_v57 = vld [vmem:[#allocation2 + $0x350] sm:$0xff]  ;;  %v2388_v16 = vld [vmem:[#allocation2 + $0x388] sm:$0xff] }
 0x244   :  { %6760 = vmatprep.subr.bf16.mxu0 %v9550_v61  ;;  %6916 = vmatprep.subr.bf16.mxu1 %v9542_v36  ;;  %10794 = vst [vmem:[#allocation17_spill] sm:$0xff] %v9562_v23  ;;  %10796 = vst [vmem:[#allocation19_spill] sm:$0xff] %v9570_v4  ;;  %v2379_v49 = vld [vmem:[#allocation2 + $0x340] sm:$0xff]  ;;  %v2385_v45 = vld [vmem:[#allocation2 + $0x370] sm:$0xff] }
 0x245   :  { %10797 = vst [vmem:[#allocation20_spill] sm:$0xff] %v9574_v41  ;;  %10798 = vst [vmem:[#allocation21_spill] sm:$0xff] %v9578_v33  ;;  %v9600_v7 = vpack.c.bf16 %v2381_v57, %v2379_v49  ;;  %v2392_v57 = vld [vmem:[#allocation2 + $0x3a8] sm:$0xff] }
 0x246   :  { %10799 = vst [vmem:[#allocation22_spill] sm:$0xff] %v9582_v21  ;;  %10801 = vst [vmem:[#allocation24_spill] sm:$0xff] %v9594_v56 }
 0x247   :  { %6762 = vmatpush1.bf16.msra.mxu0 %v9554_v52  ;;  %6918 = vmatpush1.bf16.msra.mxu1 %v9546_v47  ;;  %10802 = vst [vmem:[#allocation25_spill] sm:$0xff] %v9600_v7 }
 0x248   :  { %6764 = vmatprep.subr.bf16.mxu0 %v9558_v13  ;;  %6920 = vmatprep.subr.bf16.mxu1 %v9550_v61 }
 0x24b   :  { %6766 = vmatpush1.bf16.msra.mxu0 %v9562_v23  ;;  %6922 = vmatpush1.bf16.msra.mxu1 %v9554_v52 }
 0x24c   :  { %6768 = vmatprep.subr.bf16.mxu0 %v9566_v29  ;;  %6924 = vmatprep.subr.bf16.mxu1 %v9558_v13  ;;  %v9587_v13 = vpack.c.bf16 %v2377_v18, %v2375_v2  ;;  %v2383_v2 = vld [vmem:[#allocation2 + $0x360] sm:$0xff] }
 0x24e   :  { %10800 = vst [vmem:[#allocation23_spill] sm:$0xff] %v9587_v13 }
 0x24f   :  { %6770 = vmatpush1.bf16.msra.mxu0 %v9570_v4  ;;  %6926 = vmatpush1.bf16.msra.mxu1 %v9562_v23  ;;  %v2386_v23 = vld [vmem:[#allocation2 + $0x378] sm:$0xff] }
 0x250   :  { %6772 = vmatprep.subr.bf16.mxu0 %v9574_v41  ;;  %6928 = vmatprep.subr.bf16.mxu1 %v9566_v29  ;;  %v2384_v29 = vld [vmem:[#allocation2 + $0x368] sm:$0xff] }
 0x251   :  { %v9604_v18 = vpack.c.bf16 %v2386_v23, %v2384_v29  ;;  %v2387_v23 = vld [vmem:[#allocation2 + $0x380] sm:$0xff]  ;;  %v2389_v29 = vld [vmem:[#allocation2 + $0x390] sm:$0xff] }
 0x252   :  { %2711 = vmatmul.mubr.f32.vlgmr.msra.gmra.mrb[64].mxu0 %v9424_v63  ;;  %v9617_v52 = vpack.c.bf16 %v2389_v29, %v2387_v23  ;;  %v2397_v29 = vld [vmem:[#allocation2 + $0x3d0] sm:$0xff] }
 0x253   :  { %6774 = vmatpush1.bf16.msra.mxu0 %v9578_v33  ;;  %6930 = vmatpush1.bf16.msra.mxu1 %v9570_v4  ;;  %10803 = vst [vmem:[#allocation26_spill] sm:$0xff] %v9604_v18  ;;  %v9609_v4 = vpack.c.bf16 %v2385_v45, %v2383_v2  ;;  %v2393_v45 = vld [vmem:[#allocation2 + $0x3b0] sm:$0xff] }
 0x254   :  { %6776 = vmatprep.subr.bf16.mxu0 %v9582_v21  ;;  %6932 = vmatprep.subr.bf16.mxu1 %v9574_v41  ;;  %v2390_v41 = vld [vmem:[#allocation2 + $0x398] sm:$0xff]  ;;  %10806 = vst [vmem:[#allocation29_spill] sm:$0xff] %v9617_v52 }
 0x255   :  { %2783 = vmatprep.mubr.f32.mxu0 %v10788_v38  ;;  %10804 = vst [vmem:[#allocation27_spill] sm:$0xff] %v9609_v4  ;;  %v9613_v49 = vpack.c.bf16 %v2390_v41, %v2388_v16  ;;  %v2391_v41 = vld [vmem:[#allocation2 + $0x3a0] sm:$0xff]  ;;  %v2396_v16 = vld [vmem:[#allocation2 + $0x3c8] sm:$0xff] }
 0x256   :  { %3073 = vmatmul.mubr.f32.vlgmr.msra.gmra.mrb[64].mxu1 %v9590_v24 }
 0x257   :  { %6778 = vmatpush1.bf16.msra.mxu0 %v9587_v13  ;;  %6934 = vmatpush1.bf16.msra.mxu1 %v9578_v33  ;;  %10805 = vst [vmem:[#allocation28_spill] sm:$0xff] %v9613_v49  ;;  %v2182_v33 = vpop.f32.mrb[58].mxu1 }
 0x258   :  { %6780 = vmatprep.subr.bf16.mxu0 %v9594_v56  ;;  %6936 = vmatprep.subr.bf16.mxu1 %v9582_v21  ;;  %v2394_v21 = vld [vmem:[#allocation2 + $0x3b8] sm:$0xff]  ;;  %v9625_v33 = vpack.c.bf16 %v2393_v45, %v2391_v41 }
 0x259   :  { %3145 = vmatprep.mubr.f32.mxu1 %v10788_v38  ;;  %v9621_v2 = vpack.c.bf16 %v2394_v21, %v2392_v57  ;;  %v2395_v21 = vld [vmem:[#allocation2 + $0x3c0] sm:$0xff]  ;;  %v2400_v57 = vld [vmem:[#allocation2 + $0x3e8] sm:$0xff] }
 0x25a   :  { %10808 = vst [vmem:[#allocation31_spill] sm:$0xff] %v9625_v33 }
 0x25b   :  { %6782 = vmatpush1.bf16.msra.mxu0 %v9600_v7  ;;  %6938 = vmatpush1.bf16.msra.mxu1 %v9587_v13  ;;  %v2183_v13 = vpop.f32.mrb[59].mxu1  ;;  %10807 = vst [vmem:[#allocation30_spill] sm:$0xff] %v9621_v2 }
 0x25c   :  { %6784 = vmatprep.subr.bf16.mxu0 %v9604_v18  ;;  %6940 = vmatprep.subr.bf16.mxu1 %v9594_v56  ;;  %v2398_v56 = vld [vmem:[#allocation2 + $0x3d8] sm:$0xff]  ;;  %v2186_v61 = vpop.f32.mrb[60].mxu1 }
 0x25d   :  { %v2187_v23 = vpop.f32.mrb[61].mxu1  ;;  %v9629_v13 = vpack.c.bf16 %v2398_v56, %v2396_v16  ;;  %v9633_v61 = vpack.c.bf16 %v2397_v29, %v2395_v21  ;;  %v2399_v56 = vld [vmem:[#allocation2 + $0x3e0] sm:$0xff]  ;;  %v2401_v16 = vld [vmem:[#allocation2 + $0x3f0] sm:$0xff] }
 0x25e   :  { %v2405_v23 = vld [vmem:[#allocation2 + $0x408] sm:$0xff]  ;;  %v2404_v29 = vld [vmem:[#allocation2 + $0x400] sm:$0xff] }
 0x25f   :  { %6786 = vmatpush1.bf16.msra.mxu0 %v9609_v4  ;;  %6942 = vmatpush1.bf16.msra.mxu1 %v9600_v7  ;;  %10809 = vst [vmem:[#allocation32_spill] sm:$0xff] %v9629_v13  ;;  %v2190_v7 = vpop.f32.mrb[62].mxu1  ;;  %10810 = vst [vmem:[#allocation33_spill] sm:$0xff] %v9633_v61 }
 0x260   :  { %6788 = vmatprep.subr.bf16.mxu0 %v9613_v49  ;;  %6944 = vmatprep.subr.bf16.mxu1 %v9604_v18  ;;  %v2402_v18 = vld [vmem:[#allocation2 + $0x3f8] sm:$0xff]  ;;  %v2191_v41 = vpop.f32.mrb[63].mxu1  ;;  %v9641_v7 = vpack.c.bf16 %v2401_v16, %v2399_v56  ;;  %v2408_v16 = vld [vmem:[#allocation2 + $0x420] sm:$0xff] }
 0x261   :  { %v9637_v45 = vpack.c.bf16 %v2402_v18, %v2400_v57  ;;  %v2406_v41 = vld [vmem:[#allocation2 + $0x410] sm:$0xff]  ;;  %v2409_v18 = vld [vmem:[#allocation2 + $0x428] sm:$0xff]  ;;  %v2411_v57 = vld [vmem:[#allocation2 + $0x438] sm:$0xff] }
 0x262   :  { %10812 = vst [vmem:[#allocation35_spill] sm:$0xff] %v9641_v7  ;;  %v9653_v56 = vpack.c.bf16 %v2411_v57, %v2409_v18  ;;  %v2412_v18 = vld [vmem:[#allocation2 + $0x440] sm:$0xff]  ;;  %v2414_v57 = vld [vmem:[#allocation2 + $0x450] sm:$0xff] }
 0x263   :  { %6790 = vmatpush1.bf16.msra.mxu0 %v9617_v52  ;;  %6946 = vmatpush1.bf16.msra.mxu1 %v9609_v4  ;;  %10811 = vst [vmem:[#allocation34_spill] sm:$0xff] %v9637_v45 }
 0x264   :  { %6792 = vmatprep.subr.bf16.mxu0 %v9621_v2  ;;  %6948 = vmatprep.subr.bf16.mxu1 %v9613_v49  ;;  %v2407_v49 = vld [vmem:[#allocation2 + $0x418] sm:$0xff]  ;;  %10815 = vst [vmem:[#allocation38_spill] sm:$0xff] %v9653_v56 }
 0x265   :  { %v9645_v21 = vpack.c.bf16 %v2407_v49, %v2405_v23  ;;  %v2413_v49 = vld [vmem:[#allocation2 + $0x448] sm:$0xff]  ;;  %v2415_v23 = vld [vmem:[#allocation2 + $0x458] sm:$0xff] }
 0x267   :  { %6794 = vmatpush1.bf16.msra.mxu0 %v9625_v33  ;;  %6950 = vmatpush1.bf16.msra.mxu1 %v9617_v52  ;;  %10813 = vst [vmem:[#allocation36_spill] sm:$0xff] %v9645_v21 }
 0x268   :  { %6796 = vmatprep.subr.bf16.mxu0 %v9629_v13  ;;  %6952 = vmatprep.subr.bf16.mxu1 %v9621_v2  ;;  %v9649_v2 = vpack.c.bf16 %v2406_v41, %v2404_v29  ;;  %v9661_v29 = vmax.f32 %v9443_v46, 0.0  ;;  %v9665_v41 = vpack.c.bf16 %v2415_v23, %v2413_v49  ;;  %v9671_v46 = vpack.c.bf16 %v2414_v57, %v2412_v18  ;;  %v2418_v49 = vld [vmem:[#allocation2 + $0x470] sm:$0xff]  ;;  %v2421_v23 = vld [vmem:[#allocation2 + $0x488] sm:$0xff] }
 0x269   :  { %v2425_v57 = vld [vmem:[#allocation2 + $0x4a8] sm:$0xff] }
 0x26a   :  { %10814 = vst [vmem:[#allocation37_spill] sm:$0xff] %v9649_v2  ;;  %10817 = vst [vmem:[#allocation40_spill] sm:$0xff] %v9661_v29 }
 0x26b   :  { %6798 = vmatpush1.bf16.msra.mxu0 %v9633_v61  ;;  %6954 = vmatpush1.bf16.msra.mxu1 %v9625_v33  ;;  %10818 = vst [vmem:[#allocation41_spill] sm:$0xff] %v9665_v41  ;;  %10819 = vst [vmem:[#allocation42_spill] sm:$0xff] %v9671_v46 }
 0x26c   :  { %6800 = vmatprep.subr.bf16.mxu0 %v9637_v45  ;;  %6956 = vmatprep.subr.bf16.mxu1 %v9629_v13  ;;  %v2410_v13 = vld [vmem:[#allocation2 + $0x430] sm:$0xff] }
 0x26d   :  { %v9658_v33 = vpack.c.bf16 %v2410_v13, %v2408_v16  ;;  %v2416_v16 = vld [vmem:[#allocation2 + $0x460] sm:$0xff] }
 0x26f   :  { %6802 = vmatpush1.bf16.msra.mxu0 %v9641_v7  ;;  %6958 = vmatpush1.bf16.msra.mxu1 %v9633_v61  ;;  %10816 = vst [vmem:[#allocation39_spill] sm:$0xff] %v9658_v33  ;;  %v2419_v61 = vld [vmem:[#allocation2 + $0x478] sm:$0xff] }
 0x270   :  { %6804 = vmatprep.subr.bf16.mxu0 %v9645_v21  ;;  %6960 = vmatprep.subr.bf16.mxu1 %v9637_v45  ;;  %v2417_v45 = vld [vmem:[#allocation2 + $0x468] sm:$0xff] }
 0x271   :  { %v9675_v13 = vpack.c.bf16 %v2419_v61, %v2417_v45  ;;  %v2420_v61 = vld [vmem:[#allocation2 + $0x480] sm:$0xff]  ;;  %v2422_v45 = vld [vmem:[#allocation2 + $0x490] sm:$0xff] }
 0x272   :  { %2784 = vmatmul.mubr.f32.vlgmr.msra.gmra.mrb[64].mxu0 %v9590_v24 }
 0x273   :  { %6806 = vmatpush1.bf16.msra.mxu0 %v9649_v2  ;;  %6962 = vmatpush1.bf16.msra.mxu1 %v9641_v7  ;;  %10820 = vst [vmem:[#allocation43_spill] sm:$0xff] %v9675_v13  ;;  %v9680_v7 = vpack.c.bf16 %v2418_v49, %v2416_v16  ;;  %v2424_v49 = vld [vmem:[#allocation2 + $0x4a0] sm:$0xff] }
 0x274   :  { %6808 = vmatprep.subr.bf16.mxu0 %v9653_v56  ;;  %6964 = vmatprep.subr.bf16.mxu1 %v9645_v21  ;;  %v2423_v21 = vld [vmem:[#allocation2 + $0x498] sm:$0xff] }
 0x275   :  { %2856 = vmatprep.mubr.f32.mxu0 %v10788_v38  ;;  %10821 = vst [vmem:[#allocation44_spill] sm:$0xff] %v9680_v7  ;;  %v9684_v18 = vpack.c.bf16 %v2423_v21, %v2421_v23  ;;  %v2429_v21 = vld [vmem:[#allocation2 + $0x4c8] sm:$0xff]  ;;  %v2431_v23 = vld [vmem:[#allocation2 + $0x4d8] sm:$0xff] }
 0x276   :  { %3146 = vmatmul.mubr.f32.vlgmr.msra.gmra.mrb[64].mxu1 %v9661_v29 }
 0x277   :  { %6810 = vmatpush1.bf16.msra.mxu0 %v9658_v33  ;;  %6966 = vmatpush1.bf16.msra.mxu1 %v9649_v2  ;;  %10822 = vst [vmem:[#allocation45_spill] sm:$0xff] %v9684_v18  ;;  %v9688_v2 = vpack.c.bf16 %v2422_v45, %v2420_v61  ;;  %v9700_v61 = vpack.c.bf16 %v2431_v23, %v2429_v21  ;;  %v2428_v45 = vld [vmem:[#allocation2 + $0x4c0] sm:$0xff]  ;;  %v10834_v23 = vld [vmem:[#allocation18_spill] sm:$0xff] }
 0x278   :  { %6812 = vmatprep.subr.bf16.mxu0 %v9665_v41  ;;  %6968 = vmatprep.subr.bf16.mxu1 %v9653_v56  ;;  %v2427_v56 = vld [vmem:[#allocation2 + $0x4b8] sm:$0xff] }
 0x279   :  { %3218 = vmatprep.mubr.f32.mxu1 %v10788_v38  ;;  %10823 = vst [vmem:[#allocation46_spill] sm:$0xff] %v9688_v2  ;;  %v9692_v16 = vpack.c.bf16 %v2427_v56, %v2425_v57  ;;  %10826 = vst [vmem:[#allocation49_spill] sm:$0xff] %v9700_v61  ;;  %v2433_v56 = vld [vmem:[#allocation2 + $0x4e8] sm:$0xff]  ;;  %v2435_v57 = vld [vmem:[#allocation2 + $0x4f8] sm:$0xff] }
 0x27b   :  { %6814 = vmatpush1.bf16.msra.mxu0 %v9671_v46  ;;  %6970 = vmatpush1.bf16.msra.mxu1 %v9658_v33  ;;  %10824 = vst [vmem:[#allocation47_spill] sm:$0xff] %v9692_v16 }
 0x27c   :  { %6816 = vmatprep.subr.bf16.mxu0 %v9675_v13  ;;  %6972 = vmatprep.subr.bf16.mxu1 %v9665_v41  ;;  %v2426_v41 = vld [vmem:[#allocation2 + $0x4b0] sm:$0xff] }
 0x27d   :  { %v9696_v33 = vpack.c.bf16 %v2426_v41, %v2424_v49  ;;  %v9708_v41 = vpack.c.bf16 %v2435_v57, %v2433_v56  ;;  %v2432_v49 = vld [vmem:[#allocation2 + $0x4e0] sm:$0xff]  ;;  %v10837_v57 = vld [vmem:[#allocation21_spill] sm:$0xff] }
 0x27e   :  { %v10836_v56 = vld [vmem:[#allocation20_spill] sm:$0xff] }
 0x27f   :  { %6818 = vmatpush1.bf16.msra.mxu0 %v9680_v7  ;;  %6974 = vmatpush1.bf16.msra.mxu1 %v9671_v46  ;;  %10825 = vst [vmem:[#allocation48_spill] sm:$0xff] %v9696_v33  ;;  %10828 = vst [vmem:[#allocation51_spill] sm:$0xff] %v9708_v41 }
 0x280   :  { %6820 = vmatprep.subr.bf16.mxu0 %v9684_v18  ;;  %6976 = vmatprep.subr.bf16.mxu1 %v9675_v13  ;;  %v2430_v13 = vld [vmem:[#allocation2 + $0x4d0] sm:$0xff] }
 0x281   :  { %v9704_v46 = vpack.c.bf16 %v2430_v13, %v2428_v45  ;;  %v9724_v13 = vmax.f32 %v9454_v27, 0.0  ;;  %v10831_v27 = vld [vmem:[#allocation15_spill] sm:$0xff] }
 0x282   :  { %v10835_v45 = vld [vmem:[#allocation19_spill] sm:$0xff] }
 0x283   :  { %6822 = vmatpush1.bf16.msra.mxu0 %v9688_v2  ;;  %6978 = vmatpush1.bf16.msra.mxu1 %v9680_v7  ;;  %10827 = vst [vmem:[#allocation50_spill] sm:$0xff] %v9704_v46 }
 0x284   :  { %6824 = vmatprep.subr.bf16.mxu0 %v9692_v16  ;;  %6980 = vmatprep.subr.bf16.mxu1 %v9684_v18  ;;  %v2434_v18 = vld [vmem:[#allocation2 + $0x4f0] sm:$0xff] }
 0x285   :  { %v9712_v21 = vpack.c.bf16 %v2434_v18, %v2432_v49  ;;  %v10833_v18 = vld [vmem:[#allocation17_spill] sm:$0xff]  ;;  %v10838_v49 = vld [vmem:[#allocation22_spill] sm:$0xff] }
 0x287   :  { %6826 = vmatpush1.bf16.msra.mxu0 %v9696_v33  ;;  %6982 = vmatpush1.bf16.msra.mxu1 %v9688_v2  ;;  %10829 = vst [vmem:[#allocation52_spill] sm:$0xff] %v9712_v21 }
 0x288   :  { %6828 = vmatprep.subr.bf16.mxu0 %v9700_v61  ;;  %6984 = vmatprep.subr.bf16.mxu1 %v9692_v16 }
 0x28b   :  { %6830 = vmatpush1.bf16.msra.mxu0 %v9704_v46  ;;  %6986 = vmatpush1.bf16.msra.mxu1 %v9696_v33 }
 0x28c   :  { %6832 = vmatprep.subr.bf16.mxu0 %v9708_v41  ;;  %6988 = vmatprep.subr.bf16.mxu1 %v9700_v61 }
 0x28f   :  { %6834 = vmatpush1.bf16.msra.mxu0 %v9712_v21  ;;  %6990 = vmatpush1.bf16.msra.mxu1 %v9704_v46 }
 0x290   :  { %6992 = vmatprep.subr.bf16.mxu1 %v9708_v41  ;;  %6996 = vmatprep.subr.bf16.mxu0 %v9264_v39 }
 0x292   :  { %2857 = vmatmul.mubr.f32.vlgmr.msra.gmra.mrb[64].mxu0 %v9661_v29 }
 0x293   :  { %6994 = vmatpush1.bf16.msra.mxu1 %v9712_v21  ;;  %6998 = vmatpush1.bf16.msra.mxu0 %v9266_v15 }
 0x294   :  { %7000 = vmatprep.subr.bf16.mxu0 %v9270_v40  ;;  %7156 = vmatprep.subr.bf16.mxu1 %v9264_v39 }
 0x295   :  { %3301 = vmatprep.mubr.f32.mxu0 %v10788_v38 }
 0x296   :  { %3219 = vmatmul.mubr.f32.vlgmr.msra.gmra.mrb[64].mxu1 %v9724_v13 }
 0x297   :  { %7002 = vmatpush1.bf16.msra.mxu0 %v9280_v19  ;;  %7158 = vmatpush1.bf16.msra.mxu1 %v9266_v15 }
 0x298   :  { %7004 = vmatprep.subr.bf16.mxu0 %v9284_v42  ;;  %7160 = vmatprep.subr.bf16.mxu1 %v9270_v40 }
 0x299   :  { %3663 = vmatprep.mubr.f32.mxu1 %v10788_v38 }
 0x29b   :  { %7006 = vmatpush1.bf16.msra.mxu0 %v9294_v20  ;;  %7162 = vmatpush1.bf16.msra.mxu1 %v9280_v19 }
 0x29c   :  { %7008 = vmatprep.subr.bf16.mxu0 %v9298_v44  ;;  %7164 = vmatprep.subr.bf16.mxu1 %v9284_v42 }
 0x29f   :  { %7010 = vmatpush1.bf16.msra.mxu0 %v9308_v26  ;;  %7166 = vmatpush1.bf16.msra.mxu1 %v9294_v20 }
 0x2a0   :  { %7012 = vmatprep.subr.bf16.mxu0 %v9353_v53  ;;  %7168 = vmatprep.subr.bf16.mxu1 %v9298_v44 }
 0x2a3   :  { %7014 = vmatpush1.bf16.msra.mxu0 %v9355_v55  ;;  %7170 = vmatpush1.bf16.msra.mxu1 %v9308_v26 }
 0x2a4   :  { %7016 = vmatprep.subr.bf16.mxu0 %v9361_v10  ;;  %7172 = vmatprep.subr.bf16.mxu1 %v9353_v53 }
 0x2a7   :  { %7018 = vmatpush1.bf16.msra.mxu0 %v9363_v59  ;;  %7174 = vmatpush1.bf16.msra.mxu1 %v9355_v55 }
 0x2a8   :  { %7020 = vmatprep.subr.bf16.mxu0 %v9369_v31  ;;  %7176 = vmatprep.subr.bf16.mxu1 %v9361_v10 }
 0x2ab   :  { %7022 = vmatpush1.bf16.msra.mxu0 %v9371_v6  ;;  %7178 = vmatpush1.bf16.msra.mxu1 %v9363_v59 }
 0x2ac   :  { %7024 = vmatprep.subr.bf16.mxu0 %v9381_v8  ;;  %7180 = vmatprep.subr.bf16.mxu1 %v9369_v31 }
 0x2af   :  { %7026 = vmatpush1.bf16.msra.mxu0 %v9384_v11  ;;  %7182 = vmatpush1.bf16.msra.mxu1 %v9371_v6 }
 0x2b0   :  { %7028 = vmatprep.subr.bf16.mxu0 %v9392_v14  ;;  %7184 = vmatprep.subr.bf16.mxu1 %v9381_v8 }
 0x2b2   :  { %3302 = vmatmul.mubr.f32.vlgmr.msra.gmra.mrb[66].mxu0 %v9590_v24 }
 0x2b3   :  { %7030 = vmatpush1.bf16.msra.mxu0 %v9412_v48  ;;  %7186 = vmatpush1.bf16.msra.mxu1 %v9384_v11 }
 0x2b4   :  { %7032 = vmatprep.subr.bf16.mxu0 %v9415_v54  ;;  %7188 = vmatprep.subr.bf16.mxu1 %v9392_v14 }
 0x2b5   :  { %3372 = vmatprep.mubr.f32.mxu0 %v10788_v38 }
 0x2b6   :  { %3664 = vmatmul.mubr.f32.vlgmr.msra.gmra.mrb[66].mxu1 %v9661_v29 }
 0x2b7   :  { %7034 = vmatpush1.bf16.msra.mxu0 %v9421_v62  ;;  %7190 = vmatpush1.bf16.msra.mxu1 %v9412_v48 }
 0x2b8   :  { %7036 = vmatprep.subr.bf16.mxu0 %v9427_v28  ;;  %7192 = vmatprep.subr.bf16.mxu1 %v9415_v54 }
 0x2b9   :  { %3734 = vmatprep.mubr.f32.mxu1 %v10788_v38 }
 0x2bb   :  { %7038 = vmatpush1.bf16.msra.mxu0 %v9435_v12  ;;  %7194 = vmatpush1.bf16.msra.mxu1 %v9421_v62 }
 0x2bc   :  { %7040 = vmatprep.subr.bf16.mxu0 %v9439_v17  ;;  %7196 = vmatprep.subr.bf16.mxu1 %v9427_v28 }
 0x2bf   :  { %7042 = vmatpush1.bf16.msra.mxu0 %v9447_v51  ;;  %7198 = vmatpush1.bf16.msra.mxu1 %v9435_v12 }
 0x2c0   :  { %7044 = vmatprep.subr.bf16.mxu0 %v9451_v58  ;;  %7200 = vmatprep.subr.bf16.mxu1 %v9439_v17 }
 0x2c3   :  { %7046 = vmatpush1.bf16.msra.mxu0 %v9458_v30  ;;  %7202 = vmatpush1.bf16.msra.mxu1 %v9447_v51 }
 0x2c4   :  { %7048 = vmatprep.subr.bf16.mxu0 %v9462_v5  ;;  %7204 = vmatprep.subr.bf16.mxu1 %v9451_v58 }
 0x2c7   :  { %7050 = vmatpush1.bf16.msra.mxu0 %v9469_v22  ;;  %7206 = vmatpush1.bf16.msra.mxu1 %v9458_v30 }
 0x2c8   :  { %7052 = vmatprep.subr.bf16.mxu0 %v9473_v50  ;;  %7208 = vmatprep.subr.bf16.mxu1 %v9462_v5 }
 0x2cb   :  { %7054 = vmatpush1.bf16.msra.mxu0 %v9480_v1  ;;  %7210 = vmatpush1.bf16.msra.mxu1 %v9469_v22 }
 0x2cc   :  { %7056 = vmatprep.subr.bf16.mxu0 %v9484_v35  ;;  %7212 = vmatprep.subr.bf16.mxu1 %v9473_v50 }
 0x2cf   :  { %7058 = vmatpush1.bf16.msra.mxu0 %v9491_v25  ;;  %7214 = vmatpush1.bf16.msra.mxu1 %v9480_v1 }
 0x2d0   :  { %7060 = vmatprep.subr.bf16.mxu0 %v9497_v60  ;;  %7216 = vmatprep.subr.bf16.mxu1 %v9484_v35 }
 0x2d2   :  { %3373 = vmatmul.mubr.f32.vlgmr.msra.gmra.mrb[66].mxu0 %v9424_v63  ;;  %v10830_v63 = vld [vmem:[#allocation14_spill] sm:$0xff] }
 0x2d3   :  { %7062 = vmatpush1.bf16.msra.mxu0 %v9504_v9  ;;  %7218 = vmatpush1.bf16.msra.mxu1 %v9491_v25 }
 0x2d4   :  { %7064 = vmatprep.subr.bf16.mxu0 %v9508_v43  ;;  %7220 = vmatprep.subr.bf16.mxu1 %v9497_v60 }
 0x2d5   :  { %3443 = vmatprep.mubr.f32.mxu0 %v10788_v38 }
 0x2d6   :  { %3735 = vmatmul.mubr.f32.vlgmr.msra.gmra.mrb[66].mxu1 %v9590_v24  ;;  %v10832_v24 = vld [vmem:[#allocation16_spill] sm:$0xff] }
 0x2d7   :  { %7066 = vmatpush1.bf16.msra.mxu0 %v9515_v32  ;;  %7222 = vmatpush1.bf16.msra.mxu1 %v9504_v9 }
 0x2d8   :  { %7068 = vmatprep.subr.bf16.mxu0 %v9519_v3  ;;  %7224 = vmatprep.subr.bf16.mxu1 %v9508_v43 }
 0x2d9   :  { %3805 = vmatprep.mubr.f32.mxu1 %v10788_v38 }
 0x2db   :  { %7070 = vmatpush1.bf16.msra.mxu0 %v9529_v34  ;;  %7226 = vmatpush1.bf16.msra.mxu1 %v9515_v32 }
 0x2dc   :  { %7072 = vmatprep.subr.bf16.mxu0 %v9533_v0  ;;  %7228 = vmatprep.subr.bf16.mxu1 %v9519_v3 }
 0x2df   :  { %7074 = vmatpush1.bf16.msra.mxu0 %v9538_v37  ;;  %7230 = vmatpush1.bf16.msra.mxu1 %v9529_v34 }
 0x2e0   :  { %7076 = vmatprep.subr.bf16.mxu0 %v9542_v36  ;;  %7232 = vmatprep.subr.bf16.mxu1 %v9533_v0 }
 0x2e3   :  { %7078 = vmatpush1.bf16.msra.mxu0 %v9546_v47  ;;  %7234 = vmatpush1.bf16.msra.mxu1 %v9538_v37 }
 0x2e4   :  { %7080 = vmatprep.subr.bf16.mxu0 %v10830_v63  ;;  %7236 = vmatprep.subr.bf16.mxu1 %v9542_v36 }
 0x2e7   :  { %7082 = vmatpush1.bf16.msra.mxu0 %v10831_v27  ;;  %7238 = vmatpush1.bf16.msra.mxu1 %v9546_v47 }
 0x2e8   :  { %7084 = vmatprep.subr.bf16.mxu0 %v10832_v24  ;;  %7240 = vmatprep.subr.bf16.mxu1 %v10830_v63 }
 0x2eb   :  { %7086 = vmatpush1.bf16.msra.mxu0 %v10833_v18  ;;  %7242 = vmatpush1.bf16.msra.mxu1 %v10831_v27 }
 0x2ec   :  { %7088 = vmatprep.subr.bf16.mxu0 %v10834_v23  ;;  %7244 = vmatprep.subr.bf16.mxu1 %v10832_v24  ;;  %v10839_v24 = vld [vmem:[#allocation23_spill] sm:$0xff] }
 0x2ef   :  { %7090 = vmatpush1.bf16.msra.mxu0 %v10835_v45  ;;  %7246 = vmatpush1.bf16.msra.mxu1 %v10833_v18  ;;  %v10840_v18 = vld [vmem:[#allocation24_spill] sm:$0xff] }
 0x2f0   :  { %7092 = vmatprep.subr.bf16.mxu0 %v10836_v56  ;;  %7248 = vmatprep.subr.bf16.mxu1 %v10834_v23 }
 0x2f2   :  { %3444 = vmatmul.mubr.f32.vlgmr.msra.gmra.mrb[66].mxu0 %v9661_v29  ;;  %v10841_v29 = vld [vmem:[#allocation25_spill] sm:$0xff] }
 0x2f3   :  { %7094 = vmatpush1.bf16.msra.mxu0 %v10837_v57  ;;  %7250 = vmatpush1.bf16.msra.mxu1 %v10835_v45  ;;  %v10842_v45 = vld [vmem:[#allocation26_spill] sm:$0xff] }
 0x2f4   :  { %7096 = vmatprep.subr.bf16.mxu0 %v10838_v49  ;;  %7252 = vmatprep.subr.bf16.mxu1 %v10836_v56  ;;  %v10843_v56 = vld [vmem:[#allocation28_spill] sm:$0xff] }
 0x2f5   :  { %3516 = vmatprep.mubr.f32.mxu0 %v10788_v38 }
 0x2f6   :  { %3806 = vmatmul.mubr.f32.vlgmr.msra.gmra.mrb[66].mxu1 %v9724_v13 }
 0x2f7   :  { %7098 = vmatpush1.bf16.msra.mxu0 %v10839_v24  ;;  %7254 = vmatpush1.bf16.msra.mxu1 %v10837_v57  ;;  %v10853_v57 = vld [vmem:[#allocation38_spill] sm:$0xff] }
 0x2f8   :  { %7100 = vmatprep.subr.bf16.mxu0 %v10840_v18  ;;  %7256 = vmatprep.subr.bf16.mxu1 %v10838_v49  ;;  %v10844_v49 = vld [vmem:[#allocation30_spill] sm:$0xff] }
 0x2f9   :  { %3878 = vmatprep.mubr.f32.mxu1 %v10788_v38 }
 0x2fb   :  { %7102 = vmatpush1.bf16.msra.mxu0 %v10841_v29  ;;  %7258 = vmatpush1.bf16.msra.mxu1 %v10839_v24  ;;  %v10845_v24 = vld [vmem:[#allocation31_spill] sm:$0xff] }
 0x2fc   :  { %7104 = vmatprep.subr.bf16.mxu0 %v10842_v45  ;;  %7260 = vmatprep.subr.bf16.mxu1 %v10840_v18  ;;  %v10846_v18 = vld [vmem:[#allocation32_spill] sm:$0xff] }
 0x2ff   :  { %7106 = vmatpush1.bf16.msra.mxu0 %v9609_v4  ;;  %7262 = vmatpush1.bf16.msra.mxu1 %v10841_v29  ;;  %v10847_v29 = vld [vmem:[#allocation33_spill] sm:$0xff] }
 0x300   :  { %7108 = vmatprep.subr.bf16.mxu0 %v10843_v56  ;;  %7264 = vmatprep.subr.bf16.mxu1 %v10842_v45  ;;  %v10848_v45 = vld [vmem:[#allocation34_spill] sm:$0xff] }
 0x303   :  { %7110 = vmatpush1.bf16.msra.mxu0 %v9617_v52  ;;  %7266 = vmatpush1.bf16.msra.mxu1 %v9609_v4  ;;  %v10849_v4 = vld [vmem:[#allocation35_spill] sm:$0xff] }
 0x304   :  { %7112 = vmatprep.subr.bf16.mxu0 %v10844_v49  ;;  %7268 = vmatprep.subr.bf16.mxu1 %v10843_v56  ;;  %v10850_v56 = vld [vmem:[#allocation36_spill] sm:$0xff] }
 0x307   :  { %7114 = vmatpush1.bf16.msra.mxu0 %v10845_v24  ;;  %7270 = vmatpush1.bf16.msra.mxu1 %v9617_v52  ;;  %v10851_v52 = vld [vmem:[#allocation37_spill] sm:$0xff] }
 0x308   :  { %7116 = vmatprep.subr.bf16.mxu0 %v10846_v18  ;;  %7272 = vmatprep.subr.bf16.mxu1 %v10844_v49  ;;  %v10852_v49 = vld [vmem:[#allocation8_spill] sm:$0xff] }
 0x30b   :  { %7118 = vmatpush1.bf16.msra.mxu0 %v10847_v29  ;;  %7274 = vmatpush1.bf16.msra.mxu1 %v10845_v24  ;;  %v9871_v24 = vmax.f32 %v10852_v49, 0.0  ;;  %v10856_v49 = vld [vmem:[#allocation42_spill] sm:$0xff] }
 0x30c   :  { %7120 = vmatprep.subr.bf16.mxu0 %v10848_v45  ;;  %7276 = vmatprep.subr.bf16.mxu1 %v10846_v18 }
 0x30f   :  { %7122 = vmatpush1.bf16.msra.mxu0 %v10849_v4  ;;  %7278 = vmatpush1.bf16.msra.mxu1 %v10847_v29  ;;  %v10854_v29 = vld [vmem:[#allocation39_spill] sm:$0xff] }
 0x310   :  { %7124 = vmatprep.subr.bf16.mxu0 %v10850_v56  ;;  %7280 = vmatprep.subr.bf16.mxu1 %v10848_v45  ;;  %v10855_v45 = vld [vmem:[#allocation41_spill] sm:$0xff] }
 0x312   :  { %3517 = vmatmul.mubr.f32.vlgmr.msra.gmra.mrb[66].mxu0 %v9724_v13 }
 0x313   :  { %7126 = vmatpush1.bf16.msra.mxu0 %v10851_v52  ;;  %7282 = vmatpush1.bf16.msra.mxu1 %v10849_v4  ;;  %v10857_v4 = vld [vmem:[#allocation43_spill] sm:$0xff] }
 0x314   :  { %7128 = vmatprep.subr.bf16.mxu0 %v10853_v57  ;;  %7284 = vmatprep.subr.bf16.mxu1 %v10850_v56  ;;  %v10858_v56 = vld [vmem:[#allocation45_spill] sm:$0xff] }
 0x315   :  { %3589 = vmatprep.mubr.f32.mxu0 %v10788_v38 }
 0x316   :  { %3879 = vmatmul.mubr.f32.vlgmr.msra.gmra.mrb[66].mxu1 %v9871_v24 }
 0x317   :  { %7130 = vmatpush1.bf16.msra.mxu0 %v10854_v29  ;;  %7286 = vmatpush1.bf16.msra.mxu1 %v10851_v52 }
 0x318   :  { %7132 = vmatprep.subr.bf16.mxu0 %v10855_v45  ;;  %7288 = vmatprep.subr.bf16.mxu1 %v10853_v57 }
 0x319   :  { %3951 = vmatprep.mubr.f32.mxu1 %v10788_v38 }
 0x31b   :  { %7134 = vmatpush1.bf16.msra.mxu0 %v10856_v49  ;;  %7290 = vmatpush1.bf16.msra.mxu1 %v10854_v29  ;;  %v9976_v29 = vld [vmem:[%s10625_s4] ss:$0 sm:$0xff] }
 0x31c   :  { %7136 = vmatprep.subr.bf16.mxu0 %v10857_v4  ;;  %7292 = vmatprep.subr.bf16.mxu1 %v10855_v45 }
 0x31f   :  { %7138 = vmatpush1.bf16.msra.mxu0 %v9680_v7  ;;  %7294 = vmatpush1.bf16.msra.mxu1 %v10856_v49 }
 0x320   :  { %7140 = vmatprep.subr.bf16.mxu0 %v10858_v56  ;;  %7296 = vmatprep.subr.bf16.mxu1 %v10857_v4  ;;  %v2444_v4 = vld [vmem:[%s10626_s5 + $0x40] sm:$0xff] }
 0x323   :  { %7142 = vmatpush1.bf16.msra.mxu0 %v9688_v2  ;;  %7298 = vmatpush1.bf16.msra.mxu1 %v9680_v7  ;;  %v2439_v7 = vld [vmem:[%s10626_s5 + $0x18] sm:$0xff] }
 0x324   :  { %7144 = vmatprep.subr.bf16.mxu0 %v9692_v16  ;;  %7300 = vmatprep.subr.bf16.mxu1 %v10858_v56  ;;  %v10737_v56 = vmov 0.0|0.0  }
 0x327   :  { %7146 = vmatpush1.bf16.msra.mxu0 %v9696_v33  ;;  %7302 = vmatpush1.bf16.msra.mxu1 %v9688_v2  ;;  %v2436_v2 = vld [vmem:[%s10626_s5] sm:$0xff] }
 0x328   :  { %7148 = vmatprep.subr.bf16.mxu0 %v9700_v61  ;;  %7304 = vmatprep.subr.bf16.mxu1 %v9692_v16  ;;  %v2437_v16 = vld [vmem:[%s10626_s5 + $0x8] sm:$0xff] }
 0x32b   :  { %7150 = vmatpush1.bf16.msra.mxu0 %v9704_v46  ;;  %7306 = vmatpush1.bf16.msra.mxu1 %v9696_v33  ;;  %v2438_v33 = vld [vmem:[%s10626_s5 + $0x10] sm:$0xff] }
 0x32c   :  { %7152 = vmatprep.subr.bf16.mxu0 %v9708_v41  ;;  %7308 = vmatprep.subr.bf16.mxu1 %v9700_v61  ;;  %v7340_v61 = vpack.c.bf16 %v2437_v16, %v2436_v2  ;;  %v7343_v2 = vpack.c.bf16 %v2439_v7, %v2438_v33  ;;  %v2440_v16 = vld [vmem:[%s10626_s5 + $0x20] sm:$0xff]  ;;  %v2442_v33 = vld [vmem:[%s10626_s5 + $0x30] sm:$0xff]  ;;  %v2443_v7 = vld [vmem:[%s10626_s5 + $0x38] sm:$0xff] }
 0x32f   :  { %7154 = vmatpush1.bf16.msra.mxu0 %v9712_v21  ;;  %7310 = vmatpush1.bf16.msra.mxu1 %v9704_v46 }
 0x330   :  { %7312 = vmatprep.subr.bf16.mxu1 %v9708_v41  ;;  %7315 = vmatprep.subr.bf16.mxu0 %v10737_v56  ;;  %v10859_v41 = vld [vmem:[#allocation9_spill] sm:$0xff] }
 0x331   :  { %v9917_v46 = vmax.f32 %v10859_v41, 0.0  ;;  %v2441_v41 = vld [vmem:[%s10626_s5 + $0x28] sm:$0xff] }
 0x332   :  { %3590 = vmatmul.mubr.f32.vlgmr.msra.gmra.mrb[66].mxu0 %v9871_v24 }
 0x333   :  { %7314 = vmatpush1.bf16.msra.mxu1 %v9712_v21  ;;  %6397 = vmatprep.mubr.msk.f32.mxu0 %vm8427_vm4, %v10788_v38  ;;  %v7346_v21 = vpack.c.bf16 %v2441_v41, %v2440_v16  ;;  %v2446_v41 = vld [vmem:[%s10626_s5 + $0x50] sm:$0xff] }
 0x334   :  { %7339 = vmatprep.subr.bf16.mxu1 %v10737_v56 }
 0x336   :  { %3952 = vmatmul.mubr.f32.vlgmr.msra.gmra.mrb[66].mxu1 %v9917_v46 }
 0x337   :  { %7341 = vmatpush3.bf16.msra.mxu1 %v7340_v61  ;;  %6432 = vmatprep.mubr.msk.f32.mxu1 %vm8427_vm4, %v10788_v38  ;;  %v7349_v61 = vpack.c.bf16 %v2443_v7, %v2442_v33  ;;  %v2448_v7 = vld [vmem:[%s10626_s5 + $0x60] sm:$0xff] }
 0x338   :  { %7342 = vmatprep.subr.bf16.mxu1 %v10737_v56 }
 0x33b   :  { %7344 = vmatpush3.bf16.msra.mxu1 %v7343_v2  ;;  %v2445_v2 = vld [vmem:[%s10626_s5 + $0x48] sm:$0xff] }
 0x33c   :  { %7345 = vmatprep.subr.bf16.mxu1 %v10737_v56  ;;  %v7352_v16 = vpack.c.bf16 %v2445_v2, %v2444_v4  ;;  %v2449_v4 = vld [vmem:[%s10626_s5 + $0x68] sm:$0xff]  ;;  %v2450_v2 = vld [vmem:[%s10626_s5 + $0x70] sm:$0xff] }
 0x33f   :  { %7347 = vmatpush3.bf16.msra.mxu1 %v7346_v21  ;;  %v2447_v21 = vld [vmem:[%s10626_s5 + $0x58] sm:$0xff] }
 0x340   :  { %7348 = vmatprep.subr.bf16.mxu1 %v10737_v56  ;;  %v7355_v33 = vpack.c.bf16 %v2447_v21, %v2446_v41 }
 0x343   :  { %7350 = vmatpush3.bf16.msra.mxu1 %v7349_v61  ;;  %v7358_v61 = vpack.c.bf16 %v2449_v4, %v2448_v7 }
 0x344   :  { %7351 = vmatprep.subr.bf16.mxu1 %v10737_v56 }
 0x347   :  { %7353 = vmatpush3.bf16.msra.mxu1 %v7352_v16  ;;  %v2451_v16 = vld [vmem:[%s10626_s5 + $0x78] sm:$0xff] }
 0x348   :  { %7354 = vmatprep.subr.bf16.mxu1 %v10737_v56  ;;  %v7361_v41 = vpack.c.bf16 %v2451_v16, %v2450_v2  ;;  %v6211_v16 = vld [vmem:[%s10626_s5 + $0x80] sm:$0xff] }
 0x34b   :  { %7356 = vmatpush3.bf16.msra.mxu1 %v7355_v33 }
 0x34c   :  { %7357 = vmatprep.subr.bf16.mxu1 %v10737_v56 }
 0x34f   :  { %7359 = vmatpush3.bf16.msra.mxu1 %v7358_v61 }
 0x350   :  { %7360 = vmatprep.subr.bf16.mxu1 %v10737_v56 }
 0x353   :  { %7362 = vmatpush3.bf16.msra.mxu1 %v7361_v41  ;;  %v6212_v41 = vld [vmem:[%s10626_s5 + $0x88] sm:$0xff] }
 0x354   :  { %7524 = vmatprep.subr.bf16.mxu1 %v9264_v39 }
 0x365   :  { %v2858_v21 = vpop.f32.mrb[64].mxu0 }
 0x366   :  { %v2860_v33 = vpop.f32.mrb[65].mxu0 }
 0x367   :  { %v2865_v7 = vmax.f32 %v2858_v21, %v2860_v33  ;;  %v7316_v21 = vpack.c.bf16 %v6212_v41, %v6211_v16  ;;  %v6215_v33 = vld [vmem:[%s10626_s5 + $0xa0] sm:$0xff] }
 0x368   :  { %v6219_v41 = vld [vmem:[%s10626_s5 + $0xc0] sm:$0xff] }
 0x369   :  { %v3220_v4 = vpop.f32.mrb[64].mxu1  ;;  %7317 = vmatpush3.bf16.msra.mxu0 %v7316_v21  ;;  %v6220_v21 = vld [vmem:[%s10626_s5 + $0xc8] sm:$0xff] }
 0x36a   :  { %v3222_v49 = vpop.f32.mrb[65].mxu1  ;;  %7318 = vmatprep.subr.bf16.mxu0 %v10737_v56 }
 0x36b   :  { %v3227_v45 = vmax.f32 %v3220_v4, %v3222_v49 }
 0x36d   :  { %v3228_v57 = vmax.f32 %v2865_v7, %v3227_v45  ;;  %v6213_v45 = vld [vmem:[%s10626_s5 + $0x90] sm:$0xff]  ;;  %v6216_v7 = vld [vmem:[%s10626_s5 + $0xa8] sm:$0xff] }
 0x36e   :  { %v7322_v4 = vpack.c.bf16 %v6216_v7, %v6215_v33  ;;  %v6223_v7 = vld [vmem:[%s10626_s5 + $0xe0] sm:$0xff] }
 0x36f   :  { %v3235_v61 = vadd.f32 %v9976_v29, %v3228_v57  ;;  %v6214_v57 = vld [vmem:[%s10626_s5 + $0x98] sm:$0xff] }
 0x370   :  { %v7319_v49 = vpack.c.bf16 %v6214_v57, %v6213_v45  ;;  %v7328_v45 = vpack.c.bf16 %v6220_v21, %v6219_v41  ;;  %v6221_v57 = vld [vmem:[%s10626_s5 + $0xd0] sm:$0xff]  ;;  %v10860_v21 = vld [vmem:[#allocation16_spill] sm:$0xff] }
 0x371   :  { %v3236_v2 = vmax.f32 %v3235_v61, 0.0  ;;  %v6217_v61 = vld [vmem:[%s10626_s5 + $0xb0] sm:$0xff] }
 0x372   :  { %7320 = vmatpush3.bf16.msra.mxu0 %v7319_v49  ;;  %v6222_v49 = vld [vmem:[%s10626_s5 + $0xd8] sm:$0xff] }
 0x373   :  { %6433 = vmatmul.mubr.f32.vlgmr.msra.gmra.mrb[68].mxu1 %v3236_v2  ;;  %7321 = vmatprep.subr.bf16.mxu0 %v10737_v56  ;;  %v6218_v2 = vld [vmem:[%s10626_s5 + $0xb8] sm:$0xff]  ;;  %v7331_v33 = vpack.c.bf16 %v6222_v49, %v6221_v57  ;;  %v10863_v49 = vld [vmem:[#allocation20_spill] sm:$0xff] }
 0x374   :  { %7526 = vmatpush1.bf16.msra.mxu1 %v9266_v15  ;;  %4530 = vmatprep.mubr.f32.mxu1 %v10788_v38  ;;  %v7325_v16 = vpack.c.bf16 %v6218_v2, %v6217_v61  ;;  %v6225_v2 = vld [vmem:[%s10626_s5 + $0xf0] sm:$0xff]  ;;  %v10862_v57 = vld [vmem:[#allocation19_spill] sm:$0xff] }
 0x375   :  { %7528 = vmatprep.subr.bf16.mxu1 %v9270_v40 }
 0x376   :  { %7323 = vmatpush3.bf16.msra.mxu0 %v7322_v4  ;;  %v6224_v4 = vld [vmem:[%s10626_s5 + $0xe8] sm:$0xff] }
 0x377   :  { %7324 = vmatprep.subr.bf16.mxu0 %v10737_v56  ;;  %v7334_v61 = vpack.c.bf16 %v6224_v4, %v6223_v7  ;;  %v10865_v7 = vld [vmem:[#allocation22_spill] sm:$0xff]  ;;  %v10866_v4 = vld [vmem:[#allocation23_spill] sm:$0xff] }
 0x378   :  { %7530 = vmatpush1.bf16.msra.mxu1 %v9280_v19 }
 0x379   :  { %7532 = vmatprep.subr.bf16.mxu1 %v9284_v42 }
 0x37a   :  { %7326 = vmatpush3.bf16.msra.mxu0 %v7325_v16  ;;  %v6226_v16 = vld [vmem:[%s10626_s5 + $0xf8] sm:$0xff] }
 0x37b   :  { %7327 = vmatprep.subr.bf16.mxu0 %v10737_v56  ;;  %v7337_v41 = vpack.c.bf16 %v6226_v16, %v6225_v2  ;;  %v10868_v2 = vld [vmem:[#allocation25_spill] sm:$0xff]  ;;  %v10869_v16 = vld [vmem:[#allocation26_spill] sm:$0xff] }
 0x37c   :  { %7534 = vmatpush1.bf16.msra.mxu1 %v9294_v20 }
 0x37d   :  { %7536 = vmatprep.subr.bf16.mxu1 %v9298_v44 }
 0x37e   :  { %7329 = vmatpush3.bf16.msra.mxu0 %v7328_v45  ;;  %v10861_v45 = vld [vmem:[#allocation17_spill] sm:$0xff] }
 0x37f   :  { %7330 = vmatprep.subr.bf16.mxu0 %v10737_v56 }
 0x380   :  { %7538 = vmatpush1.bf16.msra.mxu1 %v9308_v26 }
 0x381   :  { %7540 = vmatprep.subr.bf16.mxu1 %v9353_v53 }
 0x382   :  { %7332 = vmatpush3.bf16.msra.mxu0 %v7331_v33  ;;  %v10864_v33 = vld [vmem:[#allocation21_spill] sm:$0xff] }
 0x383   :  { %7333 = vmatprep.subr.bf16.mxu0 %v10737_v56 }
 0x384   :  { %7542 = vmatpush1.bf16.msra.mxu1 %v9355_v55 }
 0x385   :  { %7544 = vmatprep.subr.bf16.mxu1 %v9361_v10 }
 0x386   :  { %7335 = vmatpush3.bf16.msra.mxu0 %v7334_v61  ;;  %v10867_v61 = vld [vmem:[#allocation24_spill] sm:$0xff] }
 0x387   :  { %7336 = vmatprep.subr.bf16.mxu0 %v10737_v56  ;;  %v10871_v56 = vld [vmem:[#allocation28_spill] sm:$0xff] }
 0x388   :  { %7546 = vmatpush1.bf16.msra.mxu1 %v9363_v59 }
 0x389   :  { %7548 = vmatprep.subr.bf16.mxu1 %v9369_v31 }
 0x38a   :  { %7338 = vmatpush3.bf16.msra.mxu0 %v7337_v41  ;;  %v10870_v41 = vld [vmem:[#allocation27_spill] sm:$0xff] }
 0x38b   :  { %7364 = vmatprep.subr.bf16.mxu0 %v9264_v39 }
 0x38c   :  { %7550 = vmatpush1.bf16.msra.mxu1 %v9371_v6 }
 0x38d   :  { %7552 = vmatprep.subr.bf16.mxu1 %v9381_v8 }
 0x390   :  { %7554 = vmatpush1.bf16.msra.mxu1 %v9384_v11 }
 0x391   :  { %7556 = vmatprep.subr.bf16.mxu1 %v9392_v14 }
 0x393   :  { %4531 = vmatmul.mubr.f32.vlgmr.msra.gmra.mrb[70].mxu1 %v9871_v24 }
 0x394   :  { %7558 = vmatpush1.bf16.msra.mxu1 %v9412_v48  ;;  %4601 = vmatprep.mubr.f32.mxu1 %v10788_v38 }
 0x395   :  { %7560 = vmatprep.subr.bf16.mxu1 %v9415_v54 }
 0x398   :  { %7562 = vmatpush1.bf16.msra.mxu1 %v9421_v62 }
 0x399   :  { %7564 = vmatprep.subr.bf16.mxu1 %v9427_v28 }
 0x39c   :  { %7566 = vmatpush1.bf16.msra.mxu1 %v9435_v12 }
 0x39d   :  { %7568 = vmatprep.subr.bf16.mxu1 %v9439_v17 }
 0x3a0   :  { %7570 = vmatpush1.bf16.msra.mxu1 %v9447_v51 }
 0x3a1   :  { %7572 = vmatprep.subr.bf16.mxu1 %v9451_v58 }
 0x3a4   :  { %7574 = vmatpush1.bf16.msra.mxu1 %v9458_v30 }
 0x3a5   :  { %7576 = vmatprep.subr.bf16.mxu1 %v9462_v5 }
 0x3a8   :  { %7578 = vmatpush1.bf16.msra.mxu1 %v9469_v22 }
 0x3a9   :  { %7580 = vmatprep.subr.bf16.mxu1 %v9473_v50 }
 0x3ac   :  { %7582 = vmatpush1.bf16.msra.mxu1 %v9480_v1 }
 0x3ad   :  { %7584 = vmatprep.subr.bf16.mxu1 %v9484_v35 }
 0x3b0   :  { %7586 = vmatpush1.bf16.msra.mxu1 %v9491_v25 }
 0x3b1   :  { %7588 = vmatprep.subr.bf16.mxu1 %v9497_v60 }
 0x3b3   :  { %4602 = vmatmul.mubr.f32.vlgmr.msra.gmra.mrb[70].mxu1 %v9724_v13 }
 0x3b4   :  { %7590 = vmatpush1.bf16.msra.mxu1 %v9504_v9  ;;  %4672 = vmatprep.mubr.f32.mxu1 %v10788_v38 }
 0x3b5   :  { %7592 = vmatprep.subr.bf16.mxu1 %v9508_v43 }
 0x3b8   :  { %7594 = vmatpush1.bf16.msra.mxu1 %v9515_v32 }
 0x3b9   :  { %7596 = vmatprep.subr.bf16.mxu1 %v9519_v3 }
 0x3bc   :  { %7598 = vmatpush1.bf16.msra.mxu1 %v9529_v34 }
 0x3bd   :  { %7600 = vmatprep.subr.bf16.mxu1 %v9533_v0 }
 0x3c0   :  { %7602 = vmatpush1.bf16.msra.mxu1 %v9538_v37 }
 0x3c1   :  { %7604 = vmatprep.subr.bf16.mxu1 %v9542_v36 }
 0x3c4   :  { %7606 = vmatpush1.bf16.msra.mxu1 %v9546_v47 }
 0x3c5   :  { %7608 = vmatprep.subr.bf16.mxu1 %v10830_v63 }
 0x3c8   :  { %7610 = vmatpush1.bf16.msra.mxu1 %v10831_v27 }
 0x3c9   :  { %7612 = vmatprep.subr.bf16.mxu1 %v10860_v21  ;;  %v10895_v21 = vld [vmem:[#allocation11_spill] sm:$0xff] }
 0x3cc   :  { %7614 = vmatpush1.bf16.msra.mxu1 %v10861_v45  ;;  %v10892_v45 = vld [vmem:[#allocation50_spill] sm:$0xff] }
 0x3cd   :  { %7616 = vmatprep.subr.bf16.mxu1 %v10834_v23  ;;  %v10891_v23 = vld [vmem:[#allocation49_spill] sm:$0xff] }
 0x3d0   :  { %7618 = vmatpush1.bf16.msra.mxu1 %v10862_v57  ;;  %v10873_v57 = vld [vmem:[#allocation30_spill] sm:$0xff] }
 0x3d1   :  { %7620 = vmatprep.subr.bf16.mxu1 %v10863_v49  ;;  %v10872_v49 = vld [vmem:[#allocation29_spill] sm:$0xff] }
 0x3d3   :  { %4673 = vmatmul.mubr.f32.vlgmr.msra.gmra.mrb[70].mxu1 %v9917_v46 }
 0x3d4   :  { %7622 = vmatpush1.bf16.msra.mxu1 %v10864_v33  ;;  %4745 = vmatprep.mubr.f32.mxu1 %v10788_v38  ;;  %v10874_v33 = vld [vmem:[#allocation31_spill] sm:$0xff] }
 0x3d5   :  { %7624 = vmatprep.subr.bf16.mxu1 %v10865_v7  ;;  %v10875_v7 = vld [vmem:[#allocation33_spill] sm:$0xff] }
 0x3d8   :  { %7626 = vmatpush1.bf16.msra.mxu1 %v10866_v4  ;;  %v10876_v4 = vld [vmem:[#allocation34_spill] sm:$0xff] }
 0x3d9   :  { %7628 = vmatprep.subr.bf16.mxu1 %v10867_v61  ;;  %v10877_v61 = vld [vmem:[#allocation35_spill] sm:$0xff] }
 0x3dc   :  { %7630 = vmatpush1.bf16.msra.mxu1 %v10868_v2  ;;  %v10878_v2 = vld [vmem:[#allocation10_spill] sm:$0xff] }
 0x3dd   :  { %7632 = vmatprep.subr.bf16.mxu1 %v10869_v16  ;;  %v10106_v16 = vmax.f32 %v10878_v2, 0.0  ;;  %v10886_v2 = vld [vmem:[#allocation44_spill] sm:$0xff] }
 0x3df   :  { %10879 = vst [vmem:[#allocation14_spill] sm:$0xff] %v10106_v16 }
 0x3e0   :  { %7634 = vmatpush1.bf16.msra.mxu1 %v10870_v41  ;;  %v10880_v41 = vld [vmem:[#allocation36_spill] sm:$0xff] }
 0x3e1   :  { %7636 = vmatprep.subr.bf16.mxu1 %v10871_v56 }
 0x3e4   :  { %7638 = vmatpush1.bf16.msra.mxu1 %v10872_v49 }
 0x3e5   :  { %7640 = vmatprep.subr.bf16.mxu1 %v10873_v57  ;;  %v10887_v57 = vld [vmem:[#allocation45_spill] sm:$0xff] }
 0x3e8   :  { %7642 = vmatpush1.bf16.msra.mxu1 %v10874_v33  ;;  %v10881_v33 = vld [vmem:[#allocation38_spill] sm:$0xff] }
 0x3e9   :  { %7644 = vmatprep.subr.bf16.mxu1 %v10846_v18  ;;  %v10882_v18 = vld [vmem:[#allocation39_spill] sm:$0xff] }
 0x3ec   :  { %7646 = vmatpush1.bf16.msra.mxu1 %v10875_v7  ;;  %v10883_v7 = vld [vmem:[#allocation41_spill] sm:$0xff] }
 0x3ed   :  { %7648 = vmatprep.subr.bf16.mxu1 %v10876_v4  ;;  %v10884_v4 = vld [vmem:[#allocation42_spill] sm:$0xff] }
 0x3f0   :  { %7650 = vmatpush1.bf16.msra.mxu1 %v10877_v61  ;;  %v10885_v61 = vld [vmem:[#allocation43_spill] sm:$0xff] }
 0x3f1   :  { %7652 = vmatprep.subr.bf16.mxu1 %v10880_v41  ;;  %v10888_v41 = vld [vmem:[#allocation46_spill] sm:$0xff] }
 0x3f3   :  { %4746 = vmatmul.mubr.f32.vlgmr.msra.gmra.mrb[70].mxu1 %v10106_v16 }
 0x3f4   :  { %7654 = vmatpush1.bf16.msra.mxu1 %v10851_v52  ;;  %4818 = vmatprep.mubr.f32.mxu1 %v10788_v38  ;;  %v10889_v52 = vld [vmem:[#allocation47_spill] sm:$0xff] }
 0x3f5   :  { %7656 = vmatprep.subr.bf16.mxu1 %v10881_v33  ;;  %v10890_v33 = vld [vmem:[#allocation48_spill] sm:$0xff] }
 0x3f8   :  { %7658 = vmatpush1.bf16.msra.mxu1 %v10882_v18 }
 0x3f9   :  { %7660 = vmatprep.subr.bf16.mxu1 %v10883_v7 }
 0x3fc   :  { %7662 = vmatpush1.bf16.msra.mxu1 %v10884_v4 }
 0x3fd   :  { %7664 = vmatprep.subr.bf16.mxu1 %v10885_v61 }
 0x400   :  { %7666 = vmatpush1.bf16.msra.mxu1 %v10886_v2  ;;  %v10893_v2 = vld [vmem:[#allocation51_spill] sm:$0xff] }
 0x401   :  { %7668 = vmatprep.subr.bf16.mxu1 %v10887_v57 }
 0x404   :  { %7670 = vmatpush1.bf16.msra.mxu1 %v10888_v41  ;;  %v10894_v41 = vld [vmem:[#allocation52_spill] sm:$0xff] }
 0x405   :  { %v3591_v49 = vpop.f32.mrb[66].mxu0  ;;  %7672 = vmatprep.subr.bf16.mxu1 %v10889_v52  ;;  %v10128_v52 = vmax.f32 %v10895_v21, 0.0  ;;  %v10897_v21 = vld [vmem:[#allocation40_spill] sm:$0xff] }
 0x406   :  { %v3593_v56 = vpop.f32.mrb[67].mxu0 }
 0x407   :  { %v3598_v16 = vmax.f32 %v3591_v49, %v3593_v56  ;;  %10896 = vst [vmem:[#allocation15_spill] sm:$0xff] %v10128_v52  ;;  %v10899_v49 = vld [vmem:[#allocation17_spill] sm:$0xff] }
 0x408   :  { %7674 = vmatpush1.bf16.msra.mxu1 %v10890_v33 }
 0x409   :  { %v3953_v18 = vpop.f32.mrb[66].mxu1  ;;  %7676 = vmatprep.subr.bf16.mxu1 %v10891_v23 }
 0x40a   :  { %v3955_v7 = vpop.f32.mrb[67].mxu1 }
 0x40b   :  { %v3960_v4 = vmax.f32 %v3953_v18, %v3955_v7  ;;  %v10900_v7 = vld [vmem:[#allocation18_spill] sm:$0xff] }
 0x40c   :  { %7678 = vmatpush1.bf16.msra.mxu1 %v10892_v45 }
 0x40d   :  { %v3961_v61 = vmax.f32 %v3598_v16, %v3960_v4  ;;  %7680 = vmatprep.subr.bf16.mxu1 %v10893_v2  ;;  %v10901_v4 = vld [vmem:[#allocation19_spill] sm:$0xff]  ;;  %v10903_v16 = vld [vmem:[#allocation14_spill] sm:$0xff] }
 0x40f   :  { %v3962_v57 = vadd.f32 %v9976_v29, %v3961_v61  ;;  %v10902_v61 = vld [vmem:[#allocation20_spill] sm:$0xff] }
 0x410   :  { %7682 = vmatpush1.bf16.msra.mxu1 %v10894_v41 }
 0x411   :  { %v3963_v56 = vmax.f32 %v3962_v57, 0.0  ;;  %7708 = vmatprep.subr.bf16.mxu1 %v9264_v39  ;;  %v10898_v57 = vld [vmem:[#allocation16_spill] sm:$0xff] }
 0x413   :  { %4819 = vmatmul.mubr.f32.vlgmr.msra.gmra.mrb[70].mxu1 %v10128_v52  ;;  %6398 = vmatmul.mubr.f32.vlgmr.msra.gmra.mrb[68].mxu0 %v3963_v56  ;;  %v10904_v56 = vld [vmem:[#allocation21_spill] sm:$0xff] }
 0x414   :  { %7366 = vmatpush1.bf16.msra.mxu0 %v9266_v15  ;;  %7710 = vmatpush1.bf16.msra.mxu1 %v9266_v15 }
 0x415   :  { %7368 = vmatprep.subr.bf16.mxu0 %v9270_v40  ;;  %7712 = vmatprep.subr.bf16.mxu1 %v9270_v40 }
 0x416   :  { %4168 = vmatprep.mubr.f32.mxu0 %v10788_v38  ;;  %4966 = vmatprep.mubr.f32.mxu1 %v10788_v38 }
 0x418   :  { %7370 = vmatpush1.bf16.msra.mxu0 %v9280_v19  ;;  %7714 = vmatpush1.bf16.msra.mxu1 %v9280_v19 }
 0x419   :  { %7372 = vmatprep.subr.bf16.mxu0 %v9284_v42  ;;  %7716 = vmatprep.subr.bf16.mxu1 %v9284_v42 }
 0x41c   :  { %7374 = vmatpush1.bf16.msra.mxu0 %v9294_v20  ;;  %7718 = vmatpush1.bf16.msra.mxu1 %v9294_v20 }
 0x41d   :  { %7376 = vmatprep.subr.bf16.mxu0 %v9298_v44  ;;  %7720 = vmatprep.subr.bf16.mxu1 %v9298_v44 }
 0x420   :  { %7378 = vmatpush1.bf16.msra.mxu0 %v9308_v26  ;;  %7722 = vmatpush1.bf16.msra.mxu1 %v9308_v26 }
 0x421   :  { %7380 = vmatprep.subr.bf16.mxu0 %v9353_v53  ;;  %7724 = vmatprep.subr.bf16.mxu1 %v9353_v53 }
 0x424   :  { %7382 = vmatpush1.bf16.msra.mxu0 %v9355_v55  ;;  %7726 = vmatpush1.bf16.msra.mxu1 %v9355_v55 }
 0x425   :  { %7384 = vmatprep.subr.bf16.mxu0 %v9361_v10  ;;  %7728 = vmatprep.subr.bf16.mxu1 %v9361_v10 }
 0x428   :  { %7386 = vmatpush1.bf16.msra.mxu0 %v9363_v59  ;;  %7730 = vmatpush1.bf16.msra.mxu1 %v9363_v59 }
 0x429   :  { %7388 = vmatprep.subr.bf16.mxu0 %v9369_v31  ;;  %7732 = vmatprep.subr.bf16.mxu1 %v9369_v31 }
 0x42c   :  { %7390 = vmatpush1.bf16.msra.mxu0 %v9371_v6  ;;  %7734 = vmatpush1.bf16.msra.mxu1 %v9371_v6 }
 0x42d   :  { %7392 = vmatprep.subr.bf16.mxu0 %v9381_v8  ;;  %7736 = vmatprep.subr.bf16.mxu1 %v9381_v8 }
 0x430   :  { %7394 = vmatpush1.bf16.msra.mxu0 %v9384_v11  ;;  %7738 = vmatpush1.bf16.msra.mxu1 %v9384_v11 }
 0x431   :  { %7396 = vmatprep.subr.bf16.mxu0 %v9392_v14  ;;  %7740 = vmatprep.subr.bf16.mxu1 %v9392_v14 }
 0x433   :  { %4169 = vmatmul.mubr.f32.vlgmr.msra.gmra.mrb[70].mxu0 %v9724_v13  ;;  %4967 = vmatmul.mubr.f32.vlgmr.msra.gmra.mrb[72].mxu1 %v9917_v46 }
 0x434   :  { %7398 = vmatpush1.bf16.msra.mxu0 %v9412_v48  ;;  %7742 = vmatpush1.bf16.msra.mxu1 %v9412_v48 }
 0x435   :  { %7400 = vmatprep.subr.bf16.mxu0 %v9415_v54  ;;  %7744 = vmatprep.subr.bf16.mxu1 %v9415_v54 }
 0x436   :  { %4239 = vmatprep.mubr.f32.mxu0 %v10788_v38  ;;  %5037 = vmatprep.mubr.f32.mxu1 %v10788_v38 }
 0x438   :  { %7402 = vmatpush1.bf16.msra.mxu0 %v9421_v62  ;;  %7746 = vmatpush1.bf16.msra.mxu1 %v9421_v62 }
 0x439   :  { %7404 = vmatprep.subr.bf16.mxu0 %v9427_v28  ;;  %7748 = vmatprep.subr.bf16.mxu1 %v9427_v28 }
 0x43c   :  { %7406 = vmatpush1.bf16.msra.mxu0 %v9435_v12  ;;  %7750 = vmatpush1.bf16.msra.mxu1 %v9435_v12 }
 0x43d   :  { %7408 = vmatprep.subr.bf16.mxu0 %v9439_v17  ;;  %7752 = vmatprep.subr.bf16.mxu1 %v9439_v17 }
 0x440   :  { %7410 = vmatpush1.bf16.msra.mxu0 %v9447_v51  ;;  %7754 = vmatpush1.bf16.msra.mxu1 %v9447_v51 }
 0x441   :  { %7412 = vmatprep.subr.bf16.mxu0 %v9451_v58  ;;  %7756 = vmatprep.subr.bf16.mxu1 %v9451_v58 }
 0x444   :  { %7414 = vmatpush1.bf16.msra.mxu0 %v9458_v30  ;;  %7758 = vmatpush1.bf16.msra.mxu1 %v9458_v30 }
 0x445   :  { %7416 = vmatprep.subr.bf16.mxu0 %v9462_v5  ;;  %7760 = vmatprep.subr.bf16.mxu1 %v9462_v5 }
 0x446   :  { %v10190_v13 = vpop.f32.mrb[68].mxu1 }
 0x447   :  { %v6434_v18 = vpop.f32.mrb[69].mxu1 }
 0x448   :  { %7418 = vmatpush1.bf16.msra.mxu0 %v9469_v22  ;;  %7762 = vmatpush1.bf16.msra.mxu1 %v9469_v22  ;;  %v10905_v18 = vld [vmem:[#allocation22_spill] sm:$0xff] }
 0x449   :  { %7420 = vmatprep.subr.bf16.mxu0 %v9473_v50  ;;  %7764 = vmatprep.subr.bf16.mxu1 %v9473_v50 }
 0x44c   :  { %7422 = vmatpush1.bf16.msra.mxu0 %v9480_v1  ;;  %7766 = vmatpush1.bf16.msra.mxu1 %v9480_v1 }
 0x44d   :  { %7424 = vmatprep.subr.bf16.mxu0 %v9484_v35  ;;  %7768 = vmatprep.subr.bf16.mxu1 %v9484_v35 }
 0x450   :  { %7426 = vmatpush1.bf16.msra.mxu0 %v9491_v25  ;;  %7770 = vmatpush1.bf16.msra.mxu1 %v9491_v25 }
 0x451   :  { %7428 = vmatprep.subr.bf16.mxu0 %v9497_v60  ;;  %7772 = vmatprep.subr.bf16.mxu1 %v9497_v60 }
 0x453   :  { %4240 = vmatmul.mubr.f32.vlgmr.msra.gmra.mrb[70].mxu0 %v10897_v21  ;;  %5038 = vmatmul.mubr.f32.vlgmr.msra.gmra.mrb[72].mxu1 %v9871_v24  ;;  %v10906_v21 = vld [vmem:[#allocation23_spill] sm:$0xff] }
 0x454   :  { %7430 = vmatpush1.bf16.msra.mxu0 %v9504_v9  ;;  %7774 = vmatpush1.bf16.msra.mxu1 %v9504_v9 }
 0x455   :  { %7432 = vmatprep.subr.bf16.mxu0 %v9508_v43  ;;  %7776 = vmatprep.subr.bf16.mxu1 %v9508_v43 }
 0x456   :  { %4310 = vmatprep.mubr.f32.mxu0 %v10788_v38  ;;  %5108 = vmatprep.mubr.f32.mxu1 %v10788_v38 }
 0x458   :  { %7434 = vmatpush1.bf16.msra.mxu0 %v9515_v32  ;;  %7778 = vmatpush1.bf16.msra.mxu1 %v9515_v32 }
 0x459   :  { %7436 = vmatprep.subr.bf16.mxu0 %v9519_v3  ;;  %7780 = vmatprep.subr.bf16.mxu1 %v9519_v3 }
 0x45c   :  { %7438 = vmatpush1.bf16.msra.mxu0 %v9529_v34  ;;  %7782 = vmatpush1.bf16.msra.mxu1 %v9529_v34 }
 0x45d   :  { %7440 = vmatprep.subr.bf16.mxu0 %v9533_v0  ;;  %7784 = vmatprep.subr.bf16.mxu1 %v9533_v0 }
 0x460   :  { %7442 = vmatpush1.bf16.msra.mxu0 %v9538_v37  ;;  %7786 = vmatpush1.bf16.msra.mxu1 %v9538_v37 }
 0x461   :  { %7444 = vmatprep.subr.bf16.mxu0 %v9542_v36  ;;  %7788 = vmatprep.subr.bf16.mxu1 %v9542_v36 }
 0x464   :  { %7446 = vmatpush1.bf16.msra.mxu0 %v9546_v47  ;;  %7790 = vmatpush1.bf16.msra.mxu1 %v9546_v47 }
 0x465   :  { %7448 = vmatprep.subr.bf16.mxu0 %v10830_v63  ;;  %7792 = vmatprep.subr.bf16.mxu1 %v10830_v63 }
 0x468   :  { %7450 = vmatpush1.bf16.msra.mxu0 %v10831_v27  ;;  %7794 = vmatpush1.bf16.msra.mxu1 %v10831_v27 }
 0x469   :  { %7452 = vmatprep.subr.bf16.mxu0 %v10898_v57  ;;  %7796 = vmatprep.subr.bf16.mxu1 %v10898_v57 }
 0x46c   :  { %7454 = vmatpush1.bf16.msra.mxu0 %v10899_v49  ;;  %7798 = vmatpush1.bf16.msra.mxu1 %v10899_v49 }
 0x46d   :  { %7456 = vmatprep.subr.bf16.mxu0 %v10900_v7  ;;  %7800 = vmatprep.subr.bf16.mxu1 %v10900_v7 }
 0x470   :  { %7458 = vmatpush1.bf16.msra.mxu0 %v10901_v4  ;;  %7802 = vmatpush1.bf16.msra.mxu1 %v10901_v4  ;;  %v10911_v4 = vld [vmem:[#allocation28_spill] sm:$0xff] }
 0x471   :  { %7460 = vmatprep.subr.bf16.mxu0 %v10902_v61  ;;  %7804 = vmatprep.subr.bf16.mxu1 %v10902_v61  ;;  %v10907_v61 = vld [vmem:[#allocation24_spill] sm:$0xff] }
 0x473   :  { %4311 = vmatmul.mubr.f32.vlgmr.msra.gmra.mrb[70].mxu0 %v9871_v24  ;;  %5109 = vmatmul.mubr.f32.vlgmr.msra.gmra.mrb[72].mxu1 %v10903_v16  ;;  %v10908_v24 = vld [vmem:[#allocation25_spill] sm:$0xff] }
 0x474   :  { %7462 = vmatpush1.bf16.msra.mxu0 %v10904_v56  ;;  %7806 = vmatpush1.bf16.msra.mxu1 %v10904_v56  ;;  %v10909_v56 = vld [vmem:[#allocation26_spill] sm:$0xff] }
 0x475   :  { %7464 = vmatprep.subr.bf16.mxu0 %v10905_v18  ;;  %7808 = vmatprep.subr.bf16.mxu1 %v10905_v18  ;;  %v10910_v18 = vld [vmem:[#allocation27_spill] sm:$0xff] }
 0x476   :  { %4383 = vmatprep.mubr.f32.mxu0 %v10788_v38  ;;  %5181 = vmatprep.mubr.f32.mxu1 %v10788_v38 }
 0x478   :  { %7466 = vmatpush1.bf16.msra.mxu0 %v10906_v21  ;;  %7810 = vmatpush1.bf16.msra.mxu1 %v10906_v21  ;;  %v10912_v21 = vld [vmem:[#allocation29_spill] sm:$0xff] }
 0x479   :  { %7468 = vmatprep.subr.bf16.mxu0 %v10907_v61  ;;  %7812 = vmatprep.subr.bf16.mxu1 %v10907_v61  ;;  %v10913_v61 = vld [vmem:[#allocation30_spill] sm:$0xff] }
 0x47c   :  { %7470 = vmatpush1.bf16.msra.mxu0 %v10908_v24  ;;  %7814 = vmatpush1.bf16.msra.mxu1 %v10908_v24  ;;  %v10914_v24 = vld [vmem:[#allocation31_spill] sm:$0xff] }
 0x47d   :  { %7472 = vmatprep.subr.bf16.mxu0 %v10909_v56  ;;  %7816 = vmatprep.subr.bf16.mxu1 %v10909_v56  ;;  %v10915_v56 = vld [vmem:[#allocation32_spill] sm:$0xff] }
 0x480   :  { %7474 = vmatpush1.bf16.msra.mxu0 %v10910_v18  ;;  %7818 = vmatpush1.bf16.msra.mxu1 %v10910_v18  ;;  %v10916_v18 = vld [vmem:[#allocation33_spill] sm:$0xff] }
 0x481   :  { %7476 = vmatprep.subr.bf16.mxu0 %v10911_v4  ;;  %7820 = vmatprep.subr.bf16.mxu1 %v10911_v4  ;;  %v10917_v4 = vld [vmem:[#allocation34_spill] sm:$0xff] }
 0x484   :  { %7478 = vmatpush1.bf16.msra.mxu0 %v10912_v21  ;;  %7822 = vmatpush1.bf16.msra.mxu1 %v10912_v21  ;;  %v10918_v21 = vld [vmem:[#allocation35_spill] sm:$0xff] }
 0x485   :  { %7480 = vmatprep.subr.bf16.mxu0 %v10913_v61  ;;  %7824 = vmatprep.subr.bf16.mxu1 %v10913_v61  ;;  %v10919_v61 = vld [vmem:[#allocation36_spill] sm:$0xff] }
 0x488   :  { %7482 = vmatpush1.bf16.msra.mxu0 %v10914_v24  ;;  %7826 = vmatpush1.bf16.msra.mxu1 %v10914_v24  ;;  %v10927_v24 = vld [vmem:[#allocation45_spill] sm:$0xff] }
 0x489   :  { %7484 = vmatprep.subr.bf16.mxu0 %v10915_v56  ;;  %7828 = vmatprep.subr.bf16.mxu1 %v10915_v56  ;;  %v10920_v56 = vld [vmem:[#allocation37_spill] sm:$0xff] }
 0x48c   :  { %7486 = vmatpush1.bf16.msra.mxu0 %v10916_v18  ;;  %7830 = vmatpush1.bf16.msra.mxu1 %v10916_v18  ;;  %v10921_v18 = vld [vmem:[#allocation38_spill] sm:$0xff] }
 0x48d   :  { %7488 = vmatprep.subr.bf16.mxu0 %v10917_v4  ;;  %7832 = vmatprep.subr.bf16.mxu1 %v10917_v4  ;;  %v10924_v4 = vld [vmem:[#allocation42_spill] sm:$0xff] }
 0x490   :  { %7490 = vmatpush1.bf16.msra.mxu0 %v10918_v21  ;;  %7834 = vmatpush1.bf16.msra.mxu1 %v10918_v21  ;;  %v10922_v21 = vld [vmem:[#allocation39_spill] sm:$0xff] }
 0x491   :  { %7492 = vmatprep.subr.bf16.mxu0 %v10919_v61  ;;  %7836 = vmatprep.subr.bf16.mxu1 %v10919_v61  ;;  %v10923_v61 = vld [vmem:[#allocation41_spill] sm:$0xff] }
 0x493   :  { %4384 = vmatmul.mubr.f32.vlgmr.msra.gmra.mrb[70].mxu0 %v9917_v46  ;;  %5182 = vmatmul.mubr.f32.vlgmr.msra.gmra.mrb[72].mxu1 %v10128_v52  ;;  %v6239_v52 = vld [vmem:[%s10626_s5 + $0x160] sm:$0xff] }
 0x494   :  { %7494 = vmatpush1.bf16.msra.mxu0 %v10920_v56  ;;  %7838 = vmatpush1.bf16.msra.mxu1 %v10920_v56  ;;  %v10925_v56 = vld [vmem:[#allocation43_spill] sm:$0xff] }
 0x495   :  { %7496 = vmatprep.subr.bf16.mxu0 %v10921_v18  ;;  %7840 = vmatprep.subr.bf16.mxu1 %v10921_v18  ;;  %v10926_v18 = vld [vmem:[#allocation44_spill] sm:$0xff] }
 0x496   :  { %4456 = vmatprep.mubr.f32.mxu0 %v10788_v38  ;;  %5254 = vmatprep.mubr.f32.mxu1 %v10788_v38 }
 0x498   :  { %7498 = vmatpush1.bf16.msra.mxu0 %v10922_v21  ;;  %7842 = vmatpush1.bf16.msra.mxu1 %v10922_v21  ;;  %v10928_v21 = vld [vmem:[#allocation46_spill] sm:$0xff] }
 0x499   :  { %7500 = vmatprep.subr.bf16.mxu0 %v10923_v61  ;;  %7844 = vmatprep.subr.bf16.mxu1 %v10923_v61  ;;  %v10929_v61 = vld [vmem:[#allocation47_spill] sm:$0xff] }
 0x49c   :  { %7502 = vmatpush1.bf16.msra.mxu0 %v10924_v4  ;;  %7846 = vmatpush1.bf16.msra.mxu1 %v10924_v4 }
 0x49d   :  { %7504 = vmatprep.subr.bf16.mxu0 %v10925_v56  ;;  %7848 = vmatprep.subr.bf16.mxu1 %v10925_v56  ;;  %v6235_v56 = vld [vmem:[%s10626_s5 + $0x140] sm:$0xff] }
 0x4a0   :  { %7506 = vmatpush1.bf16.msra.mxu0 %v10926_v18  ;;  %7850 = vmatpush1.bf16.msra.mxu1 %v10926_v18  ;;  %v6230_v18 = vld [vmem:[%s10626_s5 + $0x118] sm:$0xff] }
 0x4a1   :  { %7508 = vmatprep.subr.bf16.mxu0 %v10927_v24  ;;  %7852 = vmatprep.subr.bf16.mxu1 %v10927_v24 }
 0x4a4   :  { %7510 = vmatpush1.bf16.msra.mxu0 %v10928_v21  ;;  %7854 = vmatpush1.bf16.msra.mxu1 %v10928_v21  ;;  %v10930_v21 = vld [vmem:[#allocation12_spill] sm:$0xff] }
 0x4a5   :  { %7512 = vmatprep.subr.bf16.mxu0 %v10929_v61  ;;  %7856 = vmatprep.subr.bf16.mxu1 %v10929_v61  ;;  %v6227_v61 = vld [vmem:[%s10626_s5 + $0x100] sm:$0xff]  ;;  %v10775_v24 = vmax.f32 %v10930_v21, 0.0 }
 0x4a8   :  { %7514 = vmatpush1.bf16.msra.mxu0 %v10890_v33  ;;  %7858 = vmatpush1.bf16.msra.mxu1 %v10890_v33  ;;  %v6228_v33 = vld [vmem:[%s10626_s5 + $0x108] sm:$0xff] }
 0x4a9   :  { %7516 = vmatprep.subr.bf16.mxu0 %v10891_v23  ;;  %7860 = vmatprep.subr.bf16.mxu1 %v10891_v23  ;;  %v7684_v23 = vpack.c.bf16 %v6228_v33, %v6227_v61  ;;  %v6231_v61 = vld [vmem:[%s10626_s5 + $0x120] sm:$0xff] }
 0x4ac   :  { %7518 = vmatpush1.bf16.msra.mxu0 %v10892_v45  ;;  %7862 = vmatpush1.bf16.msra.mxu1 %v10892_v45  ;;  %v10931_v45 = vmov 0.0|0.0  }
 0x4ad   :  { %7520 = vmatprep.subr.bf16.mxu0 %v10893_v2  ;;  %7864 = vmatprep.subr.bf16.mxu1 %v10893_v2  ;;  %v6229_v2 = vld [vmem:[%s10626_s5 + $0x110] sm:$0xff] }
 0x4ae   :  { %v7687_v33 = vpack.c.bf16 %v6230_v18, %v6229_v2  ;;  %v6234_v2 = vld [vmem:[%s10626_s5 + $0x138] sm:$0xff] }
 0x4b0   :  { %7522 = vmatpush1.bf16.msra.mxu0 %v10894_v41  ;;  %7866 = vmatpush1.bf16.msra.mxu1 %v10894_v41  ;;  %v6232_v41 = vld [vmem:[%s10626_s5 + $0x128] sm:$0xff] }
 0x4b1   :  { %7683 = vmatprep.subr.bf16.mxu0 %v10931_v45  ;;  %8027 = vmatprep.subr.bf16.mxu1 %v10931_v45 }
 0x4b3   :  { %4457 = vmatmul.mubr.f32.vlgmr.msra.gmra.mrb[70].mxu0 %v10903_v16  ;;  %5255 = vmatmul.mubr.f32.vlgmr.msra.gmra.mrb[72].mxu1 %v10775_v24  ;;  %v7690_v24 = vpack.c.bf16 %v6232_v41, %v6231_v61  ;;  %v6236_v41 = vld [vmem:[%s10626_s5 + $0x148] sm:$0xff]  ;;  %v6237_v61 = vld [vmem:[%s10626_s5 + $0x150] sm:$0xff] }
 0x4b4   :  { %7685 = vmatpush3.bf16.msra.mxu0 %v7684_v23  ;;  %6467 = vmatprep.mubr.msk.f32.mxu0 %vm8427_vm4, %v10788_v38  ;;  %v6233_v23 = vld [vmem:[%s10626_s5 + $0x130] sm:$0xff] }
 0x4b5   :  { %7686 = vmatprep.subr.bf16.mxu0 %v10931_v45  ;;  %6502 = vmatprep.mubr.msk.f32.mxu1 %vm8427_vm4, %v10788_v38  ;;  %v7693_v18 = vpack.c.bf16 %v6234_v2, %v6233_v23 }
 0x4b8   :  { %7688 = vmatpush3.bf16.msra.mxu0 %v7687_v33  ;;  %v7696_v33 = vpack.c.bf16 %v6236_v41, %v6235_v56 }
 0x4b9   :  { %7689 = vmatprep.subr.bf16.mxu0 %v10931_v45 }
 0x4bc   :  { %7691 = vmatpush3.bf16.msra.mxu0 %v7690_v24  ;;  %v6238_v24 = vld [vmem:[%s10626_s5 + $0x158] sm:$0xff] }
 0x4bd   :  { %7692 = vmatprep.subr.bf16.mxu0 %v10931_v45  ;;  %v7699_v23 = vpack.c.bf16 %v6238_v24, %v6237_v61 }
 0x4c0   :  { %7694 = vmatpush3.bf16.msra.mxu0 %v7693_v18 }
 0x4c1   :  { %7695 = vmatprep.subr.bf16.mxu0 %v10931_v45 }
 0x4c4   :  { %7697 = vmatpush3.bf16.msra.mxu0 %v7696_v33  ;;  %v6240_v33 = vld [vmem:[%s10626_s5 + $0x168] sm:$0xff] }
 0x4c5   :  { %7698 = vmatprep.subr.bf16.mxu0 %v10931_v45  ;;  %v7702_v61 = vpack.c.bf16 %v6240_v33, %v6239_v52 }
 0x4c8   :  { %7700 = vmatpush3.bf16.msra.mxu0 %v7699_v23 }
 0x4c9   :  { %7701 = vmatprep.subr.bf16.mxu0 %v10931_v45 }
 0x4cc   :  { %7703 = vmatpush3.bf16.msra.mxu0 %v7702_v61 }
 0x4cd   :  { %7704 = vmatprep.subr.bf16.mxu0 %v10931_v45 }
 0x4e6   :  { %v4820_v2 = vpop.f32.mrb[70].mxu1  ;;  %v4030_v18 = vpop.f32.mrb[68].mxu0 }
 0x4e7   :  { %v10363_v56 = vadd.f32 %v10190_v13, %v4030_v18  ;;  %v4822_v41 = vpop.f32.mrb[71].mxu1  ;;  %v6399_v4 = vpop.f32.mrb[69].mxu0  ;;  %v6241_v13 = vld [vmem:[%s10626_s5 + $0x170] sm:$0xff] }
 0x4e8   :  { %v4827_v21 = vmax.f32 %v4820_v2, %v4822_v41  ;;  %v6242_v4 = vld [vmem:[%s10626_s5 + $0x178] sm:$0xff] }
 0x4e9   :  { %10932 = vst [vmem:[#allocation8_spill] sm:$0xff] %v10363_v56  ;;  %v7705_v24 = vpack.c.bf16 %v6242_v4, %v6241_v13  ;;  %v10967_v13 = vld [vmem:[#allocation50_spill] sm:$0xff]  ;;  %v10968_v4 = vld [vmem:[#allocation51_spill] sm:$0xff] }
 0x4eb   :  { %7706 = vmatpush3.bf16.msra.mxu0 %v7705_v24  ;;  %v10969_v24 = vld [vmem:[#allocation52_spill] sm:$0xff] }
 0x4ec   :  { %7868 = vmatprep.subr.bf16.mxu0 %v9264_v39  ;;  %v6243_v39 = vld [vmem:[%s10626_s5 + $0x180] sm:$0xff] }
 0x586   :  { %v4458_v23 = vpop.f32.mrb[70].mxu0  ;;  %v10379_v2 = vpop.f32.mrb[72].mxu1 }
 0x587   :  { %v4460_v18 = vpop.f32.mrb[71].mxu0  ;;  %v10381_v52 = vpop.f32.mrb[73].mxu1 }
 0x588   :  { %v4465_v41 = vmax.f32 %v4458_v23, %v4460_v18  ;;  %v5263_v33 = vmax.f32 %v10379_v2, %v10381_v52  ;;  %v10970_v23 = vld [vmem:[#allocation13_spill] sm:$0xff]  ;;  %v5723_v52 = vld [vmem:[%s10628_s7 + $0x70] sm:$0xff] }
 0x589   :  { %v2271_v18 = vmax.f32 %v10970_v23, 0.0 }
 0x58a   :  { %v4828_v61 = vmax.f32 %v4465_v41, %v4827_v21  ;;  %v10965_v21 = vld [vmem:[#allocation48_spill] sm:$0xff] }
 0x58c   :  { %v4829_v56 = vadd.f32 %v9976_v29, %v4828_v61  ;;  %v10957_v29 = vld [vmem:[#allocation39_spill] sm:$0xff]  ;;  %v10971_v61 = vld [vmem:[#allocation8_spill] sm:$0xff] }
 0x58e   :  { %v4830_v7 = vmax.f32 %v4829_v56, 0.0  ;;  %v10966_v56 = vld [vmem:[#allocation49_spill] sm:$0xff] }
 0x590   :  { %6468 = vmatmul.mubr.f32.vlgmr.msra.gmra.mrb[72].mxu0 %v4830_v7  ;;  %v10963_v7 = vld [vmem:[#allocation46_spill] sm:$0xff] }
 0x591   :  { %7870 = vmatpush1.bf16.msra.mxu0 %v9266_v15  ;;  %5328 = vmatprep.mubr.f32.mxu0 %v10788_v38  ;;  %v6244_v15 = vld [vmem:[%s10626_s5 + $0x188] sm:$0xff] }
 0x592   :  { %7872 = vmatprep.subr.bf16.mxu0 %v9270_v40  ;;  %v6245_v40 = vld [vmem:[%s10626_s5 + $0x190] sm:$0xff] }
 0x595   :  { %7874 = vmatpush1.bf16.msra.mxu0 %v9280_v19  ;;  %v8028_v19 = vpack.c.bf16 %v6244_v15, %v6243_v39 }
 0x596   :  { %7876 = vmatprep.subr.bf16.mxu0 %v9284_v42  ;;  %v6246_v42 = vld [vmem:[%s10626_s5 + $0x198] sm:$0xff] }
 0x597   :  { %8029 = vmatpush3.bf16.msra.mxu1 %v8028_v19  ;;  %v6256_v19 = vld [vmem:[%s10626_s5 + $0x1e8] sm:$0xff] }
 0x598   :  { %8030 = vmatprep.subr.bf16.mxu1 %v10931_v45 }
 0x599   :  { %7878 = vmatpush1.bf16.msra.mxu0 %v9294_v20  ;;  %v8031_v20 = vpack.c.bf16 %v6246_v42, %v6245_v40  ;;  %v6255_v40 = vld [vmem:[%s10626_s5 + $0x1e0] sm:$0xff] }
 0x59a   :  { %7880 = vmatprep.subr.bf16.mxu0 %v9298_v44  ;;  %v6247_v44 = vld [vmem:[%s10626_s5 + $0x1a0] sm:$0xff]  ;;  %v8046_v42 = vpack.c.bf16 %v6256_v19, %v6255_v40 }
 0x59b   :  { %8032 = vmatpush3.bf16.msra.mxu1 %v8031_v20  ;;  %v6257_v20 = vld [vmem:[%s10626_s5 + $0x1f0] sm:$0xff] }
 0x59c   :  { %8033 = vmatprep.subr.bf16.mxu1 %v10931_v45 }
 0x59d   :  { %7882 = vmatpush1.bf16.msra.mxu0 %v9308_v26  ;;  %v6248_v26 = vld [vmem:[%s10626_s5 + $0x1a8] sm:$0xff] }
 0x59e   :  { %7884 = vmatprep.subr.bf16.mxu0 %v9353_v53  ;;  %v10933_v53 = vld [vmem:[#allocation18_spill] sm:$0xff] }
 0x5a1   :  { %7886 = vmatpush1.bf16.msra.mxu0 %v9355_v55  ;;  %v8034_v55 = vpack.c.bf16 %v6248_v26, %v6247_v44  ;;  %v6258_v44 = vld [vmem:[%s10626_s5 + $0x1f8] sm:$0xff] }
 0x5a2   :  { %7888 = vmatprep.subr.bf16.mxu0 %v9361_v10  ;;  %v6249_v10 = vld [vmem:[%s10626_s5 + $0x1b0] sm:$0xff]  ;;  %v8049_v26 = vpack.c.bf16 %v6258_v44, %v6257_v20  ;;  %v5818_v20 = vld [vmem:[#allocation4 + $0x78] sm:$0xff] }
 0x5a3   :  { %8035 = vmatpush3.bf16.msra.mxu1 %v8034_v55  ;;  %v5710_v55 = vld [vmem:[%s10628_s7 + $0x8] sm:$0xff] }
 0x5a4   :  { %8036 = vmatprep.subr.bf16.mxu1 %v10931_v45 }
 0x5a5   :  { %7890 = vmatpush1.bf16.msra.mxu0 %v9363_v59  ;;  %v6250_v59 = vld [vmem:[%s10626_s5 + $0x1b8] sm:$0xff] }
 0x5a6   :  { %7892 = vmatprep.subr.bf16.mxu0 %v9369_v31  ;;  %v10934_v31 = vld [vmem:[#allocation19_spill] sm:$0xff] }
 0x5a9   :  { %7894 = vmatpush1.bf16.msra.mxu0 %v9371_v6  ;;  %v10935_v6 = vld [vmem:[#allocation20_spill] sm:$0xff] }
 0x5aa   :  { %7896 = vmatprep.subr.bf16.mxu0 %v9381_v8  ;;  %v8037_v8 = vpack.c.bf16 %v6250_v59, %v6249_v10  ;;  %v5711_v10 = vld [vmem:[%s10628_s7 + $0x10] sm:$0xff] }
 0x5ac   :  { %8038 = vmatpush3.bf16.msra.mxu1 %v8037_v8  ;;  %v5713_v8 = vld [vmem:[%s10628_s7 + $0x20] sm:$0xff] }
 0x5ad   :  { %7898 = vmatpush1.bf16.msra.mxu0 %v9384_v11  ;;  %v10936_v11 = vld [vmem:[#allocation15_spill] sm:$0xff]  ;;  %8039 = vmatprep.subr.bf16.mxu1 %v10931_v45 }
 0x5ae   :  { %7900 = vmatprep.subr.bf16.mxu0 %v9392_v14  ;;  %v6251_v14 = vld [vmem:[%s10626_s5 + $0x1c0] sm:$0xff] }
 0x5b0   :  { %5329 = vmatmul.mubr.f32.vlgmr.msra.gmra.mrb[74].mxu0 %v10903_v16  ;;  %v10964_v16 = vld [vmem:[#allocation47_spill] sm:$0xff] }
 0x5b1   :  { %7902 = vmatpush1.bf16.msra.mxu0 %v9412_v48  ;;  %5399 = vmatprep.mubr.f32.mxu0 %v10788_v38  ;;  %v6252_v48 = vld [vmem:[%s10626_s5 + $0x1c8] sm:$0xff] }
 0x5b2   :  { %7904 = vmatprep.subr.bf16.mxu0 %v9415_v54  ;;  %v10937_v54 = vld [vmem:[#allocation21_spill] sm:$0xff] }
 0x5b5   :  { %7906 = vmatpush1.bf16.msra.mxu0 %v9421_v62  ;;  %v10938_v62 = vld [vmem:[#allocation22_spill] sm:$0xff] }
 0x5b6   :  { %7908 = vmatprep.subr.bf16.mxu0 %v9427_v28  ;;  %v8040_v28 = vpack.c.bf16 %v6252_v48, %v6251_v14  ;;  %v5715_v48 = vld [vmem:[%s10628_s7 + $0x30] sm:$0xff] }
 0x5b8   :  { %8041 = vmatpush3.bf16.msra.mxu1 %v8040_v28  ;;  %v5717_v28 = vld [vmem:[%s10628_s7 + $0x40] sm:$0xff] }
 0x5b9   :  { %7910 = vmatpush1.bf16.msra.mxu0 %v9435_v12  ;;  %v6253_v12 = vld [vmem:[%s10626_s5 + $0x1d0] sm:$0xff]  ;;  %8042 = vmatprep.subr.bf16.mxu1 %v10931_v45 }
 0x5ba   :  { %7912 = vmatprep.subr.bf16.mxu0 %v9439_v17  ;;  %v6254_v17 = vld [vmem:[%s10626_s5 + $0x1d8] sm:$0xff] }
 0x5bd   :  { %7914 = vmatpush1.bf16.msra.mxu0 %v9447_v51  ;;  %v10939_v51 = vld [vmem:[#allocation23_spill] sm:$0xff] }
 0x5be   :  { %7916 = vmatprep.subr.bf16.mxu0 %v9451_v58  ;;  %v10940_v58 = vld [vmem:[#allocation24_spill] sm:$0xff] }
 0x5c1   :  { %7918 = vmatpush1.bf16.msra.mxu0 %v9458_v30  ;;  %v8043_v30 = vpack.c.bf16 %v6254_v17, %v6253_v12  ;;  %v5718_v12 = vld [vmem:[%s10628_s7 + $0x48] sm:$0xff] }
 0x5c2   :  { %7920 = vmatprep.subr.bf16.mxu0 %v9462_v5  ;;  %v10941_v5 = vld [vmem:[#allocation25_spill] sm:$0xff]  ;;  %v8064_v17 = vpack.c.bf16 %v5718_v12, %v5717_v28 }
 0x5c3   :  { %8044 = vmatpush3.bf16.msra.mxu1 %v8043_v30 }
 0x5c4   :  { %8045 = vmatprep.subr.bf16.mxu1 %v10931_v45 }
 0x5c5   :  { %7922 = vmatpush1.bf16.msra.mxu0 %v9469_v22  ;;  %v10942_v22 = vld [vmem:[#allocation26_spill] sm:$0xff] }
 0x5c6   :  { %7924 = vmatprep.subr.bf16.mxu0 %v9473_v50  ;;  %v10943_v50 = vld [vmem:[#allocation27_spill] sm:$0xff] }
 0x5c7   :  { %8047 = vmatpush3.bf16.msra.mxu1 %v8046_v42  ;;  %v5817_v42 = vld [vmem:[#allocation4 + $0x70] sm:$0xff] }
 0x5c8   :  { %8048 = vmatprep.subr.bf16.mxu1 %v10931_v45  ;;  %v8097_v44 = vpack.c.bf16 %v5818_v20, %v5817_v42 }
 0x5c9   :  { %7926 = vmatpush1.bf16.msra.mxu0 %v9480_v1  ;;  %v10944_v1 = vld [vmem:[#allocation28_spill] sm:$0xff] }
 0x5ca   :  { %7928 = vmatprep.subr.bf16.mxu0 %v9484_v35  ;;  %v10945_v35 = vld [vmem:[#allocation29_spill] sm:$0xff] }
 0x5cb   :  { %8050 = vmatpush3.bf16.msra.mxu1 %v8049_v26  ;;  %v6261_v26 = vld [vmem:[%s10629_s8] ss:$0 sm:$0xff] }
 0x5cc   :  { %8075 = vmatprep.subr.bf16.mxu1 %v10931_v45 }
 0x5cd   :  { %7930 = vmatpush1.bf16.msra.mxu0 %v9491_v25  ;;  %v10946_v25 = vld [vmem:[#allocation30_spill] sm:$0xff] }
 0x5ce   :  { %7932 = vmatprep.subr.bf16.mxu0 %v9497_v60  ;;  %v10947_v60 = vld [vmem:[#allocation31_spill] sm:$0xff] }
 0x5d0   :  { %5400 = vmatmul.mubr.f32.vlgmr.msra.gmra.mrb[74].mxu0 %v9917_v46  ;;  %v10958_v46 = vld [vmem:[#allocation41_spill] sm:$0xff] }
 0x5d1   :  { %7934 = vmatpush1.bf16.msra.mxu0 %v9504_v9  ;;  %5470 = vmatprep.mubr.f32.mxu0 %v10788_v38  ;;  %v10948_v9 = vld [vmem:[#allocation32_spill] sm:$0xff] }
 0x5d2   :  { %7936 = vmatprep.subr.bf16.mxu0 %v9508_v43  ;;  %v10949_v43 = vld [vmem:[#allocation33_spill] sm:$0xff] }
 0x5d5   :  { %7938 = vmatpush1.bf16.msra.mxu0 %v9515_v32  ;;  %v10950_v32 = vld [vmem:[#allocation34_spill] sm:$0xff] }
 0x5d6   :  { %7940 = vmatprep.subr.bf16.mxu0 %v9519_v3  ;;  %v10951_v3 = vld [vmem:[#allocation35_spill] sm:$0xff] }
 0x5d9   :  { %7942 = vmatpush1.bf16.msra.mxu0 %v9529_v34  ;;  %v10952_v34 = vld [vmem:[#allocation36_spill] sm:$0xff] }
 0x5da   :  { %7944 = vmatprep.subr.bf16.mxu0 %v9533_v0  ;;  %v10953_v0 = vld [vmem:[#allocation12_spill] sm:$0xff] }
 0x5dd   :  { %7946 = vmatpush1.bf16.msra.mxu0 %v9538_v37  ;;  %v10954_v37 = vmax.f32 %v10953_v0, 0.0 }
 0x5de   :  { %7948 = vmatprep.subr.bf16.mxu0 %v9542_v36  ;;  %v10955_v36 = vld [vmem:[#allocation37_spill] sm:$0xff] }
 0x5e1   :  { %7950 = vmatpush1.bf16.msra.mxu0 %v9546_v47  ;;  %v10956_v47 = vld [vmem:[#allocation38_spill] sm:$0xff] }
 0x5e2   :  { %7952 = vmatprep.subr.bf16.mxu0 %v10830_v63  ;;  %v10959_v63 = vld [vmem:[#allocation42_spill] sm:$0xff] }
 0x5e5   :  { %7954 = vmatpush1.bf16.msra.mxu0 %v10831_v27  ;;  %v10960_v27 = vld [vmem:[#allocation43_spill] sm:$0xff] }
 0x5e6   :  { %7956 = vmatprep.subr.bf16.mxu0 %v10898_v57  ;;  %v10961_v57 = vld [vmem:[#allocation44_spill] sm:$0xff] }
 0x5e9   :  { %7958 = vmatpush1.bf16.msra.mxu0 %v10899_v49  ;;  %v10962_v49 = vld [vmem:[#allocation45_spill] sm:$0xff] }
 0x5ea   :  { %7960 = vmatprep.subr.bf16.mxu0 %v10933_v53  ;;  %v5709_v53 = vld [vmem:[%s10628_s7] sm:$0xff] }
 0x5eb   :  { %v8052_v59 = vpack.c.bf16 %v5710_v55, %v5709_v53 }
 0x5ed   :  { %7962 = vmatpush1.bf16.msra.mxu0 %v10934_v31  ;;  %v5712_v31 = vld [vmem:[%s10628_s7 + $0x18] sm:$0xff] }
 0x5ee   :  { %7964 = vmatprep.subr.bf16.mxu0 %v10935_v6  ;;  %v8055_v6 = vpack.c.bf16 %v5712_v31, %v5711_v10 }
 0x5f0   :  { %5471 = vmatmul.mubr.f32.vlgmr.msra.gmra.mrb[74].mxu0 %v10936_v11  ;;  %v5714_v11 = vld [vmem:[%s10628_s7 + $0x28] sm:$0xff] }
 0x5f1   :  { %7966 = vmatpush1.bf16.msra.mxu0 %v10937_v54  ;;  %5543 = vmatprep.mubr.f32.mxu0 %v10788_v38  ;;  %v8058_v14 = vpack.c.bf16 %v5714_v11, %v5713_v8  ;;  %v5716_v54 = vld [vmem:[%s10628_s7 + $0x38] sm:$0xff] }
 0x5f2   :  { %7968 = vmatprep.subr.bf16.mxu0 %v10938_v62  ;;  %v8061_v62 = vpack.c.bf16 %v5716_v54, %v5715_v48 }
 0x5f5   :  { %7970 = vmatpush1.bf16.msra.mxu0 %v10939_v51  ;;  %v5719_v51 = vld [vmem:[%s10628_s7 + $0x50] sm:$0xff] }
 0x5f6   :  { %7972 = vmatprep.subr.bf16.mxu0 %v10940_v58  ;;  %v5720_v58 = vld [vmem:[%s10628_s7 + $0x58] sm:$0xff] }
 0x5f7   :  { %v8067_v30 = vpack.c.bf16 %v5720_v58, %v5719_v51 }
 0x5f9   :  { %7974 = vmatpush1.bf16.msra.mxu0 %v10941_v5 }
 0x5fa   :  { %7976 = vmatprep.subr.bf16.mxu0 %v10942_v22 }
 0x5fd   :  { %7978 = vmatpush1.bf16.msra.mxu0 %v10943_v50 }
 0x5fe   :  { %7980 = vmatprep.subr.bf16.mxu0 %v10944_v1 }
 0x601   :  { %7982 = vmatpush1.bf16.msra.mxu0 %v10945_v35  ;;  %v8369_v35 = vld [vmem:[%s10625_s4] ss:$0 sm:$0xff] }
 0x602   :  { %7984 = vmatprep.subr.bf16.mxu0 %v10946_v25 }
 0x605   :  { %7986 = vmatpush1.bf16.msra.mxu0 %v10947_v60 }
 0x606   :  { %7988 = vmatprep.subr.bf16.mxu0 %v10948_v9  ;;  %v5721_v9 = vld [vmem:[%s10628_s7 + $0x60] sm:$0xff] }
 0x609   :  { %7990 = vmatpush1.bf16.msra.mxu0 %v10949_v43  ;;  %v5722_v43 = vld [vmem:[%s10628_s7 + $0x68] sm:$0xff] }
 0x60a   :  { %7992 = vmatprep.subr.bf16.mxu0 %v10950_v32  ;;  %v8070_v2 = vpack.c.bf16 %v5722_v43, %v5721_v9  ;;  %v5803_v32 = vld [vmem:[#allocation4] sm:$0xff] }
 0x60d   :  { %7994 = vmatpush1.bf16.msra.mxu0 %v10951_v3  ;;  %v5804_v3 = vld [vmem:[#allocation4 + $0x8] sm:$0xff] }
 0x60e   :  { %7996 = vmatprep.subr.bf16.mxu0 %v10952_v34  ;;  %v5805_v34 = vld [vmem:[#allocation4 + $0x10] sm:$0xff]  ;;  %v8076_v0 = vpack.c.bf16 %v5804_v3, %v5803_v32 }
 0x610   :  { %5544 = vmatmul.mubr.f32.vlgmr.msra.gmra.mrb[74].mxu0 %v10954_v37  ;;  %v5806_v37 = vld [vmem:[#allocation4 + $0x18] sm:$0xff] }
 0x611   :  { %7998 = vmatpush1.bf16.msra.mxu0 %v10955_v36  ;;  %5616 = vmatprep.mubr.f32.mxu0 %v10788_v38  ;;  %v8079_v36 = vpack.c.bf16 %v5806_v37, %v5805_v34 }
 0x612   :  { %8000 = vmatprep.subr.bf16.mxu0 %v10956_v47  ;;  %v5807_v47 = vld [vmem:[#allocation4 + $0x20] sm:$0xff] }
 0x615   :  { %8002 = vmatpush1.bf16.msra.mxu0 %v10957_v29  ;;  %v5808_v29 = vld [vmem:[#allocation4 + $0x28] sm:$0xff] }
 0x616   :  { %8004 = vmatprep.subr.bf16.mxu0 %v10958_v46  ;;  %v8082_v46 = vpack.c.bf16 %v5808_v29, %v5807_v47 }
 0x619   :  { %8006 = vmatpush1.bf16.msra.mxu0 %v10959_v63  ;;  %v5809_v63 = vld [vmem:[#allocation4 + $0x30] sm:$0xff] }
 0x61a   :  { %8008 = vmatprep.subr.bf16.mxu0 %v10960_v27  ;;  %v5810_v27 = vld [vmem:[#allocation4 + $0x38] sm:$0xff] }
 0x61d   :  { %8010 = vmatpush1.bf16.msra.mxu0 %v10961_v57  ;;  %v8085_v57 = vpack.c.bf16 %v5810_v27, %v5809_v63 }
 0x61e   :  { %8012 = vmatprep.subr.bf16.mxu0 %v10962_v49  ;;  %v5811_v49 = vld [vmem:[#allocation4 + $0x40] sm:$0xff] }
 0x621   :  { %8014 = vmatpush1.bf16.msra.mxu0 %v10963_v7  ;;  %v5812_v7 = vld [vmem:[#allocation4 + $0x48] sm:$0xff] }
 0x622   :  { %8016 = vmatprep.subr.bf16.mxu0 %v10964_v16  ;;  %v8088_v16 = vpack.c.bf16 %v5812_v7, %v5811_v49 }
 0x625   :  { %8018 = vmatpush1.bf16.msra.mxu0 %v10965_v21  ;;  %v5813_v21 = vld [vmem:[#allocation4 + $0x50] sm:$0xff] }
 0x626   :  { %8020 = vmatprep.subr.bf16.mxu0 %v10966_v56  ;;  %v5814_v56 = vld [vmem:[#allocation4 + $0x58] sm:$0xff] }
 0x629   :  { %8022 = vmatpush1.bf16.msra.mxu0 %v10967_v13  ;;  %v8091_v13 = vpack.c.bf16 %v5814_v56, %v5813_v21 }
 0x62a   :  { %8024 = vmatprep.subr.bf16.mxu0 %v10968_v4  ;;  %v5815_v4 = vld [vmem:[#allocation4 + $0x60] sm:$0xff] }
 0x62d   :  { %8026 = vmatpush1.bf16.msra.mxu0 %v10969_v24  ;;  %v5816_v24 = vld [vmem:[#allocation4 + $0x68] sm:$0xff] }
 0x62e   :  { %8051 = vmatprep.subr.bf16.mxu0 %v10931_v45  ;;  %v8094_v23 = vpack.c.bf16 %v5816_v24, %v5815_v4 }
 0x630   :  { %5617 = vmatmul.mubr.f32.vlgmr.msra.gmra.mrb[74].mxu0 %v2271_v18 }
 0x631   :  { %6537 = vmatprep.mubr.msk.f32.mxu0 %vm8427_vm4, %v10788_v38  ;;  %8053 = vmatpush3.bf16.msra.mxu0 %v8052_v59  ;;  %v5896_v59 = vlaneseq }
 0x632   :  { %8054 = vmatprep.subr.bf16.mxu0 %v10931_v45 }
 0x633   :  { %v5897_v31 = vand.u32 127, %v5896_v59 }
 0x635   :  { %8056 = vmatpush3.bf16.msra.mxu0 %v8055_v6  ;;  %vm5898_vm5 = vcmp.lt.s32.totalorder %v5897_v31, 10 }
 0x636   :  { %8057 = vmatprep.subr.bf16.mxu0 %v10931_v45 }
 0x639   :  { %8059 = vmatpush3.bf16.msra.mxu0 %v8058_v14 }
 0x63a   :  { %8060 = vmatprep.subr.bf16.mxu0 %v10931_v45 }
 0x63d   :  { %8062 = vmatpush3.bf16.msra.mxu0 %v8061_v62 }
 0x63e   :  { %8063 = vmatprep.subr.bf16.mxu0 %v10931_v45 }
 0x641   :  { %8065 = vmatpush3.bf16.msra.mxu0 %v8064_v17 }
 0x642   :  { %8066 = vmatprep.subr.bf16.mxu0 %v10931_v45 }
 0x645   :  { %8068 = vmatpush3.bf16.msra.mxu0 %v8067_v30 }
 0x646   :  { %8069 = vmatprep.subr.bf16.mxu0 %v10931_v45 }
 0x649   :  { %8071 = vmatpush3.bf16.msra.mxu0 %v8070_v2 }
 0x64a   :  { %8072 = vmatprep.subr.bf16.mxu0 %v10931_v45 }
 0x663   :  { %v4897_v41 = vpop.f32.mrb[72].mxu0 }
 0x664   :  { %v10522_v39 = vadd.f32 %v4897_v41, %v10971_v61  ;;  %v6469_v15 = vpop.f32.mrb[73].mxu0  ;;  %v6260_v41 = vld [vmem:[%s10627_s6] ss:$0 sm:$0xff] }
 0x703   :  { %v5618_v5 = vpop.f32.mrb[74].mxu0 }
 0x704   :  { %v5620_v22 = vpop.f32.mrb[75].mxu0 }
 0x705   :  { %v5625_v50 = vmax.f32 %v5618_v5, %v5620_v22 }
 0x707   :  { %v5626_v1 = vmax.f32 %v5263_v33, %v5625_v50 }
 0x709   :  { %v5627_v25 = vadd.f32 %v8369_v35, %v5626_v1 }
 0x70b   :  { %v5628_v60 = vmax.f32 %v5627_v25, 0.0 }
 0x70d   :  { %6503 = vmatmul.mubr.f32.vlgmr.msra.gmra.mrb[74].mxu1 %v5628_v60 }
 0x70e   :  { %6572 = vmatprep.mubr.msk.f32.mxu1 %vm8427_vm4, %v10788_v38  ;;  %v5724_v38 = vld [vmem:[%s10628_s7 + $0x78] sm:$0xff]  ;;  %8077 = vmatpush3.bf16.msra.mxu1 %v8076_v0 }
 0x70f   :  { %v8073_v33 = vpack.c.bf16 %v5724_v38, %v5723_v52  ;;  %8078 = vmatprep.subr.bf16.mxu1 %v10931_v45 }
 0x711   :  { %8074 = vmatpush3.bf16.msra.mxu0 %v8073_v33 }
 0x712   :  { %8080 = vmatpush3.bf16.msra.mxu1 %v8079_v36 }
 0x713   :  { %8081 = vmatprep.subr.bf16.mxu1 %v10931_v45 }
 0x716   :  { %8083 = vmatpush3.bf16.msra.mxu1 %v8082_v46 }
 0x717   :  { %8084 = vmatprep.subr.bf16.mxu1 %v10931_v45 }
 0x71a   :  { %8086 = vmatpush3.bf16.msra.mxu1 %v8085_v57 }
 0x71b   :  { %8087 = vmatprep.subr.bf16.mxu1 %v10931_v45 }
 0x71e   :  { %8089 = vmatpush3.bf16.msra.mxu1 %v8088_v16 }
 0x71f   :  { %8090 = vmatprep.subr.bf16.mxu1 %v10931_v45 }
 0x722   :  { %8092 = vmatpush3.bf16.msra.mxu1 %v8091_v13 }
 0x723   :  { %8093 = vmatprep.subr.bf16.mxu1 %v10931_v45 }
 0x726   :  { %8095 = vmatpush3.bf16.msra.mxu1 %v8094_v23 }
 0x727   :  { %8096 = vmatprep.subr.bf16.mxu1 %v10931_v45 }
 0x72a   :  { %8098 = vmatpush3.bf16.msra.mxu1 %v8097_v44 }
 0x7e0   :  { %v5695_v18 = vpop.f32.mrb[74].mxu1 }
 0x7e1   :  { %v5699_v61 = vadd.f32 %v5695_v18, %v10522_v39  ;;  %v6504_v15 = vpop.f32.mrb[75].mxu1  ;;  %v6262_v39 = vld [vmem:[%s10631_s10] ss:$0 sm:$0xff] }
 0x7e3   :  { %v5707_v40 = vadd.f32 %v6260_v41, %v5699_v61 }
 0x7e5   :  { %v5708_v19 = vmax.f32 %v5707_v40, 0.0 }
 0x7e7   :  { %6538 = vmatmul.mubr.f32.vlgmr.msra.gmra.mrb[76].mxu0 %v5708_v19 }
 0x8ba   :  { %v5798_v45 = vpop.f32.mrb[76].mxu0 }
 0x8bb   :  { %v5799_v53 = vadd.f32 %v6261_v26, %v5798_v45  ;;  %v6539_v55 = vpop.f32.mrb[77].mxu0 }
 0x8bd   :  { %v5802_v10 = vmax.f32 %v5799_v53, 0.0 }
 0x8bf   :  { %6573 = vmatmul.mubr.f32.vlgmr.msra.gmra.mrb[76].mxu1 %v5802_v10 }
 0x992   :  { %v5892_v6 = vpop.f32.mrb[76].mxu1 }
 0x993   :  { %v5893_v8 = vadd.f32 %v6262_v39, %v5892_v6  ;;  %v6574_v11 = vpop.f32.mrb[77].mxu1 }
 0x995   :  { %v5899_v14 = vsel %vm5898_vm5, %v5893_v8, -inf }
 0x996   :  { %5900 = vmax.xlane.f32.xlu0 %v5899_v14 }
 0xa23   :  { %v5901_v48 = vpop.xlane.xlu0 %5900 }
 0xa24   :  { %v5902_v54 = vsub.f32 %v5893_v8, %v5901_v48 }
 0xa26   :  { %v5903_v62 = vmul.f32 1.442695, %v5902_v54 }
 0xa28   :  { %8365 = vpow2.f32 %v5903_v62 }
 0xa32   :  { %v8366_v28 = vpop.eup %8365 }
 0xa33   :  { %v5905_v12 = vsel %vm5898_vm5, %v8366_v28, 0.0 }
 0xa34   :  { %5906 = vadd.xlane.f32.xlu0 %v5905_v12 }
 0xac1   :  { %v5907_v17 = vpop.xlane.xlu0 %5906 }
 0xac2   :  { %8367 = vlog2.f32 %v5907_v17 }
 0xacc   :  { %v8368_v51 = vpop.eup %8367 }
 0xacd   :  { %v5909_v58 = vmul.f32 0.6931472, %v8368_v51 }
 0xacf   :  { %v5910_v30 = vsub.f32 %v5902_v54, %v5909_v58 }
 0xad1   :  { %5911 = vst [vmem:[%s10632_s11] sm:$0xff] %v5910_v30 }
 0xad2   :  { %5916 = vsyncpa [#allocation3], 1 }
 0xad3   :  { %5917 = vsyncpa [#allocation5], 1 }

</bundles_post_ra>
